<compile_context>
chip_gen: v5e
topology: v5e:2x2
jax: 0.10.0
libtpu: 0.0.40
codegen_flags: <defaults>
</compile_context>

<pallas_src>
import functools

import numpy as np
import jax
import jax.numpy as jnp
from jax.experimental import pallas as pl
from jax.experimental.pallas import tpu as pltpu


# VMEM budgeting: one evc/out block is capped at _MAX_BLOCK_BYTES; total live
# footprint is ~6x that (double-buffered in/out + w/acc intermediates), i.e.
# ~24 MiB, which fits v7x's 64 MiB/TC and is far below v5e/v6e's 128 MiB.
_MAX_BLOCK_BYTES = 4 << 20
_VMEM_LIMIT_BYTES = 48 << 20
_LANE = 128


def _round_up(x, m):
    return (x + m - 1) // m * m


def _pade_spectrum(d, alpha, beta, num_sqrtm):
    """s = sum_k alpha_k (d - 1) / ((1 - beta_k) + beta_k d) on the clamped spectrum."""
    for _ in range(num_sqrtm):           # eigval ** (1 / 2**num_sqrtm), matches reference
        d = jnp.sqrt(d)
    dm1 = d - 1.0
    s = jnp.zeros_like(d)
    for a_k, b_k in zip(alpha, beta):    # static pade_order-long unrolled loop
        # approx reciprocal routes the divide to the (otherwise idle) EUP slot
        inv = pl.reciprocal((1.0 - b_k) + b_k * d, approx=True)
        s = s + (a_k * dm1) * inv
    return s


def _logm_lane_kernel(evl_ref, evc_ref, out_ref, *, alpha, beta, num_sqrtm):
    """Small-n path: batch on the 128-lane axis, reconstruction on the VPU.

    evl_ref: (n, bt)     eigenvalues (batch on lanes)
    evc_ref: (n, n, bt)  eigenvectors, evc[i, m, b] = V_b[i, m]
    out_ref: (n, n, bt)  log-matrix approximation
    """
    evc = evc_ref[...]
    d = jnp.maximum(evl_ref[...], 0.0)              # clamp to PSD spectrum
    s = _pade_spectrum(d, alpha, beta, num_sqrtm)   # (n, bt)
    w = evc * s[None, :, :]                         # scale eigenvector m by s[m]

    n = evc.shape[0]
    # out[i, k, b] = sum_m w[i, m, b] * evc[k, m, b]: rank-1 outer-product
    # accumulation on the VPU — every op uses all 128 lanes, no MXU push/drain
    # latency, and the store is fully lane-dense (no masked 16-lane vst).
    acc = jnp.zeros(out_ref.shape, jnp.float32)
    for m in range(n):                              # static, n <= 32
        acc = acc + w[:, m, :][:, None, :] * evc[:, m, :][None, :, :]
    out_ref[...] = acc.astype(out_ref.dtype)


def _logm_mxu_kernel(evl_ref, evc_ref, out_ref, *, alpha, beta, num_sqrtm):
    """Large-n path: per-matrix MXU reconstruction, bf16 operands / f32 accumulate.

    evl_ref: (bt, n); evc_ref/out_ref: (bt, n, n)
    """
    evc = evc_ref[...]
    d = jnp.maximum(evl_ref[...], 0.0)
    s = _pade_spectrum(d, alpha, beta, num_sqrtm)   # (bt, n)
    w = (evc * s[:, None, :]).astype(jnp.bfloat16)
    # Contract the LAST dims of both operands (no explicit XLU transpose).
    out = jnp.einsum("bim,bkm->bik", w, evc.astype(jnp.bfloat16),
                     preferred_element_type=jnp.float32)
    out_ref[...] = out.astype(out_ref.dtype)


def matrix_logm(matA, num_sqrtm=8, pade_order=8):
    """JAX/Pallas equivalent of TorchMatrixLogm(num_sqrtm, pade_order).forward."""
    shape = matA.shape
    n = shape[-1]
    a = matA.reshape(-1, n, n).astype(jnp.float32)
    b = a.shape[0]

    # TODO(synk): torch.linalg.eigh has no Pallas equivalent; computed as XLA glue.
    evl, evc = jnp.linalg.eigh(a)                   # (b, n), (b, n, n)

    # Deterministic "parameters" from the module __init__ (Gauss-Legendre).
    node, weight = np.polynomial.legendre.leggauss(pade_order)
    alpha = tuple(float(w) * (2.0 ** (num_sqrtm - 1)) for w in weight)
    beta = tuple(float((x + 1.0) / 2.0) for x in node)

    compiler_params = pltpu.CompilerParams(
        dimension_semantics=("parallel",),
        vmem_limit_bytes=_VMEM_LIMIT_BYTES,
    )

    if n <= 32:
        # Lane-batched VPU path: lane-dense blocks (last dim = batch, multiple
        # of 128). Pad the batch up to a multiple of bt instead of shrinking bt.
        cap = max(_LANE, (_MAX_BLOCK_BYTES // (n * n * 4)) // _LANE * _LANE)
        bt = min(cap, _round_up(b, _LANE))
        b_pad = _round_up(b, bt)
        evl_t = jnp.transpose(evl, (1, 0))          # (n, b)
        evc_t = jnp.transpose(evc, (1, 2, 0))       # (n, n, b)
        if b_pad != b:
            evl_t = jnp.pad(evl_t, ((0, 0), (0, b_pad - b)))
            evc_t = jnp.pad(evc_t, ((0, 0), (0, 0), (0, b_pad - b)))
        kernel = functools.partial(_logm_lane_kernel, alpha=alpha, beta=beta,
                                   num_sqrtm=num_sqrtm)
        out_t = pl.pallas_call(
            kernel,
            out_shape=jax.ShapeDtypeStruct((n, n, b_pad), jnp.float32),
            grid=(b_pad // bt,),
            in_specs=[
                pl.BlockSpec((n, bt), lambda i: (0, i)),        # eigenvalues
                pl.BlockSpec((n, n, bt), lambda i: (0, 0, i)),  # eigenvectors
            ],
            out_specs=pl.BlockSpec((n, n, bt), lambda i: (0, 0, i)),
            compiler_params=compiler_params,
        )(evl_t, evc_t)
        out = jnp.transpose(out_t, (2, 0, 1))[:b]
    else:
        # MXU path for large matrices: batch-leading blocks, bf16 matmul inputs.
        per_mat = (2 * n * n + n) * 4
        bt = max(1, min(b, _MAX_BLOCK_BYTES // per_mat))
        b_pad = _round_up(b, bt)                    # pad instead of shrinking bt
        evl_p, evc_p = evl, evc
        if b_pad != b:
            evl_p = jnp.pad(evl, ((0, b_pad - b), (0, 0)))
            evc_p = jnp.pad(evc, ((0, b_pad - b), (0, 0), (0, 0)))
        kernel = functools.partial(_logm_mxu_kernel, alpha=alpha, beta=beta,
                                   num_sqrtm=num_sqrtm)
        out = pl.pallas_call(
            kernel,
            out_shape=jax.ShapeDtypeStruct((b_pad, n, n), jnp.float32),
            grid=(b_pad // bt,),
            in_specs=[
                pl.BlockSpec((bt, n), lambda i: (i, 0)),        # eigenvalues
                pl.BlockSpec((bt, n, n), lambda i: (i, 0, 0)),  # eigenvectors
            ],
            out_specs=pl.BlockSpec((bt, n, n), lambda i: (i, 0, 0)),
            compiler_params=compiler_params,
        )(evl_p, evc_p)
        out = out[:b]

    return out.reshape(shape)


def reference_logm(matA, num_sqrtm=8, pade_order=8):
    """Pure-JAX re-implementation of the PyTorch forward (for verification)."""
    node, weight = np.polynomial.legendre.leggauss(pade_order)
    alpha = jnp.asarray(weight * 2.0 ** (num_sqrtm - 1), jnp.float32).reshape(-1, 1, 1, 1)
    beta = jnp.asarray((node + 1.0) / 2.0, jnp.float32).reshape(-1, 1, 1, 1)
    shape = matA.shape
    n = shape[-1]
    a = matA.reshape(-1, n, n).astype(jnp.float32)
    evl, evc = jnp.linalg.eigh(a)
    d = jnp.maximum(evl, 0.0)
    for _ in range(num_sqrtm):
        d = jnp.sqrt(d)
    torch1 = (evc * d[:, None, :]) @ jnp.swapaxes(evc, -1, -2)
    eye = jnp.eye(n, dtype=jnp.float32)
    tmp0 = (1.0 - beta) * eye + beta * torch1
    tmp1 = alpha * torch1 - alpha * eye
    return jnp.linalg.solve(tmp0, tmp1).sum(axis=0).reshape(shape)


if __name__ == "__main__":
    key = jax.random.PRNGKey(0)
    B, C, N = 2, 4, 16
    x = jax.random.normal(key, (B * C, N, N), dtype=jnp.float32)
    # Symmetric positive-definite input (PSD + diagonal shift).
    matA = (x @ jnp.swapaxes(x, -1, -2)) / N + 0.5 * jnp.eye(N, dtype=jnp.float32)
    matA = matA.reshape(B, C, N, N)

    out = matrix_logm(matA)
    out = jax.block_until_ready(out)

    ref = reference_logm(matA)
    assert out.shape == matA.shape
    assert bool(jnp.all(jnp.isfinite(out)))
    assert bool(jnp.allclose(out, ref, rtol=2e-2, atol=2e-3)), (
        "max abs err = %f" % float(jnp.max(jnp.abs(out - ref)))
    )
    print("KERNEL_OK")
</pallas_src>

<mosaic_0001>
module attributes {stable_mosaic.version = 11 : i64} {
  func.func @_logm_lane_kernel(%arg0: i32, %arg1: memref<16x128xf32, #tpu.memory_space<vmem>>, %arg2: memref<16x16x128xf32, #tpu.memory_space<vmem>>, %arg3: memref<16x16x128xf32, #tpu.memory_space<vmem>>) attributes {dimension_semantics = [#tpu.dimension_semantics<parallel>], iteration_bounds = array<i64: 1>, scalar_prefetch = 0 : i64, scratch_operands = 0 : i64, tpu.core_type = #tpu.core_type<tc>, window_params = [{transform_indices = @transform_0, window_bounds = array<i64: 16, 128>}, {transform_indices = @transform_1, window_bounds = array<i64: 16, 16, 128>}, {transform_indices = @transform_2, window_bounds = array<i64: 16, 16, 128>}]} {
    %c0 = arith.constant 0 : index
    %c0_0 = arith.constant 0 : index
    %c0_1 = arith.constant 0 : index
    %0 = vector.load %arg2[%c0, %c0_0, %c0_1] : memref<16x16x128xf32, #tpu.memory_space<vmem>>, vector<16x16x128xf32>
    %c0_2 = arith.constant 0 : index
    %c0_3 = arith.constant 0 : index
    %1 = vector.load %arg1[%c0_2, %c0_3] : memref<16x128xf32, #tpu.memory_space<vmem>>, vector<16x128xf32>
    %cst = arith.constant 0.000000e+00 : f32
    %2 = vector.broadcast %cst : f32 to vector<16x128xf32>
    %3 = arith.maximumf %1, %2 : vector<16x128xf32>
    %4 = math.sqrt %3 : vector<16x128xf32>
    %5 = math.sqrt %4 : vector<16x128xf32>
    %6 = math.sqrt %5 : vector<16x128xf32>
    %7 = math.sqrt %6 : vector<16x128xf32>
    %8 = math.sqrt %7 : vector<16x128xf32>
    %9 = math.sqrt %8 : vector<16x128xf32>
    %10 = math.sqrt %9 : vector<16x128xf32>
    %11 = math.sqrt %10 : vector<16x128xf32>
    %cst_4 = arith.constant 1.000000e+00 : f32
    %12 = vector.broadcast %cst_4 : f32 to vector<16x128xf32>
    %13 = arith.subf %11, %12 : vector<16x128xf32>
    %cst_5 = arith.constant 0.000000e+00 : f32
    %14 = vector.broadcast %cst_5 : f32 to vector<16x128xf32>
    %cst_6 = arith.constant 0.0198550709 : f32
    %15 = vector.broadcast %cst_6 : f32 to vector<16x128xf32>
    %16 = arith.mulf %15, %11 : vector<16x128xf32>
    %cst_7 = arith.constant 0.980144917 : f32
    %17 = vector.broadcast %cst_7 : f32 to vector<16x128xf32>
    %18 = arith.addf %17, %16 : vector<16x128xf32>
    %19 = tpu.reciprocal %18 {approx = true} : vector<16x128xf32> -> vector<16x128xf32>
    %cst_8 = arith.constant 12.9572525 : f32
    %20 = vector.broadcast %cst_8 : f32 to vector<16x128xf32>
    %21 = arith.mulf %20, %13 : vector<16x128xf32>
    %22 = arith.mulf %21, %19 : vector<16x128xf32>
    %23 = arith.addf %14, %22 : vector<16x128xf32>
    %cst_9 = arith.constant 0.101666763 : f32
    %24 = vector.broadcast %cst_9 : f32 to vector<16x128xf32>
    %25 = arith.mulf %24, %11 : vector<16x128xf32>
    %cst_10 = arith.constant 0.898333251 : f32
    %26 = vector.broadcast %cst_10 : f32 to vector<16x128xf32>
    %27 = arith.addf %26, %25 : vector<16x128xf32>
    %28 = tpu.reciprocal %27 {approx = true} : vector<16x128xf32> -> vector<16x128xf32>
    %cst_11 = arith.constant 28.4647732 : f32
    %29 = vector.broadcast %cst_11 : f32 to vector<16x128xf32>
    %30 = arith.mulf %29, %13 : vector<16x128xf32>
    %31 = arith.mulf %30, %28 : vector<16x128xf32>
    %32 = arith.addf %23, %31 : vector<16x128xf32>
    %cst_12 = arith.constant 0.237233788 : f32
    %33 = vector.broadcast %cst_12 : f32 to vector<16x128xf32>
    %34 = arith.mulf %33, %11 : vector<16x128xf32>
    %cst_13 = arith.constant 0.762766182 : f32
    %35 = vector.broadcast %cst_13 : f32 to vector<16x128xf32>
    %36 = arith.addf %35, %34 : vector<16x128xf32>
    %37 = tpu.reciprocal %36 {approx = true} : vector<16x128xf32> -> vector<16x128xf32>
    %cst_14 = arith.constant 40.1544495 : f32
    %38 = vector.broadcast %cst_14 : f32 to vector<16x128xf32>
    %39 = arith.mulf %38, %13 : vector<16x128xf32>
    %40 = arith.mulf %39, %37 : vector<16x128xf32>
    %41 = arith.addf %32, %40 : vector<16x128xf32>
    %cst_15 = arith.constant 0.408282667 : f32
    %42 = vector.broadcast %cst_15 : f32 to vector<16x128xf32>
    %43 = arith.mulf %42, %11 : vector<16x128xf32>
    %cst_16 = arith.constant 0.591717303 : f32
    %44 = vector.broadcast %cst_16 : f32 to vector<16x128xf32>
    %45 = arith.addf %44, %43 : vector<16x128xf32>
    %46 = tpu.reciprocal %45 {approx = true} : vector<16x128xf32> -> vector<16x128xf32>
    %cst_17 = arith.constant 46.4235229 : f32
    %47 = vector.broadcast %cst_17 : f32 to vector<16x128xf32>
    %48 = arith.mulf %47, %13 : vector<16x128xf32>
    %49 = arith.mulf %48, %46 : vector<16x128xf32>
    %50 = arith.addf %41, %49 : vector<16x128xf32>
    %cst_18 = arith.constant 0.591717303 : f32
    %51 = vector.broadcast %cst_18 : f32 to vector<16x128xf32>
    %52 = arith.mulf %51, %11 : vector<16x128xf32>
    %cst_19 = arith.constant 0.408282667 : f32
    %53 = vector.broadcast %cst_19 : f32 to vector<16x128xf32>
    %54 = arith.addf %53, %52 : vector<16x128xf32>
    %55 = tpu.reciprocal %54 {approx = true} : vector<16x128xf32> -> vector<16x128xf32>
    %cst_20 = arith.constant 46.4235229 : f32
    %56 = vector.broadcast %cst_20 : f32 to vector<16x128xf32>
    %57 = arith.mulf %56, %13 : vector<16x128xf32>
    %58 = arith.mulf %57, %55 : vector<16x128xf32>
    %59 = arith.addf %50, %58 : vector<16x128xf32>
    %cst_21 = arith.constant 0.762766182 : f32
    %60 = vector.broadcast %cst_21 : f32 to vector<16x128xf32>
    %61 = arith.mulf %60, %11 : vector<16x128xf32>
    %cst_22 = arith.constant 0.237233788 : f32
    %62 = vector.broadcast %cst_22 : f32 to vector<16x128xf32>
    %63 = arith.addf %62, %61 : vector<16x128xf32>
    %64 = tpu.reciprocal %63 {approx = true} : vector<16x128xf32> -> vector<16x128xf32>
    %cst_23 = arith.constant 40.1544495 : f32
    %65 = vector.broadcast %cst_23 : f32 to vector<16x128xf32>
    %66 = arith.mulf %65, %13 : vector<16x128xf32>
    %67 = arith.mulf %66, %64 : vector<16x128xf32>
    %68 = arith.addf %59, %67 : vector<16x128xf32>
    %cst_24 = arith.constant 0.898333251 : f32
    %69 = vector.broadcast %cst_24 : f32 to vector<16x128xf32>
    %70 = arith.mulf %69, %11 : vector<16x128xf32>
    %cst_25 = arith.constant 0.101666763 : f32
    %71 = vector.broadcast %cst_25 : f32 to vector<16x128xf32>
    %72 = arith.addf %71, %70 : vector<16x128xf32>
    %73 = tpu.reciprocal %72 {approx = true} : vector<16x128xf32> -> vector<16x128xf32>
    %cst_26 = arith.constant 28.4647732 : f32
    %74 = vector.broadcast %cst_26 : f32 to vector<16x128xf32>
    %75 = arith.mulf %74, %13 : vector<16x128xf32>
    %76 = arith.mulf %75, %73 : vector<16x128xf32>
    %77 = arith.addf %68, %76 : vector<16x128xf32>
    %cst_27 = arith.constant 0.980144917 : f32
    %78 = vector.broadcast %cst_27 : f32 to vector<16x128xf32>
    %79 = arith.mulf %78, %11 : vector<16x128xf32>
    %cst_28 = arith.constant 0.0198550709 : f32
    %80 = vector.broadcast %cst_28 : f32 to vector<16x128xf32>
    %81 = arith.addf %80, %79 : vector<16x128xf32>
    %82 = tpu.reciprocal %81 {approx = true} : vector<16x128xf32> -> vector<16x128xf32>
    %cst_29 = arith.constant 12.9572525 : f32
    %83 = vector.broadcast %cst_29 : f32 to vector<16x128xf32>
    %84 = arith.mulf %83, %13 : vector<16x128xf32>
    %85 = arith.mulf %84, %82 : vector<16x128xf32>
    %86 = arith.addf %77, %85 : vector<16x128xf32>
    %87 = vector.shape_cast %86 : vector<16x128xf32> to vector<1x16x128xf32>
    %88 = vector.broadcast %87 : vector<1x16x128xf32> to vector<16x16x128xf32>
    %89 = arith.mulf %0, %88 : vector<16x16x128xf32>
    %cst_30 = arith.constant 0.000000e+00 : f32
    %90 = vector.broadcast %cst_30 : f32 to vector<16x16x128xf32>
    %91 = vector.extract_strided_slice %89 {offsets = [0, 0, 0], sizes = [16, 1, 128], strides = [1, 1, 1]} : vector<16x16x128xf32> to vector<16x1x128xf32>
    %92 = vector.shape_cast %91 : vector<16x1x128xf32> to vector<16x128xf32>
    %93 = vector.shape_cast %92 : vector<16x128xf32> to vector<16x1x128xf32>
    %94 = vector.extract_strided_slice %0 {offsets = [0, 0, 0], sizes = [16, 1, 128], strides = [1, 1, 1]} : vector<16x16x128xf32> to vector<16x1x128xf32>
    %95 = vector.shape_cast %94 : vector<16x1x128xf32> to vector<16x128xf32>
    %96 = vector.shape_cast %95 : vector<16x128xf32> to vector<1x16x128xf32>
    %97 = vector.broadcast %93 : vector<16x1x128xf32> to vector<16x16x128xf32>
    %98 = vector.broadcast %96 : vector<1x16x128xf32> to vector<16x16x128xf32>
    %99 = arith.mulf %97, %98 : vector<16x16x128xf32>
    %100 = arith.addf %90, %99 : vector<16x16x128xf32>
    %101 = vector.extract_strided_slice %89 {offsets = [0, 1, 0], sizes = [16, 1, 128], strides = [1, 1, 1]} : vector<16x16x128xf32> to vector<16x1x128xf32>
    %102 = vector.shape_cast %101 : vector<16x1x128xf32> to vector<16x128xf32>
    %103 = vector.shape_cast %102 : vector<16x128xf32> to vector<16x1x128xf32>
    %104 = vector.extract_strided_slice %0 {offsets = [0, 1, 0], sizes = [16, 1, 128], strides = [1, 1, 1]} : vector<16x16x128xf32> to vector<16x1x128xf32>
    %105 = vector.shape_cast %104 : vector<16x1x128xf32> to vector<16x128xf32>
    %106 = vector.shape_cast %105 : vector<16x128xf32> to vector<1x16x128xf32>
    %107 = vector.broadcast %103 : vector<16x1x128xf32> to vector<16x16x128xf32>
    %108 = vector.broadcast %106 : vector<1x16x128xf32> to vector<16x16x128xf32>
    %109 = arith.mulf %107, %108 : vector<16x16x128xf32>
    %110 = arith.addf %100, %109 : vector<16x16x128xf32>
    %111 = vector.extract_strided_slice %89 {offsets = [0, 2, 0], sizes = [16, 1, 128], strides = [1, 1, 1]} : vector<16x16x128xf32> to vector<16x1x128xf32>
    %112 = vector.shape_cast %111 : vector<16x1x128xf32> to vector<16x128xf32>
    %113 = vector.shape_cast %112 : vector<16x128xf32> to vector<16x1x128xf32>
    %114 = vector.extract_strided_slice %0 {offsets = [0, 2, 0], sizes = [16, 1, 128], strides = [1, 1, 1]} : vector<16x16x128xf32> to vector<16x1x128xf32>
    %115 = vector.shape_cast %114 : vector<16x1x128xf32> to vector<16x128xf32>
    %116 = vector.shape_cast %115 : vector<16x128xf32> to vector<1x16x128xf32>
    %117 = vector.broadcast %113 : vector<16x1x128xf32> to vector<16x16x128xf32>
    %118 = vector.broadcast %116 : vector<1x16x128xf32> to vector<16x16x128xf32>
    %119 = arith.mulf %117, %118 : vector<16x16x128xf32>
    %120 = arith.addf %110, %119 : vector<16x16x128xf32>
    %121 = vector.extract_strided_slice %89 {offsets = [0, 3, 0], sizes = [16, 1, 128], strides = [1, 1, 1]} : vector<16x16x128xf32> to vector<16x1x128xf32>
    %122 = vector.shape_cast %121 : vector<16x1x128xf32> to vector<16x128xf32>
    %123 = vector.shape_cast %122 : vector<16x128xf32> to vector<16x1x128xf32>
    %124 = vector.extract_strided_slice %0 {offsets = [0, 3, 0], sizes = [16, 1, 128], strides = [1, 1, 1]} : vector<16x16x128xf32> to vector<16x1x128xf32>
    %125 = vector.shape_cast %124 : vector<16x1x128xf32> to vector<16x128xf32>
    %126 = vector.shape_cast %125 : vector<16x128xf32> to vector<1x16x128xf32>
    %127 = vector.broadcast %123 : vector<16x1x128xf32> to vector<16x16x128xf32>
    %128 = vector.broadcast %126 : vector<1x16x128xf32> to vector<16x16x128xf32>
    %129 = arith.mulf %127, %128 : vector<16x16x128xf32>
    %130 = arith.addf %120, %129 : vector<16x16x128xf32>
    %131 = vector.extract_strided_slice %89 {offsets = [0, 4, 0], sizes = [16, 1, 128], strides = [1, 1, 1]} : vector<16x16x128xf32> to vector<16x1x128xf32>
    %132 = vector.shape_cast %131 : vector<16x1x128xf32> to vector<16x128xf32>
    %133 = vector.shape_cast %132 : vector<16x128xf32> to vector<16x1x128xf32>
    %134 = vector.extract_strided_slice %0 {offsets = [0, 4, 0], sizes = [16, 1, 128], strides = [1, 1, 1]} : vector<16x16x128xf32> to vector<16x1x128xf32>
    %135 = vector.shape_cast %134 : vector<16x1x128xf32> to vector<16x128xf32>
    %136 = vector.shape_cast %135 : vector<16x128xf32> to vector<1x16x128xf32>
    %137 = vector.broadcast %133 : vector<16x1x128xf32> to vector<16x16x128xf32>
    %138 = vector.broadcast %136 : vector<1x16x128xf32> to vector<16x16x128xf32>
    %139 = arith.mulf %137, %138 : vector<16x16x128xf32>
    %140 = arith.addf %130, %139 : vector<16x16x128xf32>
    %141 = vector.extract_strided_slice %89 {offsets = [0, 5, 0], sizes = [16, 1, 128], strides = [1, 1, 1]} : vector<16x16x128xf32> to vector<16x1x128xf32>
    %142 = vector.shape_cast %141 : vector<16x1x128xf32> to vector<16x128xf32>
    %143 = vector.shape_cast %142 : vector<16x128xf32> to vector<16x1x128xf32>
    %144 = vector.extract_strided_slice %0 {offsets = [0, 5, 0], sizes = [16, 1, 128], strides = [1, 1, 1]} : vector<16x16x128xf32> to vector<16x1x128xf32>
    %145 = vector.shape_cast %144 : vector<16x1x128xf32> to vector<16x128xf32>
    %146 = vector.shape_cast %145 : vector<16x128xf32> to vector<1x16x128xf32>
    %147 = vector.broadcast %143 : vector<16x1x128xf32> to vector<16x16x128xf32>
    %148 = vector.broadcast %146 : vector<1x16x128xf32> to vector<16x16x128xf32>
    %149 = arith.mulf %147, %148 : vector<16x16x128xf32>
    %150 = arith.addf %140, %149 : vector<16x16x128xf32>
    %151 = vector.extract_strided_slice %89 {offsets = [0, 6, 0], sizes = [16, 1, 128], strides = [1, 1, 1]} : vector<16x16x128xf32> to vector<16x1x128xf32>
    %152 = vector.shape_cast %151 : vector<16x1x128xf32> to vector<16x128xf32>
    %153 = vector.shape_cast %152 : vector<16x128xf32> to vector<16x1x128xf32>
    %154 = vector.extract_strided_slice %0 {offsets = [0, 6, 0], sizes = [16, 1, 128], strides = [1, 1, 1]} : vector<16x16x128xf32> to vector<16x1x128xf32>
    %155 = vector.shape_cast %154 : vector<16x1x128xf32> to vector<16x128xf32>
    %156 = vector.shape_cast %155 : vector<16x128xf32> to vector<1x16x128xf32>
    %157 = vector.broadcast %153 : vector<16x1x128xf32> to vector<16x16x128xf32>
    %158 = vector.broadcast %156 : vector<1x16x128xf32> to vector<16x16x128xf32>
    %159 = arith.mulf %157, %158 : vector<16x16x128xf32>
    %160 = arith.addf %150, %159 : vector<16x16x128xf32>
    %161 = vector.extract_strided_slice %89 {offsets = [0, 7, 0], sizes = [16, 1, 128], strides = [1, 1, 1]} : vector<16x16x128xf32> to vector<16x1x128xf32>
    %162 = vector.shape_cast %161 : vector<16x1x128xf32> to vector<16x128xf32>
    %163 = vector.shape_cast %162 : vector<16x128xf32> to vector<16x1x128xf32>
    %164 = vector.extract_strided_slice %0 {offsets = [0, 7, 0], sizes = [16, 1, 128], strides = [1, 1, 1]} : vector<16x16x128xf32> to vector<16x1x128xf32>
    %165 = vector.shape_cast %164 : vector<16x1x128xf32> to vector<16x128xf32>
    %166 = vector.shape_cast %165 : vector<16x128xf32> to vector<1x16x128xf32>
    %167 = vector.broadcast %163 : vector<16x1x128xf32> to vector<16x16x128xf32>
    %168 = vector.broadcast %166 : vector<1x16x128xf32> to vector<16x16x128xf32>
    %169 = arith.mulf %167, %168 : vector<16x16x128xf32>
    %170 = arith.addf %160, %169 : vector<16x16x128xf32>
    %171 = vector.extract_strided_slice %89 {offsets = [0, 8, 0], sizes = [16, 1, 128], strides = [1, 1, 1]} : vector<16x16x128xf32> to vector<16x1x128xf32>
    %172 = vector.shape_cast %171 : vector<16x1x128xf32> to vector<16x128xf32>
    %173 = vector.shape_cast %172 : vector<16x128xf32> to vector<16x1x128xf32>
    %174 = vector.extract_strided_slice %0 {offsets = [0, 8, 0], sizes = [16, 1, 128], strides = [1, 1, 1]} : vector<16x16x128xf32> to vector<16x1x128xf32>
    %175 = vector.shape_cast %174 : vector<16x1x128xf32> to vector<16x128xf32>
    %176 = vector.shape_cast %175 : vector<16x128xf32> to vector<1x16x128xf32>
    %177 = vector.broadcast %173 : vector<16x1x128xf32> to vector<16x16x128xf32>
    %178 = vector.broadcast %176 : vector<1x16x128xf32> to vector<16x16x128xf32>
    %179 = arith.mulf %177, %178 : vector<16x16x128xf32>
    %180 = arith.addf %170, %179 : vector<16x16x128xf32>
    %181 = vector.extract_strided_slice %89 {offsets = [0, 9, 0], sizes = [16, 1, 128], strides = [1, 1, 1]} : vector<16x16x128xf32> to vector<16x1x128xf32>
    %182 = vector.shape_cast %181 : vector<16x1x128xf32> to vector<16x128xf32>
    %183 = vector.shape_cast %182 : vector<16x128xf32> to vector<16x1x128xf32>
    %184 = vector.extract_strided_slice %0 {offsets = [0, 9, 0], sizes = [16, 1, 128], strides = [1, 1, 1]} : vector<16x16x128xf32> to vector<16x1x128xf32>
    %185 = vector.shape_cast %184 : vector<16x1x128xf32> to vector<16x128xf32>
    %186 = vector.shape_cast %185 : vector<16x128xf32> to vector<1x16x128xf32>
    %187 = vector.broadcast %183 : vector<16x1x128xf32> to vector<16x16x128xf32>
    %188 = vector.broadcast %186 : vector<1x16x128xf32> to vector<16x16x128xf32>
    %189 = arith.mulf %187, %188 : vector<16x16x128xf32>
    %190 = arith.addf %180, %189 : vector<16x16x128xf32>
    %191 = vector.extract_strided_slice %89 {offsets = [0, 10, 0], sizes = [16, 1, 128], strides = [1, 1, 1]} : vector<16x16x128xf32> to vector<16x1x128xf32>
    %192 = vector.shape_cast %191 : vector<16x1x128xf32> to vector<16x128xf32>
    %193 = vector.shape_cast %192 : vector<16x128xf32> to vector<16x1x128xf32>
    %194 = vector.extract_strided_slice %0 {offsets = [0, 10, 0], sizes = [16, 1, 128], strides = [1, 1, 1]} : vector<16x16x128xf32> to vector<16x1x128xf32>
    %195 = vector.shape_cast %194 : vector<16x1x128xf32> to vector<16x128xf32>
    %196 = vector.shape_cast %195 : vector<16x128xf32> to vector<1x16x128xf32>
    %197 = vector.broadcast %193 : vector<16x1x128xf32> to vector<16x16x128xf32>
    %198 = vector.broadcast %196 : vector<1x16x128xf32> to vector<16x16x128xf32>
    %199 = arith.mulf %197, %198 : vector<16x16x128xf32>
    %200 = arith.addf %190, %199 : vector<16x16x128xf32>
    %201 = vector.extract_strided_slice %89 {offsets = [0, 11, 0], sizes = [16, 1, 128], strides = [1, 1, 1]} : vector<16x16x128xf32> to vector<16x1x128xf32>
    %202 = vector.shape_cast %201 : vector<16x1x128xf32> to vector<16x128xf32>
    %203 = vector.shape_cast %202 : vector<16x128xf32> to vector<16x1x128xf32>
    %204 = vector.extract_strided_slice %0 {offsets = [0, 11, 0], sizes = [16, 1, 128], strides = [1, 1, 1]} : vector<16x16x128xf32> to vector<16x1x128xf32>
    %205 = vector.shape_cast %204 : vector<16x1x128xf32> to vector<16x128xf32>
    %206 = vector.shape_cast %205 : vector<16x128xf32> to vector<1x16x128xf32>
    %207 = vector.broadcast %203 : vector<16x1x128xf32> to vector<16x16x128xf32>
    %208 = vector.broadcast %206 : vector<1x16x128xf32> to vector<16x16x128xf32>
    %209 = arith.mulf %207, %208 : vector<16x16x128xf32>
    %210 = arith.addf %200, %209 : vector<16x16x128xf32>
    %211 = vector.extract_strided_slice %89 {offsets = [0, 12, 0], sizes = [16, 1, 128], strides = [1, 1, 1]} : vector<16x16x128xf32> to vector<16x1x128xf32>
    %212 = vector.shape_cast %211 : vector<16x1x128xf32> to vector<16x128xf32>
    %213 = vector.shape_cast %212 : vector<16x128xf32> to vector<16x1x128xf32>
    %214 = vector.extract_strided_slice %0 {offsets = [0, 12, 0], sizes = [16, 1, 128], strides = [1, 1, 1]} : vector<16x16x128xf32> to vector<16x1x128xf32>
    %215 = vector.shape_cast %214 : vector<16x1x128xf32> to vector<16x128xf32>
    %216 = vector.shape_cast %215 : vector<16x128xf32> to vector<1x16x128xf32>
    %217 = vector.broadcast %213 : vector<16x1x128xf32> to vector<16x16x128xf32>
    %218 = vector.broadcast %216 : vector<1x16x128xf32> to vector<16x16x128xf32>
    %219 = arith.mulf %217, %218 : vector<16x16x128xf32>
    %220 = arith.addf %210, %219 : vector<16x16x128xf32>
    %221 = vector.extract_strided_slice %89 {offsets = [0, 13, 0], sizes = [16, 1, 128], strides = [1, 1, 1]} : vector<16x16x128xf32> to vector<16x1x128xf32>
    %222 = vector.shape_cast %221 : vector<16x1x128xf32> to vector<16x128xf32>
    %223 = vector.shape_cast %222 : vector<16x128xf32> to vector<16x1x128xf32>
    %224 = vector.extract_strided_slice %0 {offsets = [0, 13, 0], sizes = [16, 1, 128], strides = [1, 1, 1]} : vector<16x16x128xf32> to vector<16x1x128xf32>
    %225 = vector.shape_cast %224 : vector<16x1x128xf32> to vector<16x128xf32>
    %226 = vector.shape_cast %225 : vector<16x128xf32> to vector<1x16x128xf32>
    %227 = vector.broadcast %223 : vector<16x1x128xf32> to vector<16x16x128xf32>
    %228 = vector.broadcast %226 : vector<1x16x128xf32> to vector<16x16x128xf32>
    %229 = arith.mulf %227, %228 : vector<16x16x128xf32>
    %230 = arith.addf %220, %229 : vector<16x16x128xf32>
    %231 = vector.extract_strided_slice %89 {offsets = [0, 14, 0], sizes = [16, 1, 128], strides = [1, 1, 1]} : vector<16x16x128xf32> to vector<16x1x128xf32>
    %232 = vector.shape_cast %231 : vector<16x1x128xf32> to vector<16x128xf32>
    %233 = vector.shape_cast %232 : vector<16x128xf32> to vector<16x1x128xf32>
    %234 = vector.extract_strided_slice %0 {offsets = [0, 14, 0], sizes = [16, 1, 128], strides = [1, 1, 1]} : vector<16x16x128xf32> to vector<16x1x128xf32>
    %235 = vector.shape_cast %234 : vector<16x1x128xf32> to vector<16x128xf32>
    %236 = vector.shape_cast %235 : vector<16x128xf32> to vector<1x16x128xf32>
    %237 = vector.broadcast %233 : vector<16x1x128xf32> to vector<16x16x128xf32>
    %238 = vector.broadcast %236 : vector<1x16x128xf32> to vector<16x16x128xf32>
    %239 = arith.mulf %237, %238 : vector<16x16x128xf32>
    %240 = arith.addf %230, %239 : vector<16x16x128xf32>
    %241 = vector.extract_strided_slice %89 {offsets = [0, 15, 0], sizes = [16, 1, 128], strides = [1, 1, 1]} : vector<16x16x128xf32> to vector<16x1x128xf32>
    %242 = vector.shape_cast %241 : vector<16x1x128xf32> to vector<16x128xf32>
    %243 = vector.shape_cast %242 : vector<16x128xf32> to vector<16x1x128xf32>
    %244 = vector.extract_strided_slice %0 {offsets = [0, 15, 0], sizes = [16, 1, 128], strides = [1, 1, 1]} : vector<16x16x128xf32> to vector<16x1x128xf32>
    %245 = vector.shape_cast %244 : vector<16x1x128xf32> to vector<16x128xf32>
    %246 = vector.shape_cast %245 : vector<16x128xf32> to vector<1x16x128xf32>
    %247 = vector.broadcast %243 : vector<16x1x128xf32> to vector<16x16x128xf32>
    %248 = vector.broadcast %246 : vector<1x16x128xf32> to vector<16x16x128xf32>
    %249 = arith.mulf %247, %248 : vector<16x16x128xf32>
    %250 = arith.addf %240, %249 : vector<16x16x128xf32>
    %c0_31 = arith.constant 0 : index
    %c0_32 = arith.constant 0 : index
    %c0_33 = arith.constant 0 : index
    %251 = vector.load %arg3[%c0_31, %c0_32, %c0_33] : memref<16x16x128xf32, #tpu.memory_space<vmem>>, vector<16x16x128xf32>
    tpu.vector_store %arg3[%c0_31, %c0_32, %c0_33], %250 {strides = array<i32>} : memref<16x16x128xf32, #tpu.memory_space<vmem>>, vector<16x16x128xf32>,
    return
  }
  func.func @transform_0(%arg0: i32) -> (i32, i32) {
    %c0_i32 = arith.constant 0 : i32
    %c0_i32_0 = arith.constant 0 : i32
    return %c0_i32, %arg0 : i32, i32
  }
  func.func @transform_1(%arg0: i32) -> (i32, i32, i32) {
    %c0_i32 = arith.constant 0 : i32
    %c0_i32_0 = arith.constant 0 : i32
    %c0_i32_1 = arith.constant 0 : i32
    return %c0_i32, %c0_i32_0, %arg0 : i32, i32, i32
  }
  func.func @transform_2(%arg0: i32) -> (i32, i32, i32) {
    %c0_i32 = arith.constant 0 : i32
    %c0_i32_0 = arith.constant 0 : i32
    %c0_i32_1 = arith.constant 0 : i32
    return %c0_i32, %c0_i32_0, %arg0 : i32, i32, i32
  }
}

</mosaic_0001>

<bundles_post_ra>
// kernel: tpu_custom_call.1
= control target key start
LH: loop header
LB: loop body
LE: loop exit
PB: predicated region body
PF: predicated region fallthrough
CT: control target
= control target key end

     0   :  { %7 = vsyncpa [#allocation3], 0  ;;  %s4279_s0 = inlined_call_operand.hbm [shape: f32[16,128], index: 0, kind: input, shape index: {}]   ;;  %s4280_s1 = inlined_call_operand.hbm [shape: f32[16,16,128], index: 1, kind: input, shape index: {}]   ;;  %s4281_s2 = inlined_call_operand.hbm [shape: f32[16,16,128], index: 2, kind: output, shape index: {}]  }
   0x1   :  { %8 = vsyncpa [#allocation6], 0 }
   0x2   :  { %9 = vsyncpa [#allocation4], 0  ;;  %s14_s11 = sshll.u32 %s4279_s0, 4  ;;  %s2422_s12 = smov [#allocation2]   ;;  %s15_s11 = int_to_ptr.hbm [resolvable:$true] %s14_s11 }
   0x3   :  { %s16_s13 = sshll.u32 %s2422_s12, 4  ;;  %s27_s16 = sshll.u32 %s4280_s1, 4  ;;  %s17_s13 = int_to_ptr.vmem [resolvable:$true] %s16_s13  ;;  %s28_s16 = int_to_ptr.hbm [resolvable:$true] %s27_s16 }
   0x4   :  { %s2423_s17 = smov 128   ;;  %s2424_s18 = smov 8  }
   0x5   :  { %22 = dma.hbm_to_vmem [thread:$0]  %s15_s11, 256, %s17_s13, [#allocation3], %s2423_s17, %s2423_s17, %s2424_s18  }
   0x6   :  { %s2425_s19 = smov [#allocation5]  }
   0x7   :  { %s29_s20 = sshll.u32 %s2425_s19, 4  ;;  %s30_s20 = int_to_ptr.vmem [resolvable:$true] %s29_s20 }
   0x8   :  { %35 = dma.hbm_to_vmem [thread:$0]  %s28_s16, 4096, %s30_s20, [#allocation6], %s2423_s17, %s2423_s17, %s2424_s18  }
   0x9   :  { %2416 = dma.done.wait [#allocation3], 256  }
   0xa   :  { %2417 = vsyncadd [#allocation3], 4294967040 }
   0xb   :  { %2418 = dma.done.wait [#allocation6], 4096  }
   0xc   :  { %2419 = vsyncadd [#allocation6], 4294963200  ;;  %v76_v0 = vld [vmem:[#allocation2] sm:$0xff]  ;;  %v77_v1 = vld [vmem:[#allocation2 + $0x8] sm:$0xff]  ;;  %s2426_s0 = smov [#allocation7]   ;;  %s2231_s23 = sshll.u32 %s4281_s2, 4  ;;  %s2232_s23 = int_to_ptr.hbm [resolvable:$true] %s2231_s23 }
   0xd   :  { %v78_v2 = vmax.f32 %v76_v0, 0.0  ;;  %v79_v3 = vmax.f32 %v77_v1, 0.0  ;;  %s2229_s1 = sshll.u32 %s2426_s0, 4  ;;  %s2230_s1 = int_to_ptr.vmem [resolvable:$true] %s2229_s1 }
   0xf   :  { %2252 = vrsqrt.f32 %v78_v2  ;;  %vm87_vm0 = vcmp.eq.f32.partialorder %v78_v2, inf  ;;  %v90_v15 = vand.u32 2147483648, %v78_v2  ;;  %vm89_vm1 = vcmp.eq.f32.partialorder %v78_v2, 0.0 }
  0x10   :  { %2254 = vrsqrt.f32 %v79_v3  ;;  %vm99_vm2 = vcmp.eq.f32.partialorder %v79_v3, inf  ;;  %v102_v18 = vand.u32 2147483648, %v79_v3  ;;  %vm101_vm3 = vcmp.eq.f32.partialorder %v79_v3, 0.0 }
  0x15   :  { %v2253_v4 = vpop.eup %2252 }
  0x16   :  { %v2255_v5 = vpop.eup %2254  ;;  %v81_v6 = vmul.f32 %v2253_v4, %v78_v2 }
  0x17   :  { %v93_v7 = vmul.f32 %v2255_v5, %v79_v3 }
  0x18   :  { %v82_v8 = vmul.f32 %v2253_v4, %v81_v6 }
  0x19   :  { %v94_v9 = vmul.f32 %v2255_v5, %v93_v7 }
  0x1a   :  { %v83_v10 = vmul.f32 0.5, %v82_v8 }
  0x1b   :  { %v95_v11 = vmul.f32 0.5, %v94_v9 }
  0x1c   :  { %v84_v12 = vsub.f32 1.5, %v83_v10 }
  0x1d   :  { %v96_v13 = vsub.f32 1.5, %v95_v11 }
  0x1e   :  { %v85_v14 = vmul.f32 %v2253_v4, %v84_v12 }
  0x1f   :  { %v97_v16 = vmul.f32 %v2255_v5, %v96_v13 }
  0x20   :  { %v86_v17 = vmul.f32 %v85_v14, %v78_v2 }
  0x21   :  { %v98_v19 = vmul.f32 %v97_v16, %v79_v3 }
  0x22   :  { %v88_v20 = vsel %vm87_vm0, %v78_v2, %v86_v17 }
  0x23   :  { %v91_v21 = vsel %vm89_vm1, %v90_v15, %v88_v20  ;;  %v100_v22 = vsel %vm99_vm2, %v79_v3, %v98_v19 }
  0x24   :  { %v103_v23 = vsel %vm101_vm3, %v102_v18, %v100_v22  ;;  %2256 = vrsqrt.f32 %v91_v21  ;;  %vm111_vm4 = vcmp.eq.f32.partialorder %v91_v21, inf  ;;  %v114_v35 = vand.u32 2147483648, %v91_v21 }
  0x25   :  { %2258 = vrsqrt.f32 %v103_v23  ;;  %vm113_vm5 = vcmp.eq.f32.partialorder %v91_v21, 0.0  ;;  %vm123_vm6 = vcmp.eq.f32.partialorder %v103_v23, inf  ;;  %v126_v38 = vand.u32 2147483648, %v103_v23 }
  0x26   :  { %vm125_vm7 = vcmp.eq.f32.partialorder %v103_v23, 0.0 }
  0x2a   :  { %v2257_v24 = vpop.eup %2256 }
  0x2b   :  { %v2259_v25 = vpop.eup %2258  ;;  %v105_v26 = vmul.f32 %v2257_v24, %v91_v21 }
  0x2c   :  { %v117_v27 = vmul.f32 %v2259_v25, %v103_v23 }
  0x2d   :  { %v106_v28 = vmul.f32 %v2257_v24, %v105_v26 }
  0x2e   :  { %v118_v29 = vmul.f32 %v2259_v25, %v117_v27 }
  0x2f   :  { %v107_v30 = vmul.f32 0.5, %v106_v28 }
  0x30   :  { %v119_v31 = vmul.f32 0.5, %v118_v29 }
  0x31   :  { %v108_v32 = vsub.f32 1.5, %v107_v30 }
  0x32   :  { %v120_v33 = vsub.f32 1.5, %v119_v31 }
  0x33   :  { %v109_v34 = vmul.f32 %v2257_v24, %v108_v32 }
  0x34   :  { %v121_v36 = vmul.f32 %v2259_v25, %v120_v33 }
  0x35   :  { %v110_v37 = vmul.f32 %v109_v34, %v91_v21 }
  0x36   :  { %v122_v39 = vmul.f32 %v121_v36, %v103_v23 }
  0x37   :  { %v112_v40 = vsel %vm111_vm4, %v91_v21, %v110_v37 }
  0x38   :  { %v115_v41 = vsel %vm113_vm5, %v114_v35, %v112_v40  ;;  %v124_v42 = vsel %vm123_vm6, %v103_v23, %v122_v39 }
  0x39   :  { %v127_v43 = vsel %vm125_vm7, %v126_v38, %v124_v42  ;;  %2260 = vrsqrt.f32 %v115_v41  ;;  %vm135_vm8 = vcmp.eq.f32.partialorder %v115_v41, inf  ;;  %v138_v55 = vand.u32 2147483648, %v115_v41 }
  0x3a   :  { %2262 = vrsqrt.f32 %v127_v43  ;;  %vm137_vm9 = vcmp.eq.f32.partialorder %v115_v41, 0.0  ;;  %vm147_vm10 = vcmp.eq.f32.partialorder %v127_v43, inf  ;;  %v150_v58 = vand.u32 2147483648, %v127_v43 }
  0x3b   :  { %vm149_vm11 = vcmp.eq.f32.partialorder %v127_v43, 0.0 }
  0x3f   :  { %v2261_v44 = vpop.eup %2260 }
  0x40   :  { %v2263_v45 = vpop.eup %2262  ;;  %v129_v46 = vmul.f32 %v2261_v44, %v115_v41 }
  0x41   :  { %v141_v47 = vmul.f32 %v2263_v45, %v127_v43 }
  0x42   :  { %v130_v48 = vmul.f32 %v2261_v44, %v129_v46 }
  0x43   :  { %v142_v49 = vmul.f32 %v2263_v45, %v141_v47 }
  0x44   :  { %v131_v50 = vmul.f32 0.5, %v130_v48 }
  0x45   :  { %v143_v51 = vmul.f32 0.5, %v142_v49 }
  0x46   :  { %v132_v52 = vsub.f32 1.5, %v131_v50 }
  0x47   :  { %v144_v53 = vsub.f32 1.5, %v143_v51 }
  0x48   :  { %v133_v54 = vmul.f32 %v2261_v44, %v132_v52 }
  0x49   :  { %v145_v56 = vmul.f32 %v2263_v45, %v144_v53 }
  0x4a   :  { %v134_v57 = vmul.f32 %v133_v54, %v115_v41 }
  0x4b   :  { %v146_v59 = vmul.f32 %v145_v56, %v127_v43 }
  0x4c   :  { %v136_v60 = vsel %vm135_vm8, %v115_v41, %v134_v57 }
  0x4d   :  { %v139_v61 = vsel %vm137_vm9, %v138_v55, %v136_v60  ;;  %v148_v62 = vsel %vm147_vm10, %v127_v43, %v146_v59 }
  0x4e   :  { %v151_v63 = vsel %vm149_vm11, %v150_v58, %v148_v62  ;;  %2264 = vrsqrt.f32 %v139_v61  ;;  %vm159_vm12 = vcmp.eq.f32.partialorder %v139_v61, inf  ;;  %v162_v11 = vand.u32 2147483648, %v139_v61 }
  0x4f   :  { %2266 = vrsqrt.f32 %v151_v63  ;;  %vm161_vm13 = vcmp.eq.f32.partialorder %v139_v61, 0.0  ;;  %vm171_vm14 = vcmp.eq.f32.partialorder %v151_v63, inf  ;;  %v174_v14 = vand.u32 2147483648, %v151_v63 }
  0x50   :  { %vm173_vm15 = vcmp.eq.f32.partialorder %v151_v63, 0.0 }
  0x54   :  { %v2265_v0 = vpop.eup %2264 }
  0x55   :  { %v2267_v1 = vpop.eup %2266  ;;  %v153_v2 = vmul.f32 %v2265_v0, %v139_v61 }
  0x56   :  { %v165_v3 = vmul.f32 %v2267_v1, %v151_v63 }
  0x57   :  { %v154_v4 = vmul.f32 %v2265_v0, %v153_v2 }
  0x58   :  { %v166_v5 = vmul.f32 %v2267_v1, %v165_v3 }
  0x59   :  { %v155_v6 = vmul.f32 0.5, %v154_v4 }
  0x5a   :  { %v167_v7 = vmul.f32 0.5, %v166_v5 }
  0x5b   :  { %v156_v8 = vsub.f32 1.5, %v155_v6 }
  0x5c   :  { %v168_v9 = vsub.f32 1.5, %v167_v7 }
  0x5d   :  { %v157_v10 = vmul.f32 %v2265_v0, %v156_v8 }
  0x5e   :  { %v169_v12 = vmul.f32 %v2267_v1, %v168_v9 }
  0x5f   :  { %v158_v13 = vmul.f32 %v157_v10, %v139_v61 }
  0x60   :  { %v170_v15 = vmul.f32 %v169_v12, %v151_v63 }
  0x61   :  { %v160_v16 = vsel %vm159_vm12, %v139_v61, %v158_v13 }
  0x62   :  { %v163_v17 = vsel %vm161_vm13, %v162_v11, %v160_v16  ;;  %v172_v18 = vsel %vm171_vm14, %v151_v63, %v170_v15 }
  0x63   :  { %v175_v19 = vsel %vm173_vm15, %v174_v14, %v172_v18  ;;  %2268 = vrsqrt.f32 %v163_v17  ;;  %vm183_vm0 = vcmp.eq.f32.partialorder %v163_v17, inf  ;;  %v186_v31 = vand.u32 2147483648, %v163_v17 }
  0x64   :  { %2270 = vrsqrt.f32 %v175_v19  ;;  %vm185_vm1 = vcmp.eq.f32.partialorder %v163_v17, 0.0  ;;  %vm195_vm2 = vcmp.eq.f32.partialorder %v175_v19, inf  ;;  %v198_v34 = vand.u32 2147483648, %v175_v19 }
  0x65   :  { %vm197_vm3 = vcmp.eq.f32.partialorder %v175_v19, 0.0 }
  0x69   :  { %v2269_v20 = vpop.eup %2268 }
  0x6a   :  { %v2271_v21 = vpop.eup %2270  ;;  %v177_v22 = vmul.f32 %v2269_v20, %v163_v17 }
  0x6b   :  { %v189_v23 = vmul.f32 %v2271_v21, %v175_v19 }
  0x6c   :  { %v178_v24 = vmul.f32 %v2269_v20, %v177_v22  ;;  %v2456_v22 = vld [vmem:[#allocation5 + $0x10] sm:$0xff] }
  0x6d   :  { %v190_v25 = vmul.f32 %v2271_v21, %v189_v23 }
  0x6e   :  { %v179_v26 = vmul.f32 0.5, %v178_v24  ;;  %v2458_v24 = vld [vmem:[#allocation5 + $0x20] sm:$0xff] }
  0x6f   :  { %v191_v27 = vmul.f32 0.5, %v190_v25 }
  0x70   :  { %v180_v28 = vsub.f32 1.5, %v179_v26  ;;  %v2460_v26 = vld [vmem:[#allocation5 + $0x30] sm:$0xff] }
  0x71   :  { %v192_v29 = vsub.f32 1.5, %v191_v27 }
  0x72   :  { %v181_v30 = vmul.f32 %v2269_v20, %v180_v28 }
  0x73   :  { %v193_v32 = vmul.f32 %v2271_v21, %v192_v29  ;;  %v2454_v21 = vld [vmem:[#allocation5] sm:$0xff] }
  0x74   :  { %v182_v33 = vmul.f32 %v181_v30, %v163_v17  ;;  %v2462_v29 = vld [vmem:[#allocation5 + $0x40] sm:$0xff] }
  0x75   :  { %v194_v35 = vmul.f32 %v193_v32, %v175_v19  ;;  %v426_v32 = vrot.slane %v2456_v22, 7 }
  0x76   :  { %v184_v36 = vsel %vm183_vm0, %v163_v17, %v182_v33  ;;  %v543_v33 = vrot.slane %v2454_v21, 1  ;;  %vm427_vm0 = vcmask 1041409  }
  0x77   :  { %v187_v37 = vsel %vm185_vm1, %v186_v31, %v184_v36  ;;  %v196_v38 = vsel %vm195_vm2, %v175_v19, %v194_v35  ;;  %v429_v36 = vrot.slane %v2458_v24, 6  ;;  %vm430_vm1 = vcmask 1042434  }
  0x78   :  { %v199_v39 = vsel %vm197_vm3, %v198_v34, %v196_v38  ;;  %2272 = vrsqrt.f32 %v187_v37  ;;  %vm207_vm4 = vcmp.eq.f32.partialorder %v187_v37, inf  ;;  %v210_v51 = vand.u32 2147483648, %v187_v37  ;;  %v2466_v34 = vld [vmem:[#allocation5 + $0x50] sm:$0xff]  ;;  %v2470_v38 = vld [vmem:[#allocation5 + $0x60] sm:$0xff] }
  0x79   :  { %2274 = vrsqrt.f32 %v199_v39  ;;  %vm209_vm5 = vcmp.eq.f32.partialorder %v187_v37, 0.0  ;;  %vm219_vm6 = vcmp.eq.f32.partialorder %v199_v39, inf  ;;  %v222_v54 = vand.u32 2147483648, %v199_v39 }
  0x7a   :  { %vm221_vm7 = vcmp.eq.f32.partialorder %v199_v39, 0.0  ;;  %vm433_vm2 = vcmask 1043459   ;;  %vm436_vm3 = vcmask 1044484  }
  0x7e   :  { %v2273_v40 = vpop.eup %2272 }
  0x7f   :  { %v2275_v41 = vpop.eup %2274  ;;  %v201_v42 = vmul.f32 %v2273_v40, %v187_v37 }
  0x80   :  { %v213_v43 = vmul.f32 %v2275_v41, %v199_v39 }
  0x81   :  { %v202_v44 = vmul.f32 %v2273_v40, %v201_v42  ;;  %v2475_v42 = vld [vmem:[#allocation5 + $0x70] sm:$0xff] }
  0x82   :  { %v214_v45 = vmul.f32 %v2275_v41, %v213_v43 }
  0x83   :  { %v203_v46 = vmul.f32 0.5, %v202_v44 }
  0x84   :  { %v215_v47 = vmul.f32 0.5, %v214_v45  ;;  %v435_v45 = vrot.slane %v2462_v29, 4 }
  0x85   :  { %v204_v48 = vsub.f32 1.5, %v203_v46 }
  0x86   :  { %v216_v49 = vsub.f32 1.5, %v215_v47 }
  0x87   :  { %v205_v50 = vmul.f32 %v2273_v40, %v204_v48  ;;  %v428_v40 = vsel %vm427_vm0, %v426_v32, %v2454_v21  ;;  %v438_v48 = vrot.slane %v2466_v34, 3 }
  0x88   :  { %v217_v52 = vmul.f32 %v2275_v41, %v216_v49  ;;  %v432_v41 = vrot.slane %v2460_v26, 5  ;;  %v431_v44 = vsel %vm430_vm1, %v429_v36, %v428_v40 }
  0x89   :  { %v206_v53 = vmul.f32 %v205_v50, %v187_v37 }
  0x8a   :  { %v218_v55 = vmul.f32 %v217_v52, %v199_v39  ;;  %v434_v47 = vsel %vm433_vm2, %v432_v41, %v431_v44 }
  0x8b   :  { %v208_v56 = vsel %vm207_vm4, %v187_v37, %v206_v53  ;;  %v545_v37 = vrot.slane %v2458_v24, 7  ;;  %v437_v50 = vsel %vm436_vm3, %v435_v45, %v434_v47  ;;  %vm439_vm4 = vcmask 1045509  }
  0x8c   :  { %v211_v57 = vsel %vm209_vm5, %v210_v51, %v208_v56  ;;  %v220_v58 = vsel %vm219_vm6, %v199_v39, %v218_v55  ;;  %v441_v51 = vrot.slane %v2470_v38, 2  ;;  %v440_v53 = vsel %vm439_vm4, %v438_v48, %v437_v50 }
  0x8d   :  { %v223_v59 = vsel %vm221_vm7, %v222_v54, %v220_v58  ;;  %2276 = vrsqrt.f32 %v211_v57  ;;  %vm231_vm8 = vcmp.eq.f32.partialorder %v211_v57, inf  ;;  %v234_v7 = vand.u32 2147483648, %v211_v57 }
  0x8e   :  { %2278 = vrsqrt.f32 %v223_v59  ;;  %vm233_vm9 = vcmp.eq.f32.partialorder %v211_v57, 0.0  ;;  %vm243_vm10 = vcmp.eq.f32.partialorder %v223_v59, inf  ;;  %v246_v10 = vand.u32 2147483648, %v223_v59 }
  0x8f   :  { %vm245_vm11 = vcmp.eq.f32.partialorder %v223_v59, 0.0  ;;  %vm442_vm5 = vcmask 1046534   ;;  %v444_v54 = vrot.slane %v2475_v42, 1  ;;  %vm445_vm6 = vcmask 1047559  }
  0x93   :  { %v2277_v60 = vpop.eup %2276 }
  0x94   :  { %v2279_v61 = vpop.eup %2278  ;;  %v225_v62 = vmul.f32 %v2277_v60, %v211_v57 }
  0x95   :  { %v237_v63 = vmul.f32 %v2279_v61, %v223_v59 }
  0x96   :  { %v226_v0 = vmul.f32 %v2277_v60, %v225_v62 }
  0x97   :  { %v238_v1 = vmul.f32 %v2279_v61, %v237_v63 }
  0x98   :  { %v227_v2 = vmul.f32 0.5, %v226_v0 }
  0x99   :  { %v239_v3 = vmul.f32 0.5, %v238_v1 }
  0x9a   :  { %v228_v4 = vsub.f32 1.5, %v227_v2 }
  0x9b   :  { %v240_v5 = vsub.f32 1.5, %v239_v3 }
  0x9c   :  { %v229_v6 = vmul.f32 %v2277_v60, %v228_v4 }
  0x9d   :  { %v241_v8 = vmul.f32 %v2279_v61, %v240_v5  ;;  %v544_v5 = vsel %vm427_vm0, %v2456_v22, %v543_v33 }
  0x9e   :  { %v230_v9 = vmul.f32 %v229_v6, %v211_v57 }
  0x9f   :  { %v242_v11 = vmul.f32 %v241_v8, %v223_v59 }
  0xa0   :  { %v232_v12 = vsel %vm231_vm8, %v211_v57, %v230_v9  ;;  %v443_v57 = vsel %vm442_vm5, %v441_v51, %v440_v53  ;;  %v2500_v9 = vsel %vm430_vm1, %v545_v37, %v544_v5 }
  0xa1   :  { %v235_v13 = vsel %vm233_vm9, %v234_v7, %v232_v12  ;;  %v244_v14 = vsel %vm243_vm10, %v223_v59, %v242_v11  ;;  %v2491_v1 = vsel %vm445_vm6, %v444_v54, %v443_v57 }
  0xa2   :  { %v247_v15 = vsel %vm245_vm11, %v246_v10, %v244_v14  ;;  %2280 = vrsqrt.f32 %v235_v13  ;;  %vm255_vm12 = vcmp.eq.f32.partialorder %v235_v13, inf  ;;  %vm257_vm13 = vcmp.eq.f32.partialorder %v235_v13, 0.0  ;;  %4430 = vst [vmem:[#allocation11_spill] sm:$0xff] %v2491_v1 }
  0xa3   :  { %2282 = vrsqrt.f32 %v247_v15  ;;  %v258_v27 = vand.u32 2147483648, %v235_v13  ;;  %vm267_vm14 = vcmp.eq.f32.partialorder %v247_v15, inf  ;;  %vm269_vm15 = vcmp.eq.f32.partialorder %v247_v15, 0.0 }
  0xa4   :  { %v270_v31 = vand.u32 2147483648, %v247_v15 }
  0xa8   :  { %v2281_v16 = vpop.eup %2280 }
  0xa9   :  { %v2283_v17 = vpop.eup %2282  ;;  %v249_v18 = vmul.f32 %v2281_v16, %v235_v13 }
  0xaa   :  { %v261_v19 = vmul.f32 %v2283_v17, %v247_v15 }
  0xab   :  { %v250_v20 = vmul.f32 %v2281_v16, %v249_v18 }
  0xac   :  { %v262_v23 = vmul.f32 %v2283_v17, %v261_v19 }
  0xad   :  { %v251_v25 = vmul.f32 0.5, %v250_v20 }
  0xae   :  { %v263_v28 = vmul.f32 0.5, %v262_v23 }
  0xaf   :  { %v252_v30 = vsub.f32 1.5, %v251_v25 }
  0xb0   :  { %v264_v35 = vsub.f32 1.5, %v263_v28 }
  0xb1   :  { %v253_v39 = vmul.f32 %v2281_v16, %v252_v30 }
  0xb2   :  { %v265_v43 = vmul.f32 %v2283_v17, %v264_v35 }
  0xb3   :  { %v254_v46 = vmul.f32 %v253_v39, %v235_v13 }
  0xb4   :  { %v266_v49 = vmul.f32 %v265_v43, %v247_v15 }
  0xb5   :  { %v256_v52 = vsel %vm255_vm12, %v235_v13, %v254_v46 }
  0xb6   :  { %v259_v55 = vsel %vm257_vm13, %v258_v27, %v256_v52  ;;  %v268_v56 = vsel %vm267_vm14, %v247_v15, %v266_v49 }
  0xb7   :  { %v271_v58 = vsel %vm269_vm15, %v270_v31, %v268_v56  ;;  %v2245_v59 = vadd.f32 -1.0, %v259_v55  ;;  %v274_v60 = vmul.f32 0.01985507, %v259_v55  ;;  %v286_v61 = vmul.f32 0.10166676, %v259_v55 }
  0xb8   :  { %v2246_v62 = vadd.f32 -1.0, %v271_v58  ;;  %v275_v63 = vmul.f32 0.01985507, %v271_v58  ;;  %v287_v0 = vmul.f32 0.10166676, %v271_v58  ;;  %v547_v56 = vrot.slane %v2460_v26, 6 }
  0xb9   :  { %v276_v2 = vadd.f32 0.9801449, %v274_v60  ;;  %v2493_v3 = vmul.f32 12.9572525, %v2245_v59  ;;  %v288_v4 = vadd.f32 0.89833325, %v286_v61 }
  0xba   :  { %v277_v6 = vadd.f32 0.9801449, %v275_v63  ;;  %v2497_v7 = vmul.f32 12.9572525, %v2246_v62  ;;  %v289_v8 = vadd.f32 0.89833325, %v287_v0 }
  0xbb   :  { %2284 = vrcp.f32 %v276_v2  ;;  %v2502_v10 = vmul.f32 28.464773, %v2245_v59  ;;  %v2504_v11 = vmul.f32 28.464773, %v2246_v62  ;;  %v298_v12 = vmul.f32 0.23723379, %v259_v55 }
  0xbc   :  { %2286 = vrcp.f32 %v277_v6  ;;  %v299_v13 = vmul.f32 0.23723379, %v271_v58  ;;  %v2506_v14 = vmul.f32 40.15445, %v2245_v59  ;;  %v2508_v15 = vmul.f32 40.15445, %v2246_v62 }
  0xbd   :  { %2288 = vrcp.f32 %v288_v4  ;;  %v300_v16 = vadd.f32 0.7627662, %v298_v12  ;;  %v310_v17 = vmul.f32 0.40828267, %v259_v55  ;;  %v311_v18 = vmul.f32 0.40828267, %v271_v58 }
  0xbe   :  { %2290 = vrcp.f32 %v289_v8  ;;  %v301_v19 = vadd.f32 0.7627662, %v299_v13  ;;  %v316_v20 = vmul.f32 46.423523, %v2245_v59  ;;  %v317_v23 = vmul.f32 46.423523, %v2246_v62 }
  0xbf   :  { %2292 = vrcp.f32 %v300_v16  ;;  %v312_v25 = vadd.f32 0.5917173, %v310_v17  ;;  %v313_v27 = vadd.f32 0.5917173, %v311_v18  ;;  %v322_v28 = vmul.f32 0.5917173, %v259_v55 }
  0xc0   :  { %2294 = vrcp.f32 %v301_v19  ;;  %v323_v30 = vmul.f32 0.5917173, %v271_v58  ;;  %v332_v31 = vmul.f32 0.7627662, %v259_v55  ;;  %v333_v32 = vmul.f32 0.7627662, %v271_v58 }
  0xc1   :  { %v2285_v33 = vpop.eup %2284  ;;  %2296 = vrcp.f32 %v312_v25  ;;  %v324_v35 = vadd.f32 0.40828267, %v322_v28  ;;  %v342_v36 = vmul.f32 0.89833325, %v259_v55  ;;  %v343_v37 = vmul.f32 0.89833325, %v271_v58 }
  0xc2   :  { %v2287_v39 = vpop.eup %2286  ;;  %v282_v40 = vmul.f32 %v2285_v33, %v2493_v3  ;;  %2298 = vrcp.f32 %v313_v27  ;;  %v325_v41 = vadd.f32 0.40828267, %v323_v30  ;;  %v334_v43 = vadd.f32 0.23723379, %v332_v31 }
  0xc3   :  { %v2289_v44 = vpop.eup %2288  ;;  %v283_v45 = vmul.f32 %v2287_v39, %v2497_v7  ;;  %2300 = vrcp.f32 %v324_v35  ;;  %v335_v46 = vadd.f32 0.23723379, %v333_v32  ;;  %v344_v47 = vadd.f32 0.10166676, %v342_v36 }
  0xc4   :  { %v2291_v48 = vpop.eup %2290  ;;  %v294_v49 = vmul.f32 %v2289_v44, %v2502_v10  ;;  %2302 = vrcp.f32 %v325_v41  ;;  %v345_v50 = vadd.f32 0.10166676, %v343_v37  ;;  %v352_v51 = vmul.f32 0.9801449, %v259_v55 }
  0xc5   :  { %v2293_v52 = vpop.eup %2292  ;;  %v295_v53 = vmul.f32 %v2291_v48, %v2504_v11  ;;  %2304 = vrcp.f32 %v334_v43  ;;  %v353_v54 = vmul.f32 0.9801449, %v271_v58  ;;  %v548_v58 = vsel %vm433_vm2, %v547_v56, %v2500_v9 }
  0xc6   :  { %v2295_v57 = vpop.eup %2294  ;;  %v296_v59 = vadd.f32 %v294_v49, %v282_v40  ;;  %v306_v60 = vmul.f32 %v2293_v52, %v2506_v14  ;;  %2306 = vrcp.f32 %v335_v46  ;;  %v354_v61 = vadd.f32 0.01985507, %v352_v51 }
  0xc7   :  { %v2297_v62 = vpop.eup %2296  ;;  %v297_v63 = vadd.f32 %v295_v53, %v283_v45  ;;  %v307_v0 = vmul.f32 %v2295_v57, %v2508_v15  ;;  %2308 = vrcp.f32 %v344_v47  ;;  %v355_v2 = vadd.f32 0.01985507, %v353_v54 }
  0xc8   :  { %v2299_v55 = vpop.eup %2298  ;;  %v308_v4 = vadd.f32 %v306_v60, %v296_v59  ;;  %v318_v5 = vmul.f32 %v2297_v62, %v316_v20  ;;  %2310 = vrcp.f32 %v345_v50  ;;  %v549_v13 = vrot.slane %v2462_v29, 5 }
  0xc9   :  { %v2301_v6 = vpop.eup %2300  ;;  %v309_v8 = vadd.f32 %v307_v0, %v297_v63  ;;  %v319_v12 = vmul.f32 %v2299_v55, %v317_v23  ;;  %2312 = vrcp.f32 %v354_v61  ;;  %v551_v19 = vrot.slane %v2466_v34, 4 }
  0xca   :  { %v2303_v16 = vpop.eup %2302  ;;  %v320_v17 = vadd.f32 %v318_v5, %v308_v4  ;;  %v328_v18 = vmul.f32 %v2301_v6, %v316_v20  ;;  %2314 = vrcp.f32 %v355_v2  ;;  %v550_v30 = vsel %vm436_vm3, %v549_v13, %v548_v58  ;;  %v2554_v2 = vld [vmem:[#allocation5 + $0x8] sm:$0xff] }
  0xcb   :  { %v2305_v25 = vpop.eup %2304  ;;  %v321_v27 = vadd.f32 %v319_v12, %v309_v8  ;;  %v329_v28 = vmul.f32 %v2303_v16, %v317_v23  ;;  %v553_v31 = vrot.slane %v2470_v38, 3  ;;  %v552_v35 = vsel %vm439_vm4, %v551_v19, %v550_v30 }
  0xcc   :  { %v2307_v9 = vpop.eup %2306  ;;  %v330_v32 = vadd.f32 %v328_v18, %v320_v17  ;;  %v338_v33 = vmul.f32 %v2305_v25, %v2506_v14  ;;  %v555_v36 = vrot.slane %v2475_v42, 2  ;;  %v653_v23 = vrot.slane %v2454_v21, 2 }
  0xcd   :  { %v2309_v37 = vpop.eup %2308  ;;  %v331_v20 = vadd.f32 %v329_v28, %v321_v27  ;;  %v339_v39 = vmul.f32 %v2307_v9, %v2508_v15  ;;  %v554_v40 = vsel %vm442_vm5, %v553_v31, %v552_v35  ;;  %v654_v14 = vrot.slane %v2456_v22, 1 }
  0xce   :  { %v2311_v41 = vpop.eup %2310  ;;  %v340_v43 = vadd.f32 %v338_v33, %v330_v32  ;;  %v348_v44 = vmul.f32 %v2309_v37, %v2502_v10  ;;  %v2531_v45 = vsel %vm445_vm6, %v555_v36, %v554_v40  ;;  %v657_v49 = vrot.slane %v2460_v26, 7 }
  0xcf   :  { %4431 = vst [vmem:[#allocation12_spill] sm:$0xff] %v2531_v45  ;;  %v2313_v46 = vpop.eup %2312  ;;  %v341_v47 = vadd.f32 %v339_v39, %v331_v20  ;;  %v349_v48 = vmul.f32 %v2311_v41, %v2504_v11  ;;  %v659_v15 = vrot.slane %v2462_v29, 6  ;;  %v655_v53 = vsel %vm427_vm0, %v654_v14, %v653_v23 }
  0xd0   :  { %v2315_v50 = vpop.eup %2314  ;;  %v350_v51 = vadd.f32 %v348_v44, %v340_v43  ;;  %v358_v52 = vmul.f32 %v2313_v46, %v2493_v3  ;;  %v661_v10 = vrot.slane %v2466_v34, 5  ;;  %v656_v57 = vsel %vm430_vm1, %v2458_v24, %v655_v53 }
  0xd1   :  { %v351_v54 = vadd.f32 %v349_v48, %v341_v47  ;;  %v359_v56 = vmul.f32 %v2315_v50, %v2497_v7  ;;  %v663_v11 = vrot.slane %v2470_v38, 4  ;;  %v658_v60 = vsel %vm433_vm2, %v657_v49, %v656_v57 }
  0xd2   :  { %v2544_v59 = vadd.f32 %v358_v52, %v350_v51  ;;  %v665_v61 = vrot.slane %v2475_v42, 3  ;;  %v763_v3 = vrot.slane %v2454_v21, 3  ;;  %v660_v63 = vsel %vm436_vm3, %v659_v15, %v658_v60 }
  0xd3   :  { %v2549_v62 = vadd.f32 %v359_v56, %v351_v54  ;;  %v764_v0 = vrot.slane %v2456_v22, 2  ;;  %v766_v7 = vrot.slane %v2458_v24, 1  ;;  %v662_v4 = vsel %vm439_vm4, %v661_v10, %v660_v63 }
  0xd4   :  { %4432 = vst [vmem:[#allocation13_spill] sm:$0xff] %v2544_v59  ;;  %v2558_v55 = vmul.f32 %v2544_v59, %v2454_v21  ;;  %v769_v5 = vrot.slane %v2462_v29, 7  ;;  %v771_v58 = vrot.slane %v2466_v34, 6  ;;  %v664_v8 = vsel %vm442_vm5, %v663_v11, %v662_v4 }
  0xd5   :  { %4433 = vst [vmem:[#allocation14_spill] sm:$0xff] %v2549_v62  ;;  %v2565_v6 = vmul.f32 %v2549_v62, %v2554_v2  ;;  %v765_v12 = vsel %vm427_vm0, %v764_v0, %v763_v3  ;;  %v773_v13 = vrot.slane %v2470_v38, 5  ;;  %v2574_v19 = vsel %vm445_vm6, %v665_v61, %v664_v8 }
  0xd6   :  { %v394_v16 = vperm.slane %v2558_v55, 0  ;;  %v527_v17 = vperm.slane %v2558_v55, 1  ;;  %v637_v18 = vperm.slane %v2558_v55, 2  ;;  %4434 = vst [vmem:[#allocation15_spill] sm:$0xff] %v2574_v19  ;;  %v747_v25 = vperm.slane %v2558_v55, 3 }
  0xd7   :  { %v767_v27 = vsel %vm430_vm1, %v766_v7, %v765_v12  ;;  %v775_v28 = vrot.slane %v2475_v42, 4  ;;  %v857_v30 = vperm.slane %v2558_v55, 4  ;;  %v873_v36 = vrot.slane %v2454_v21, 4 }
  0xd8   :  { %v463_v31 = vmul.f32 %v2491_v1, %v394_v16  ;;  %v573_v9 = vmul.f32 %v2531_v45, %v527_v17  ;;  %v683_v32 = vmul.f32 %v2574_v19, %v637_v18  ;;  %v768_v33 = vsel %vm433_vm2, %v2460_v26, %v767_v27 }
  0xd9   :  { %v770_v35 = vsel %vm436_vm3, %v769_v5, %v768_v33  ;;  %v874_v37 = vrot.slane %v2456_v22, 3  ;;  %v876_v20 = vrot.slane %v2458_v24, 2  ;;  %v878_v23 = vrot.slane %v2460_v26, 1 }
  0xda   :  { %v605_v39 = vadd.f32 %v573_v9, %v463_v31  ;;  %v772_v40 = vsel %vm439_vm4, %v771_v58, %v770_v35  ;;  %v881_v41 = vrot.slane %v2466_v34, 7  ;;  %v883_v14 = vrot.slane %v2470_v38, 6 }
  0xdb   :  { %v774_v43 = vsel %vm442_vm5, %v773_v13, %v772_v40  ;;  %v875_v44 = vsel %vm427_vm0, %v874_v37, %v873_v36  ;;  %v885_v46 = vrot.slane %v2475_v42, 5  ;;  %v967_v15 = vperm.slane %v2558_v55, 5 }
  0xdc   :  { %v715_v47 = vadd.f32 %v683_v32, %v605_v39  ;;  %v2603_v48 = vsel %vm445_vm6, %v775_v28, %v774_v43  ;;  %v877_v49 = vsel %vm430_vm1, %v876_v20, %v875_v44  ;;  %v983_v52 = vrot.slane %v2454_v21, 5  ;;  %v2651_v44 = vld [vmem:[#allocation5 + $0x18] sm:$0xff] }
  0xdd   :  { %4435 = vst [vmem:[#allocation16_spill] sm:$0xff] %v2603_v48  ;;  %v793_v50 = vmul.f32 %v2603_v48, %v747_v25  ;;  %v879_v51 = vsel %vm433_vm2, %v878_v23, %v877_v49  ;;  %v984_v53 = vrot.slane %v2456_v22, 4  ;;  %v986_v54 = vrot.slane %v2458_v24, 3 }
  0xde   :  { %v880_v10 = vsel %vm436_vm3, %v2462_v29, %v879_v51  ;;  %v988_v56 = vrot.slane %v2460_v26, 2  ;;  %v990_v57 = vrot.slane %v2462_v29, 1  ;;  %v993_v3 = vrot.slane %v2470_v38, 7  ;;  %v2661_v51 = vld [vmem:[#allocation5 + $0x38] sm:$0xff] }
  0xdf   :  { %v825_v11 = vadd.f32 %v793_v50, %v715_v47  ;;  %v882_v60 = vsel %vm439_vm4, %v881_v41, %v880_v10  ;;  %v985_v61 = vsel %vm427_vm0, %v984_v53, %v983_v52  ;;  %v995_v7 = vrot.slane %v2475_v42, 6  ;;  %v2659_v50 = vld [vmem:[#allocation5 + $0x28] sm:$0xff] }
  0xe0   :  { %v884_v63 = vsel %vm442_vm5, %v883_v14, %v882_v60  ;;  %v987_v0 = vsel %vm430_vm1, %v986_v54, %v985_v61  ;;  %v1077_v4 = vperm.slane %v2558_v55, 6  ;;  %v1093_v8 = vrot.slane %v2454_v21, 6  ;;  %v2667_v54 = vld [vmem:[#allocation5 + $0x48] sm:$0xff] }
  0xe1   :  { %v2626_v5 = vsel %vm445_vm6, %v885_v46, %v884_v63  ;;  %v989_v58 = vsel %vm433_vm2, %v988_v56, %v987_v0  ;;  %v1094_v12 = vrot.slane %v2456_v22, 5  ;;  %v1096_v28 = vrot.slane %v2458_v24, 4  ;;  %v2669_v56 = vld [vmem:[#allocation5 + $0x58] sm:$0xff]  ;;  %v2675_v60 = vld [vmem:[#allocation5 + $0x68] sm:$0xff] }
  0xe2   :  { %4436 = vst [vmem:[#allocation17_spill] sm:$0xff] %v2626_v5  ;;  %v903_v13 = vmul.f32 %v2626_v5, %v857_v30  ;;  %v991_v27 = vsel %vm436_vm3, %v990_v57, %v989_v58  ;;  %v1098_v31 = vrot.slane %v2460_v26, 3  ;;  %v1100_v33 = vrot.slane %v2462_v29, 2 }
  0xe3   :  { %v992_v9 = vsel %vm439_vm4, %v2466_v34, %v991_v27  ;;  %v1095_v32 = vsel %vm427_vm0, %v1094_v12, %v1093_v8  ;;  %v1102_v35 = vrot.slane %v2466_v34, 1  ;;  %v1105_v39 = vrot.slane %v2475_v42, 7 }
  0xe4   :  { %v935_v36 = vadd.f32 %v903_v13, %v825_v11  ;;  %v994_v37 = vsel %vm442_vm5, %v993_v3, %v992_v9  ;;  %v1097_v20 = vsel %vm430_vm1, %v1096_v28, %v1095_v32  ;;  %v1187_v41 = vperm.slane %v2558_v55, 7  ;;  %v2683_v3 = vld [vmem:[#allocation5 + $0x78] sm:$0xff] }
  0xe5   :  { %v2646_v40 = vsel %vm445_vm6, %v995_v7, %v994_v37  ;;  %v1099_v23 = vsel %vm433_vm2, %v1098_v31, %v1097_v20  ;;  %v1203_v43 = vrot.slane %v2454_v21, 7  ;;  %v1204_v47 = vrot.slane %v2456_v22, 6 }
  0xe6   :  { %4437 = vst [vmem:[#allocation18_spill] sm:$0xff] %v2646_v40  ;;  %v1013_v14 = vmul.f32 %v2646_v40, %v967_v15  ;;  %v1101_v46 = vsel %vm436_vm3, %v1100_v33, %v1099_v23  ;;  %v1206_v49 = vrot.slane %v2458_v24, 5  ;;  %v1208_v21 = vrot.slane %v2460_v26, 4 }
  0xe7   :  { %v1103_v52 = vsel %vm439_vm4, %v1102_v35, %v1101_v46  ;;  %v1210_v53 = vrot.slane %v2462_v29, 3  ;;  %v1212_v10 = vrot.slane %v2466_v34, 2  ;;  %v1205_v24 = vsel %vm427_vm0, %v1204_v47, %v1203_v43 }
  0xe8   :  { %v1045_v57 = vadd.f32 %v1013_v14, %v935_v36  ;;  %v1104_v22 = vsel %vm442_vm5, %v2470_v38, %v1103_v52  ;;  %v1214_v11 = vrot.slane %v2470_v38, 1  ;;  %v1207_v29 = vsel %vm430_vm1, %v1206_v49, %v1205_v24 }
  0xe9   :  { %v2678_v26 = vsel %vm445_vm6, %v1105_v39, %v1104_v22  ;;  %v1297_v34 = vperm.slane %v2565_v6, 0  ;;  %v1329_v61 = vrot.slane %v2651_v44, 7  ;;  %v1209_v0 = vsel %vm433_vm2, %v1208_v21, %v1207_v29 }
  0xea   :  { %v1123_v63 = vmul.f32 %v2678_v26, %v1077_v4  ;;  %v1331_v38 = vrot.slane %v2659_v50, 6  ;;  %v1333_v7 = vrot.slane %v2661_v51, 5  ;;  %v1211_v58 = vsel %vm436_vm3, %v1210_v53, %v1209_v0 }
  0xeb   :  { %v1330_v8 = vsel %vm427_vm0, %v1329_v61, %v2554_v2  ;;  %v1335_v12 = vrot.slane %v2667_v54, 4  ;;  %v1337_v13 = vrot.slane %v2669_v56, 3  ;;  %v1213_v28 = vsel %vm439_vm4, %v1212_v10, %v1211_v58 }
  0xec   :  { %v1155_v27 = vadd.f32 %v1123_v63, %v1045_v57  ;;  %v1332_v31 = vsel %vm430_vm1, %v1331_v38, %v1330_v8  ;;  %v1339_v9 = vrot.slane %v2675_v60, 2  ;;  %v1215_v32 = vsel %vm442_vm5, %v1214_v11, %v1213_v28 }
  0xed   :  { %v1334_v33 = vsel %vm433_vm2, %v1333_v7, %v1332_v31  ;;  %v1341_v35 = vrot.slane %v2683_v3, 1  ;;  %v1423_v36 = vperm.slane %v2565_v6, 1  ;;  %v2705_v37 = vsel %vm445_vm6, %v2475_v42, %v1215_v32 }
  0xee   :  { %4438 = vst [vmem:[#allocation19_spill] sm:$0xff] %v2705_v37  ;;  %v1336_v20 = vsel %vm436_vm3, %v1335_v12, %v1334_v33  ;;  %v1439_v39 = vrot.slane %v2554_v2, 1  ;;  %v1441_v23 = vrot.slane %v2659_v50, 7  ;;  %v1233_v43 = vmul.f32 %v2705_v37, %v1187_v41 }
  0xef   :  { %v1338_v14 = vsel %vm439_vm4, %v1337_v13, %v1336_v20  ;;  %v1443_v46 = vrot.slane %v2661_v51, 6  ;;  %v1445_v47 = vrot.slane %v2667_v54, 5  ;;  %v1447_v52 = vrot.slane %v2669_v56, 4 }
  0xf0   :  { %v1340_v49 = vsel %vm442_vm5, %v1339_v9, %v1338_v14  ;;  %v1440_v42 = vsel %vm427_vm0, %v2651_v44, %v1439_v39  ;;  %v1449_v21 = vrot.slane %v2675_v60, 3  ;;  %v1265_v53 = vadd.f32 %v1233_v43, %v1155_v27 }
  0xf1   :  { %v2722_v10 = vsel %vm445_vm6, %v1341_v35, %v1340_v49  ;;  %v1442_v57 = vsel %vm430_vm1, %v1441_v23, %v1440_v42  ;;  %v1451_v22 = vrot.slane %v2683_v3, 2  ;;  %v1533_v29 = vperm.slane %v2565_v6, 2 }
  0xf2   :  { %4439 = vst [vmem:[#allocation20_spill] sm:$0xff] %v2722_v10  ;;  %v1359_v24 = vmul.f32 %v2722_v10, %v1297_v34  ;;  %v1444_v11 = vsel %vm433_vm2, %v1443_v46, %v1442_v57  ;;  %v1549_v61 = vrot.slane %v2554_v2, 2  ;;  %v1550_v0 = vrot.slane %v2651_v44, 1 }
  0xf3   :  { %v1446_v63 = vsel %vm436_vm3, %v1445_v47, %v1444_v11  ;;  %v1553_v38 = vrot.slane %v2661_v51, 7  ;;  %v1555_v7 = vrot.slane %v2667_v54, 6  ;;  %v1557_v12 = vrot.slane %v2669_v56, 5 }
  0xf4   :  { %v1391_v58 = vadd.f32 %v1359_v24, %v1265_v53  ;;  %v1448_v8 = vsel %vm439_vm4, %v1447_v52, %v1446_v63  ;;  %v1559_v13 = vrot.slane %v2675_v60, 4  ;;  %v1551_v28 = vsel %vm427_vm0, %v1550_v0, %v1549_v61 }
  0xf5   :  { %v1450_v27 = vsel %vm442_vm5, %v1449_v21, %v1448_v8  ;;  %v1561_v31 = vrot.slane %v2683_v3, 3  ;;  %v1643_v9 = vperm.slane %v2565_v6, 3  ;;  %v1552_v33 = vsel %vm430_vm1, %v2659_v50, %v1551_v28 }
  0xf6   :  { %v2744_v32 = vsel %vm445_vm6, %v1451_v22, %v1450_v27  ;;  %v1659_v35 = vrot.slane %v2554_v2, 3  ;;  %v1660_v20 = vrot.slane %v2651_v44, 2  ;;  %v1554_v23 = vsel %vm433_vm2, %v1553_v38, %v1552_v33 }
  0xf7   :  { %4440 = vst [vmem:[#allocation21_spill] sm:$0xff] %v2744_v32  ;;  %v1469_v39 = vmul.f32 %v2744_v32, %v1423_v36  ;;  %v1662_v43 = vrot.slane %v2659_v50, 1  ;;  %v1665_v14 = vrot.slane %v2667_v54, 7  ;;  %v1556_v46 = vsel %vm436_vm3, %v1555_v7, %v1554_v23 }
  0xf8   :  { %v1661_v47 = vsel %vm427_vm0, %v1660_v20, %v1659_v35  ;;  %v1667_v49 = vrot.slane %v2669_v56, 6  ;;  %v1669_v42 = vrot.slane %v2675_v60, 5  ;;  %v1558_v21 = vsel %vm439_vm4, %v1557_v12, %v1556_v46 }
  0xf9   :  { %v1501_v52 = vadd.f32 %v1469_v39, %v1391_v58  ;;  %v1663_v53 = vsel %vm430_vm1, %v1662_v43, %v1661_v47  ;;  %v1671_v57 = vrot.slane %v2683_v3, 4  ;;  %v1560_v22 = vsel %vm442_vm5, %v1559_v13, %v1558_v21 }
  0xfa   :  { %v1664_v24 = vsel %vm433_vm2, %v2661_v51, %v1663_v53  ;;  %v4285_v11 = vperm.slane %v2565_v6, 4  ;;  %v1769_v61 = vrot.slane %v2554_v2, 4  ;;  %v2769_v63 = vsel %vm445_vm6, %v1561_v31, %v1560_v22 }
  0xfb   :  { %4441 = vst [vmem:[#allocation22_spill] sm:$0xff] %v2769_v63  ;;  %v1666_v0 = vsel %vm436_vm3, %v1665_v14, %v1664_v24  ;;  %v1770_v38 = vrot.slane %v2651_v44, 3  ;;  %v1772_v7 = vrot.slane %v2659_v50, 2  ;;  %v1579_v58 = vmul.f32 %v2769_v63, %v1533_v29 }
  0xfc   :  { %v1668_v8 = vsel %vm439_vm4, %v1667_v49, %v1666_v0  ;;  %v1774_v12 = vrot.slane %v2661_v51, 1  ;;  %v1777_v13 = vrot.slane %v2669_v56, 7  ;;  %v1779_v31 = vrot.slane %v2675_v60, 6 }
  0xfd   :  { %v1670_v27 = vsel %vm442_vm5, %v1669_v42, %v1668_v8  ;;  %v1771_v28 = vsel %vm427_vm0, %v1770_v38, %v1769_v61  ;;  %v1781_v33 = vrot.slane %v2683_v3, 5  ;;  %v1611_v35 = vadd.f32 %v1579_v58, %v1501_v52 }
  0xfe   :  { %v2785_v20 = vsel %vm445_vm6, %v1671_v57, %v1670_v27  ;;  %v1773_v39 = vsel %vm430_vm1, %v1772_v7, %v1771_v28  ;;  %v4283_v23 = vperm.slane %v2565_v6, 5  ;;  %v1879_v46 = vrot.slane %v2554_v2, 5 }
  0xff   :  { %4442 = vst [vmem:[#allocation23_spill] sm:$0xff] %v2785_v20  ;;  %v1689_v43 = vmul.f32 %v2785_v20, %v1643_v9  ;;  %v1775_v14 = vsel %vm433_vm2, %v1774_v12, %v1773_v39  ;;  %v1880_v47 = vrot.slane %v2651_v44, 4  ;;  %v1882_v42 = vrot.slane %v2659_v50, 3 }
 0x100   :  { %v1776_v49 = vsel %vm436_vm3, %v2667_v54, %v1775_v14  ;;  %v1884_v52 = vrot.slane %v2661_v51, 2  ;;  %v1886_v21 = vrot.slane %v2667_v54, 1  ;;  %v1889_v24 = vrot.slane %v2675_v60, 7 }
 0x101   :  { %v1721_v53 = vadd.f32 %v1689_v43, %v1611_v35  ;;  %v1778_v57 = vsel %vm439_vm4, %v1777_v13, %v1776_v49  ;;  %v1881_v22 = vsel %vm427_vm0, %v1880_v47, %v1879_v46  ;;  %v1891_v38 = vrot.slane %v2683_v3, 6 }
 0x102   :  { %v1780_v61 = vsel %vm442_vm5, %v1779_v31, %v1778_v57  ;;  %v1883_v0 = vsel %vm430_vm1, %v1882_v42, %v1881_v22  ;;  %v4282_v7 = vperm.slane %v2565_v6, 6  ;;  %v1989_v12 = vrot.slane %v2554_v2, 6 }
 0x103   :  { %v2808_v58 = vsel %vm445_vm6, %v1781_v33, %v1780_v61  ;;  %v1885_v8 = vsel %vm433_vm2, %v1884_v52, %v1883_v0  ;;  %v1990_v13 = vrot.slane %v2651_v44, 5  ;;  %v1992_v31 = vrot.slane %v2659_v50, 4 }
 0x104   :  { %4443 = vst [vmem:[#allocation24_spill] sm:$0xff] %v2808_v58  ;;  %v1799_v27 = vmul.f32 %v2808_v58, %v4285_v11  ;;  %v1887_v28 = vsel %vm436_vm3, %v1886_v21, %v1885_v8  ;;  %v1994_v35 = vrot.slane %v2661_v51, 3  ;;  %v1996_v43 = vrot.slane %v2667_v54, 2  ;;  %v2839_v8 = vld [vmem:[#allocation5 + $0x90] sm:$0xff] }
 0x105   :  { %v1888_v33 = vsel %vm439_vm4, %v2669_v56, %v1887_v28  ;;  %v1991_v39 = vsel %vm427_vm0, %v1990_v13, %v1989_v12  ;;  %v1998_v14 = vrot.slane %v2669_v56, 1  ;;  %v2001_v42 = vrot.slane %v2683_v3, 7  ;;  %v2847_v28 = vld [vmem:[#allocation5 + $0xb0] sm:$0xff] }
 0x106   :  { %v1831_v46 = vadd.f32 %v1799_v27, %v1721_v53  ;;  %v1890_v47 = vsel %vm442_vm5, %v1889_v24, %v1888_v33  ;;  %v1993_v49 = vsel %vm430_vm1, %v1992_v31, %v1991_v39  ;;  %v4284_v57 = vperm.slane %v2565_v6, 7  ;;  %v2849_v31 = vld [vmem:[#allocation5 + $0xc0] sm:$0xff] }
 0x107   :  { %v2828_v52 = vsel %vm445_vm6, %v1891_v38, %v1890_v47  ;;  %v1995_v21 = vsel %vm433_vm2, %v1994_v35, %v1993_v49  ;;  %v2099_v22 = vrot.slane %v2554_v2, 7  ;;  %v2100_v24 = vrot.slane %v2651_v44, 6  ;;  %v2841_v38 = vld [vmem:[#allocation5 + $0xa0] sm:$0xff]  ;;  %v2855_v47 = vld [vmem:[#allocation5 + $0xd0] sm:$0xff] }
 0x108   :  { %4444 = vst [vmem:[#allocation25_spill] sm:$0xff] %v2828_v52  ;;  %v1909_v61 = vmul.f32 %v2828_v52, %v4283_v23  ;;  %v1997_v53 = vsel %vm436_vm3, %v1996_v43, %v1995_v21  ;;  %v2102_v0 = vrot.slane %v2659_v50, 5  ;;  %v2104_v13 = vrot.slane %v2661_v51, 4 }
 0x109   :  { %v1999_v12 = vsel %vm439_vm4, %v1998_v14, %v1997_v53  ;;  %v2106_v2 = vrot.slane %v2667_v54, 3  ;;  %v2108_v27 = vrot.slane %v2669_v56, 2  ;;  %v2101_v39 = vsel %vm427_vm0, %v2100_v24, %v2099_v22  ;;  %v2857_v14 = vld [vmem:[#allocation5 + $0xe0] sm:$0xff]  ;;  %v2863_v56 = vld [vmem:[#allocation5 + $0xf0] sm:$0xff] }
 0x10a   :  { %v1941_v35 = vadd.f32 %v1909_v61, %v1831_v46  ;;  %v2000_v33 = vsel %vm442_vm5, %v2675_v60, %v1999_v12  ;;  %v2110_v43 = vrot.slane %v2675_v60, 1  ;;  %v2103_v54 = vsel %vm430_vm1, %v2102_v0, %v2101_v39  ;;  %v2871_v22 = vld [vmem:[#allocation5 + $0x80] sm:$0xff] }
 0x10b   :  { %v2860_v51 = vsel %vm445_vm6, %v2001_v42, %v2000_v33  ;;  %v447_v46 = vrot.slane %v2839_v8, 7  ;;  %v449_v49 = vrot.slane %v2841_v38, 6  ;;  %v2105_v60 = vsel %vm433_vm2, %v2104_v13, %v2103_v54 }
 0x10c   :  { %4445 = vst [vmem:[#allocation26_spill] sm:$0xff] %v2860_v51  ;;  %v2019_v21 = vmul.f32 %v2860_v51, %v4282_v7  ;;  %v451_v61 = vrot.slane %v2847_v28, 5  ;;  %v453_v42 = vrot.slane %v2849_v31, 4  ;;  %v2107_v53 = vsel %vm436_vm3, %v2106_v2, %v2105_v60 }
 0x10d   :  { %v448_v24 = vsel %vm427_vm0, %v447_v46, %v2871_v22  ;;  %v455_v0 = vrot.slane %v2855_v47, 3  ;;  %v457_v12 = vrot.slane %v2857_v14, 2  ;;  %v2109_v39 = vsel %vm439_vm4, %v2108_v27, %v2107_v53 }
 0x10e   :  { %v2051_v33 = vadd.f32 %v2019_v21, %v1941_v35  ;;  %v450_v13 = vsel %vm430_vm1, %v449_v49, %v448_v24  ;;  %v459_v54 = vrot.slane %v2863_v56, 1  ;;  %v2111_v7 = vsel %vm442_vm5, %v2110_v43, %v2109_v39 }
 0x10f   :  { %v452_v23 = vsel %vm433_vm2, %v451_v61, %v450_v13  ;;  %v557_v2 = vrot.slane %v2871_v22, 1  ;;  %v559_v60 = vrot.slane %v2841_v38, 7  ;;  %v2889_v46 = vsel %vm445_vm6, %v2683_v3, %v2111_v7 }
 0x110   :  { %4446 = vst [vmem:[#allocation27_spill] sm:$0xff] %v2889_v46  ;;  %v454_v35 = vsel %vm436_vm3, %v453_v42, %v452_v23  ;;  %v561_v27 = vrot.slane %v2847_v28, 6  ;;  %v563_v49 = vrot.slane %v2849_v31, 5  ;;  %v2129_v43 = vmul.f32 %v2889_v46, %v4284_v57 }
 0x111   :  { %v456_v21 = vsel %vm439_vm4, %v455_v0, %v454_v35  ;;  %v558_v61 = vsel %vm427_vm0, %v2839_v8, %v557_v2  ;;  %v565_v53 = vrot.slane %v2855_v47, 4  ;;  %v567_v23 = vrot.slane %v2857_v14, 3 }
 0x112   :  { %v458_v3 = vsel %vm442_vm5, %v457_v12, %v456_v21  ;;  %v560_v7 = vsel %vm430_vm1, %v559_v60, %v558_v61  ;;  %v569_v42 = vrot.slane %v2863_v56, 2  ;;  %v2161_v24 = vadd.f32 %v2129_v43, %v2051_v33 }
 0x113   :  { %v2906_v39 = vsel %vm445_vm6, %v459_v54, %v458_v3  ;;  %v562_v13 = vsel %vm433_vm2, %v561_v27, %v560_v7  ;;  %v667_v0 = vrot.slane %v2871_v22, 2  ;;  %v668_v60 = vrot.slane %v2839_v8, 1 }
 0x114   :  { %v464_v2 = vmul.f32 %v2906_v39, %v394_v16  ;;  %v564_v12 = vsel %vm436_vm3, %v563_v49, %v562_v13  ;;  %v671_v35 = vrot.slane %v2847_v28, 7  ;;  %2193 = vst [vmem:[#allocation7] sm:$0xff] %v2161_v24  ;;  %v673_v54 = vrot.slane %v2849_v31, 6 }
 0x115   :  { %v566_v33 = vsel %vm439_vm4, %v565_v53, %v564_v12  ;;  %v675_v43 = vrot.slane %v2855_v47, 5  ;;  %v677_v27 = vrot.slane %v2857_v14, 4  ;;  %v669_v61 = vsel %vm427_vm0, %v668_v60, %v667_v0 }
 0x116   :  { %v568_v21 = vsel %vm442_vm5, %v567_v23, %v566_v33  ;;  %v679_v16 = vrot.slane %v2863_v56, 3  ;;  %v777_v49 = vrot.slane %v2871_v22, 3  ;;  %v670_v53 = vsel %vm430_vm1, %v2841_v38, %v669_v61 }
 0x117   :  { %v2925_v3 = vsel %vm445_vm6, %v569_v42, %v568_v21  ;;  %v778_v7 = vrot.slane %v2839_v8, 2  ;;  %v780_v24 = vrot.slane %v2841_v38, 1  ;;  %v672_v13 = vsel %vm433_vm2, %v671_v35, %v670_v53 }
 0x118   :  { %4447 = vst [vmem:[#allocation28_spill] sm:$0xff] %v2925_v3  ;;  %v574_v23 = vmul.f32 %v2925_v3, %v527_v17  ;;  %v783_v0 = vrot.slane %v2849_v31, 7  ;;  %v785_v12 = vrot.slane %v2855_v47, 6  ;;  %v674_v42 = vsel %vm436_vm3, %v673_v54, %v672_v13 }
 0x119   :  { %v779_v60 = vsel %vm427_vm0, %v778_v7, %v777_v49  ;;  %v787_v33 = vrot.slane %v2857_v14, 5  ;;  %v789_v21 = vrot.slane %v2863_v56, 4  ;;  %v676_v57 = vsel %vm439_vm4, %v675_v43, %v674_v42 }
 0x11a   :  { %v606_v61 = vadd.f32 %v574_v23, %v464_v2  ;;  %v781_v11 = vsel %vm430_vm1, %v780_v24, %v779_v60  ;;  %v887_v17 = vrot.slane %v2871_v22, 4  ;;  %v678_v35 = vsel %vm442_vm5, %v677_v27, %v676_v57 }
 0x11b   :  { %v782_v53 = vsel %vm433_vm2, %v2847_v28, %v781_v11  ;;  %v888_v54 = vrot.slane %v2839_v8, 3  ;;  %v890_v49 = vrot.slane %v2841_v38, 2  ;;  %v2950_v7 = vsel %vm445_vm6, %v679_v16, %v678_v35 }
 0x11c   :  { %4448 = vst [vmem:[#allocation29_spill] sm:$0xff] %v2950_v7  ;;  %v784_v2 = vsel %vm436_vm3, %v783_v0, %v782_v53  ;;  %v892_v43 = vrot.slane %v2847_v28, 1  ;;  %v895_v24 = vrot.slane %v2855_v47, 7  ;;  %v684_v57 = vmul.f32 %v2950_v7, %v637_v18 }
 0x11d   :  { %v786_v27 = vsel %vm439_vm4, %v785_v12, %v784_v2  ;;  %v889_v11 = vsel %vm427_vm0, %v888_v54, %v887_v17  ;;  %v897_v23 = vrot.slane %v2857_v14, 6  ;;  %v899_v0 = vrot.slane %v2863_v56, 5 }
 0x11e   :  { %v788_v13 = vsel %vm442_vm5, %v787_v33, %v786_v27  ;;  %v891_v16 = vsel %vm430_vm1, %v890_v49, %v889_v11  ;;  %v997_v42 = vrot.slane %v2871_v22, 5  ;;  %v716_v60 = vadd.f32 %v684_v57, %v606_v61 }
 0x11f   :  { %v2966_v35 = vsel %vm445_vm6, %v789_v21, %v788_v13  ;;  %v893_v18 = vsel %vm433_vm2, %v892_v43, %v891_v16  ;;  %v998_v12 = vrot.slane %v2839_v8, 4  ;;  %v1000_v53 = vrot.slane %v2841_v38, 3 }
 0x120   :  { %v794_v17 = vmul.f32 %v2966_v35, %v747_v25  ;;  %v894_v33 = vsel %vm436_vm3, %v2849_v31, %v893_v18  ;;  %v1002_v54 = vrot.slane %v2847_v28, 2  ;;  %v1004_v49 = vrot.slane %v2849_v31, 1 }
 0x121   :  { %v896_v61 = vsel %vm439_vm4, %v895_v24, %v894_v33  ;;  %v999_v21 = vsel %vm427_vm0, %v998_v12, %v997_v42  ;;  %v1007_v2 = vrot.slane %v2857_v14, 7  ;;  %v1009_v27 = vrot.slane %v2863_v56, 6 }
 0x122   :  { %v826_v43 = vadd.f32 %v794_v17, %v716_v60  ;;  %v898_v57 = vsel %vm442_vm5, %v897_v23, %v896_v61  ;;  %v1001_v25 = vsel %vm430_vm1, %v1000_v53, %v999_v21  ;;  %v1107_v24 = vrot.slane %v2871_v22, 6 }
 0x123   :  { %v2985_v11 = vsel %vm445_vm6, %v899_v0, %v898_v57  ;;  %v1003_v13 = vsel %vm433_vm2, %v1002_v54, %v1001_v25  ;;  %v1108_v16 = vrot.slane %v2839_v8, 5  ;;  %v1110_v23 = vrot.slane %v2841_v38, 4 }
 0x124   :  { %v904_v42 = vmul.f32 %v2985_v11, %v857_v30  ;;  %v1005_v60 = vsel %vm436_vm3, %v1004_v49, %v1003_v13  ;;  %v1112_v18 = vrot.slane %v2847_v28, 3  ;;  %v1114_v17 = vrot.slane %v2849_v31, 2  ;;  %v3010_v13 = vld [vmem:[#allocation5 + $0x98] sm:$0xff] }
 0x125   :  { %v1006_v0 = vsel %vm439_vm4, %v2855_v47, %v1005_v60  ;;  %v1109_v12 = vsel %vm427_vm0, %v1108_v16, %v1107_v24  ;;  %v1116_v33 = vrot.slane %v2855_v47, 1  ;;  %v1119_v61 = vrot.slane %v2863_v56, 7  ;;  %v3012_v24 = vld [vmem:[#allocation5 + $0xa8] sm:$0xff] }
 0x126   :  { %v936_v53 = vadd.f32 %v904_v42, %v826_v43  ;;  %v1008_v54 = vsel %vm442_vm5, %v1007_v2, %v1006_v0  ;;  %v1111_v30 = vsel %vm430_vm1, %v1110_v23, %v1109_v12  ;;  %v1217_v57 = vrot.slane %v2871_v22, 7  ;;  %v3020_v42 = vld [vmem:[#allocation5 + $0xb8] sm:$0xff]  ;;  %v3022_v60 = vld [vmem:[#allocation5 + $0xc8] sm:$0xff] }
 0x127   :  { %v3005_v21 = vsel %vm445_vm6, %v1009_v27, %v1008_v54  ;;  %v1113_v49 = vsel %vm433_vm2, %v1112_v18, %v1111_v30  ;;  %v1218_v25 = vrot.slane %v2839_v8, 6  ;;  %v1220_v16 = vrot.slane %v2841_v38, 5  ;;  %v3028_v0 = vld [vmem:[#allocation5 + $0x88] sm:$0xff]  ;;  %v3038_v54 = vld [vmem:[#allocation5 + $0xf8] sm:$0xff] }
 0x128   :  { %4449 = vst [vmem:[#allocation30_spill] sm:$0xff] %v3005_v21  ;;  %v1014_v2 = vmul.f32 %v3005_v21, %v967_v15  ;;  %v1115_v43 = vsel %vm436_vm3, %v1114_v17, %v1113_v49  ;;  %v1222_v27 = vrot.slane %v2847_v28, 4  ;;  %v1224_v23 = vrot.slane %v2849_v31, 3  ;;  %v3030_v15 = vld [vmem:[#allocation5 + $0xd8] sm:$0xff]  ;;  %v3032_v12 = vld [vmem:[#allocation5 + $0xe8] sm:$0xff] }
 0x129   :  { %v1117_v8 = vsel %vm439_vm4, %v1116_v33, %v1115_v43  ;;  %v1219_v22 = vsel %vm427_vm0, %v1218_v25, %v1217_v57  ;;  %v1226_v18 = vrot.slane %v2855_v47, 2  ;;  %v1228_v33 = vrot.slane %v2857_v14, 1 }
 0x12a   :  { %v1046_v38 = vadd.f32 %v1014_v2, %v936_v53  ;;  %v1118_v28 = vsel %vm442_vm5, %v2857_v14, %v1117_v8  ;;  %v1221_v17 = vsel %vm430_vm1, %v1220_v16, %v1219_v22  ;;  %v1343_v30 = vrot.slane %v3010_v13, 7 }
 0x12b   :  { %v3041_v31 = vsel %vm445_vm6, %v1119_v61, %v1118_v28  ;;  %v1223_v47 = vsel %vm433_vm2, %v1222_v27, %v1221_v17  ;;  %v1345_v49 = vrot.slane %v3012_v24, 6  ;;  %v1347_v25 = vrot.slane %v3020_v42, 5 }
 0x12c   :  { %v1124_v53 = vmul.f32 %v3041_v31, %v1077_v4  ;;  %v1225_v57 = vsel %vm436_vm3, %v1224_v23, %v1223_v47  ;;  %v1349_v14 = vrot.slane %v3022_v60, 4  ;;  %v1344_v61 = vsel %vm427_vm0, %v1343_v30, %v3028_v0 }
 0x12d   :  { %v1227_v2 = vsel %vm439_vm4, %v1226_v18, %v1225_v57  ;;  %v1351_v43 = vrot.slane %v3030_v15, 3  ;;  %v1353_v16 = vrot.slane %v3032_v12, 2  ;;  %v1346_v4 = vsel %vm430_vm1, %v1345_v49, %v1344_v61 }
 0x12e   :  { %v1156_v27 = vadd.f32 %v1124_v53, %v1046_v38  ;;  %v1229_v8 = vsel %vm442_vm5, %v1228_v33, %v1227_v2  ;;  %v1355_v22 = vrot.slane %v3038_v54, 1  ;;  %v1348_v18 = vsel %vm433_vm2, %v1347_v25, %v1346_v4 }
 0x12f   :  { %v3062_v23 = vsel %vm445_vm6, %v2863_v56, %v1229_v8  ;;  %v1453_v28 = vrot.slane %v3028_v0, 1  ;;  %v1455_v17 = vrot.slane %v3012_v24, 7  ;;  %v1350_v33 = vsel %vm436_vm3, %v1349_v14, %v1348_v18 }
 0x130   :  { %4450 = vst [vmem:[#allocation31_spill] sm:$0xff] %v3062_v23  ;;  %v1234_v38 = vmul.f32 %v3062_v23, %v1187_v41  ;;  %v1457_v47 = vrot.slane %v3020_v42, 6  ;;  %v1459_v30 = vrot.slane %v3022_v60, 5  ;;  %v1352_v49 = vsel %vm439_vm4, %v1351_v43, %v1350_v33 }
 0x131   :  { %v1454_v56 = vsel %vm427_vm0, %v3010_v13, %v1453_v28  ;;  %v1461_v53 = vrot.slane %v3030_v15, 4  ;;  %v1463_v57 = vrot.slane %v3032_v12, 3  ;;  %v1354_v55 = vsel %vm442_vm5, %v1353_v16, %v1352_v49 }
 0x132   :  { %v1266_v25 = vadd.f32 %v1234_v38, %v1156_v27  ;;  %v1456_v41 = vsel %vm430_vm1, %v1455_v17, %v1454_v56  ;;  %v1465_v14 = vrot.slane %v3038_v54, 2  ;;  %v3082_v2 = vsel %vm445_vm6, %v1355_v22, %v1354_v55 }
 0x133   :  { %4451 = vst [vmem:[#allocation32_spill] sm:$0xff] %v3082_v2  ;;  %v1458_v61 = vsel %vm433_vm2, %v1457_v47, %v1456_v41  ;;  %v1563_v43 = vrot.slane %v3028_v0, 2  ;;  %v1564_v8 = vrot.slane %v3010_v13, 1  ;;  %v1360_v4 = vmul.f32 %v3082_v2, %v1297_v34 }
 0x134   :  { %v1460_v27 = vsel %vm436_vm3, %v1459_v30, %v1458_v61  ;;  %v1567_v16 = vrot.slane %v3020_v42, 7  ;;  %v1569_v18 = vrot.slane %v3022_v60, 6  ;;  %v1571_v17 = vrot.slane %v3030_v15, 5 }
 0x135   :  { %v1462_v28 = vsel %vm439_vm4, %v1461_v53, %v1460_v27  ;;  %v1565_v22 = vsel %vm427_vm0, %v1564_v8, %v1563_v43  ;;  %v1573_v38 = vrot.slane %v3032_v12, 4  ;;  %v1392_v33 = vadd.f32 %v1360_v4, %v1266_v25 }
 0x136   :  { %v1464_v47 = vsel %vm442_vm5, %v1463_v57, %v1462_v28  ;;  %v1566_v34 = vsel %vm430_vm1, %v3012_v24, %v1565_v22  ;;  %v1575_v30 = vrot.slane %v3038_v54, 3  ;;  %v1673_v53 = vrot.slane %v3028_v0, 3 }
 0x137   :  { %v3102_v49 = vsel %vm445_vm6, %v1465_v14, %v1464_v47  ;;  %v1568_v56 = vsel %vm433_vm2, %v1567_v16, %v1566_v34  ;;  %v1674_v55 = vrot.slane %v3010_v13, 2  ;;  %v1676_v41 = vrot.slane %v3012_v24, 1 }
 0x138   :  { %4452 = vst [vmem:[#allocation33_spill] sm:$0xff] %v3102_v49  ;;  %v1470_v25 = vmul.f32 %v3102_v49, %v1423_v36  ;;  %v1570_v57 = vsel %vm436_vm3, %v1569_v18, %v1568_v56  ;;  %v1679_v61 = vrot.slane %v3022_v60, 7  ;;  %v1681_v8 = vrot.slane %v3030_v15, 6 }
 0x139   :  { %v1572_v43 = vsel %vm439_vm4, %v1571_v17, %v1570_v57  ;;  %v1675_v14 = vsel %vm427_vm0, %v1674_v55, %v1673_v53  ;;  %v1683_v4 = vrot.slane %v3032_v12, 5  ;;  %v1685_v36 = vrot.slane %v3038_v54, 4 }
 0x13a   :  { %v1502_v27 = vadd.f32 %v1470_v25, %v1392_v33  ;;  %v1574_v16 = vsel %vm442_vm5, %v1573_v38, %v1572_v43  ;;  %v1677_v28 = vsel %vm430_vm1, %v1676_v41, %v1675_v14  ;;  %v1783_v17 = vrot.slane %v3028_v0, 4 }
 0x13b   :  { %v3121_v18 = vsel %vm445_vm6, %v1575_v30, %v1574_v16  ;;  %v1678_v22 = vsel %vm433_vm2, %v3020_v42, %v1677_v28  ;;  %v1784_v47 = vrot.slane %v3010_v13, 3  ;;  %v1786_v34 = vrot.slane %v3012_v24, 2 }
 0x13c   :  { %4453 = vst [vmem:[#allocation34_spill] sm:$0xff] %v3121_v18  ;;  %v1580_v33 = vmul.f32 %v3121_v18, %v1533_v29  ;;  %v1680_v38 = vsel %vm436_vm3, %v1679_v61, %v1678_v22  ;;  %v1788_v56 = vrot.slane %v3020_v42, 1  ;;  %v1791_v55 = vrot.slane %v3030_v15, 7 }
 0x13d   :  { %v1682_v30 = vsel %vm439_vm4, %v1681_v8, %v1680_v38  ;;  %v1785_v53 = vsel %vm427_vm0, %v1784_v47, %v1783_v17  ;;  %v1793_v25 = vrot.slane %v3032_v12, 6  ;;  %v1795_v29 = vrot.slane %v3038_v54, 5 }
 0x13e   :  { %v1612_v57 = vadd.f32 %v1580_v33, %v1502_v27  ;;  %v1684_v41 = vsel %vm442_vm5, %v1683_v4, %v1682_v30  ;;  %v1787_v43 = vsel %vm430_vm1, %v1786_v34, %v1785_v53  ;;  %v1893_v8 = vrot.slane %v3028_v0, 5 }
 0x13f   :  { %v3141_v61 = vsel %vm445_vm6, %v1685_v36, %v1684_v41  ;;  %v1789_v14 = vsel %vm433_vm2, %v1788_v56, %v1787_v43  ;;  %v1894_v16 = vrot.slane %v3010_v13, 4  ;;  %v1896_v27 = vrot.slane %v3012_v24, 3 }
 0x140   :  { %4454 = vst [vmem:[#allocation35_spill] sm:$0xff] %v3141_v61  ;;  %v1690_v28 = vmul.f32 %v3141_v61, %v1643_v9  ;;  %v1790_v4 = vsel %vm436_vm3, %v3022_v60, %v1789_v14  ;;  %v1898_v22 = vrot.slane %v3020_v42, 2  ;;  %v1900_v47 = vrot.slane %v3022_v60, 1 }
 0x141   :  { %v1792_v36 = vsel %vm439_vm4, %v1791_v55, %v1790_v4  ;;  %v1895_v17 = vsel %vm427_vm0, %v1894_v16, %v1893_v8  ;;  %v1903_v33 = vrot.slane %v3032_v12, 7  ;;  %v1905_v56 = vrot.slane %v3038_v54, 6 }
 0x142   :  { %v1722_v38 = vadd.f32 %v1690_v28, %v1612_v57  ;;  %v1794_v34 = vsel %vm442_vm5, %v1793_v25, %v1792_v36  ;;  %v1897_v9 = vsel %vm430_vm1, %v1896_v27, %v1895_v17  ;;  %v2003_v55 = vrot.slane %v3028_v0, 6 }
 0x143   :  { %v3161_v30 = vsel %vm445_vm6, %v1795_v29, %v1794_v34  ;;  %v1899_v53 = vsel %vm433_vm2, %v1898_v22, %v1897_v9  ;;  %v2004_v41 = vrot.slane %v3010_v13, 5  ;;  %v4456_v43 = vperm.slane %v2565_v6, 4 }
 0x144   :  { %4455 = vst [vmem:[#allocation36_spill] sm:$0xff] %v3161_v30  ;;  %v1901_v57 = vsel %vm436_vm3, %v1900_v47, %v1899_v53  ;;  %v2006_v25 = vrot.slane %v3012_v24, 4  ;;  %v2008_v8 = vrot.slane %v3020_v42, 3  ;;  %v2010_v28 = vrot.slane %v3022_v60, 2 }
 0x145   :  { %v1800_v14 = vmul.f32 %v3161_v30, %v4456_v43  ;;  %v1902_v29 = vsel %vm439_vm4, %v3030_v15, %v1901_v57  ;;  %v2005_v16 = vsel %vm427_vm0, %v2004_v41, %v2003_v55  ;;  %v2012_v4 = vrot.slane %v3030_v15, 1 }
 0x146   :  { %v1904_v22 = vsel %vm442_vm5, %v1903_v33, %v1902_v29  ;;  %v2007_v36 = vsel %vm430_vm1, %v2006_v25, %v2005_v16  ;;  %v2015_v17 = vrot.slane %v3038_v54, 7  ;;  %v2113_v9 = vrot.slane %v3028_v0, 7  ;;  %v2316_v16 = vld [vmem:[#allocation5 + $0x10] sm:$0xff] }
 0x147   :  { %v1832_v27 = vadd.f32 %v1800_v14, %v1722_v38  ;;  %v3181_v47 = vsel %vm445_vm6, %v1905_v56, %v1904_v22  ;;  %v2009_v34 = vsel %vm433_vm2, %v2008_v8, %v2007_v36  ;;  %v2114_v53 = vrot.slane %v3010_v13, 6 }
 0x148   :  { %4457 = vst [vmem:[#allocation37_spill] sm:$0xff] %v3181_v47  ;;  %v4458_v55 = vperm.slane %v2565_v6, 5  ;;  %v2011_v38 = vsel %vm436_vm3, %v2010_v28, %v2009_v34  ;;  %v2116_v33 = vrot.slane %v3012_v24, 5  ;;  %v2118_v43 = vrot.slane %v3020_v42, 4 }
 0x149   :  { %v2013_v14 = vsel %vm439_vm4, %v2012_v4, %v2011_v38  ;;  %v2115_v56 = vsel %vm427_vm0, %v2114_v53, %v2113_v9  ;;  %v2120_v57 = vrot.slane %v3022_v60, 3  ;;  %v2122_v0 = vrot.slane %v3030_v15, 2 }
 0x14a   :  { %v1910_v41 = vmul.f32 %v3181_v47, %v4458_v55  ;;  %v2014_v13 = vsel %vm442_vm5, %v3032_v12, %v2013_v14  ;;  %v2117_v8 = vsel %vm430_vm1, %v2116_v33, %v2115_v56  ;;  %v2124_v29 = vrot.slane %v3032_v12, 1 }
 0x14b   :  { %v3201_v24 = vsel %vm445_vm6, %v2015_v17, %v2014_v13  ;;  %v2119_v42 = vsel %vm433_vm2, %v2118_v43, %v2117_v8  ;;  %v3205_v28 = vmul.f32 %v2316_v16, %v2544_v59  ;;  %v4460_v60 = vperm.slane %v2565_v6, 6 }
 0x14c   :  { %v1942_v25 = vadd.f32 %v1910_v41, %v1832_v27  ;;  %4459 = vst [vmem:[#allocation38_spill] sm:$0xff] %v3201_v24  ;;  %v2121_v4 = vsel %vm436_vm3, %v2120_v57, %v2119_v42  ;;  %v4462_v43 = vperm.slane %v2565_v6, 7  ;;  %v3230_v56 = vmul.f32 %v2549_v62, %v2651_v44  ;;  %v2317_v42 = vld [vmem:[#allocation5 + $0x20] sm:$0xff] }
 0x14d   :  { %v2020_v15 = vmul.f32 %v3201_v24, %v4460_v60  ;;  %v2123_v27 = vsel %vm439_vm4, %v2122_v0, %v2121_v4  ;;  %v395_v22 = vperm.slane %v3205_v28, 0  ;;  %v528_v12 = vperm.slane %v3205_v28, 1 }
 0x14e   :  { %v638_v36 = vperm.slane %v3205_v28, 2  ;;  %v2125_v34 = vsel %vm442_vm5, %v2124_v29, %v2123_v27  ;;  %v748_v9 = vperm.slane %v3205_v28, 3  ;;  %v858_v53 = vperm.slane %v3205_v28, 4 }
 0x14f   :  { %v2052_v17 = vadd.f32 %v2020_v15, %v1942_v25  ;;  %v3220_v55 = vsel %vm445_vm6, %v3038_v54, %v2125_v34  ;;  %v465_v41 = vmul.f32 %v2491_v1, %v395_v22  ;;  %v575_v38 = vmul.f32 %v2531_v45, %v528_v12 }
 0x150   :  { %4461 = vst [vmem:[#allocation39_spill] sm:$0xff] %v3220_v55  ;;  %v685_v33 = vmul.f32 %v2574_v19, %v638_v36  ;;  %v2130_v14 = vmul.f32 %v3220_v55, %v4462_v43  ;;  %v795_v0 = vmul.f32 %v2603_v48, %v748_v9  ;;  %v968_v54 = vperm.slane %v3205_v28, 5 }
 0x151   :  { %v607_v57 = vadd.f32 %v575_v38, %v465_v41  ;;  %v1078_v13 = vperm.slane %v3205_v28, 6  ;;  %v905_v29 = vmul.f32 %v2626_v5, %v858_v53  ;;  %v1188_v6 = vperm.slane %v3205_v28, 7 }
 0x152   :  { %v2162_v25 = vadd.f32 %v2130_v14, %v2052_v17  ;;  %v3238_v16 = vmul.f32 %v2317_v42, %v2544_v59  ;;  %v3242_v44 = vmul.f32 %v2549_v62, %v2659_v50  ;;  %v1015_v15 = vmul.f32 %v2646_v40, %v968_v54 }
 0x153   :  { %v717_v8 = vadd.f32 %v685_v33, %v607_v57  ;;  %v1298_v4 = vperm.slane %v3230_v56, 0  ;;  %v1424_v27 = vperm.slane %v3230_v56, 1  ;;  %v1125_v17 = vmul.f32 %v2678_v26, %v1078_v13 }
 0x154   :  { %2194 = vst [vmem:[#allocation7 + $0x8] sm:$0xff] %v2162_v25  ;;  %v1534_v34 = vperm.slane %v3230_v56, 2  ;;  %v466_v28 = vmul.f32 %v2906_v39, %v395_v22  ;;  %v576_v41 = vmul.f32 %v2925_v3, %v528_v12  ;;  %v1644_v33 = vperm.slane %v3230_v56, 3 }
 0x155   :  { %v827_v60 = vadd.f32 %v795_v0, %v717_v8  ;;  %v1754_v50 = vperm.slane %v3230_v56, 4  ;;  %v1864_v43 = vperm.slane %v3230_v56, 5  ;;  %v1974_v14 = vperm.slane %v3230_v56, 6 }
 0x156   :  { %v608_v57 = vadd.f32 %v576_v41, %v466_v28  ;;  %v686_v0 = vmul.f32 %v2950_v7, %v638_v36  ;;  %v796_v25 = vmul.f32 %v2966_v35, %v748_v9  ;;  %v1235_v42 = vmul.f32 %v2705_v37, %v1188_v6 }
 0x157   :  { %v937_v38 = vadd.f32 %v905_v29, %v827_v60  ;;  %v1361_v22 = vmul.f32 %v2722_v10, %v1298_v4  ;;  %v1471_v12 = vmul.f32 %v2744_v32, %v1424_v27  ;;  %v1581_v29 = vmul.f32 %v2769_v63, %v1534_v34 }
 0x158   :  { %v2084_v60 = vperm.slane %v3230_v56, 7  ;;  %v718_v62 = vadd.f32 %v686_v0, %v608_v57  ;;  %v906_v59 = vmul.f32 %v2985_v11, %v858_v53  ;;  %v1691_v28 = vmul.f32 %v2785_v20, %v1644_v33 }
 0x159   :  { %v1047_v8 = vadd.f32 %v1015_v15, %v937_v38  ;;  %v1801_v36 = vmul.f32 %v2808_v58, %v1754_v50  ;;  %v1911_v9 = vmul.f32 %v2828_v52, %v1864_v43  ;;  %v2021_v15 = vmul.f32 %v2860_v51, %v1974_v14 }
 0x15a   :  { %v828_v41 = vadd.f32 %v796_v25, %v718_v62  ;;  %v1016_v38 = vmul.f32 %v3005_v21, %v968_v54  ;;  %v396_v32 = vperm.slane %v3238_v16, 0  ;;  %v529_v56 = vperm.slane %v3238_v16, 1 }
 0x15b   :  { %v1157_v3 = vadd.f32 %v1125_v17, %v1047_v8  ;;  %v639_v57 = vperm.slane %v3238_v16, 2  ;;  %v749_v53 = vperm.slane %v3238_v16, 3  ;;  %v2131_v17 = vmul.f32 %v2889_v46, %v2084_v60 }
 0x15c   :  { %v938_v0 = vadd.f32 %v906_v59, %v828_v41  ;;  %v1126_v8 = vmul.f32 %v3041_v31, %v1078_v13  ;;  %v467_v52 = vmul.f32 %v2491_v1, %v396_v32  ;;  %v577_v62 = vmul.f32 %v2531_v45, %v529_v56 }
 0x15d   :  { %v1267_v63 = vadd.f32 %v1235_v42, %v1157_v3  ;;  %v687_v54 = vmul.f32 %v2574_v19, %v639_v57  ;;  %v859_v3 = vperm.slane %v3238_v16, 4  ;;  %v1236_v42 = vmul.f32 %v3062_v23, %v1188_v6 }
 0x15e   :  { %v1048_v25 = vadd.f32 %v1016_v38, %v938_v0  ;;  %v1362_v21 = vmul.f32 %v3082_v2, %v1298_v4  ;;  %v1472_v58 = vmul.f32 %v3102_v49, %v1424_v27  ;;  %v609_v59 = vadd.f32 %v577_v62, %v467_v52 }
 0x15f   :  { %v1393_v51 = vadd.f32 %v1361_v22, %v1267_v63  ;;  %v797_v13 = vmul.f32 %v2603_v48, %v749_v53  ;;  %v969_v41 = vperm.slane %v3238_v16, 5  ;;  %v1582_v22 = vmul.f32 %v3121_v18, %v1534_v34 }
 0x160   :  { %v1158_v63 = vadd.f32 %v1126_v8, %v1048_v25  ;;  %v1692_v19 = vmul.f32 %v3141_v61, %v1644_v33  ;;  %v1079_v45 = vperm.slane %v3238_v16, 6  ;;  %v719_v0 = vadd.f32 %v687_v54, %v609_v59 }
 0x161   :  { %v1503_v46 = vadd.f32 %v1471_v12, %v1393_v51  ;;  %v907_v6 = vmul.f32 %v2626_v5, %v859_v3  ;;  %v1189_v4 = vperm.slane %v3238_v16, 7  ;;  %v1802_v52 = vmul.f32 %v3161_v30, %v1754_v50 }
 0x162   :  { %v1268_v27 = vadd.f32 %v1236_v42, %v1158_v63  ;;  %v1912_v51 = vmul.f32 %v3181_v47, %v1864_v43  ;;  %v1299_v12 = vperm.slane %v3242_v44, 0  ;;  %v2022_v34 = vmul.f32 %v3201_v24, %v1974_v14 }
 0x163   :  { %v1613_v38 = vadd.f32 %v1581_v29, %v1503_v46  ;;  %v829_v62 = vadd.f32 %v797_v13, %v719_v0  ;;  %v1017_v33 = vmul.f32 %v2646_v40, %v969_v41  ;;  %v2132_v46 = vmul.f32 %v3220_v55, %v2084_v60  ;;  %v4463_v60 = vld [vmem:[#allocation28_spill] sm:$0xff] }
 0x164   :  { %v1394_v25 = vadd.f32 %v1362_v21, %v1268_v27  ;;  %v1127_v29 = vmul.f32 %v2678_v26, %v1079_v45  ;;  %v1425_v16 = vperm.slane %v3242_v44, 1  ;;  %v1237_v50 = vmul.f32 %v2705_v37, %v1189_v4 }
 0x165   :  { %v1723_v8 = vadd.f32 %v1691_v28, %v1613_v38  ;;  %v939_v42 = vadd.f32 %v907_v6, %v829_v62  ;;  %v1535_v43 = vperm.slane %v3242_v44, 2  ;;  %v1363_v28 = vmul.f32 %v2722_v10, %v1299_v12 }
 0x166   :  { %v1504_v59 = vadd.f32 %v1472_v58, %v1394_v25  ;;  %v1645_v14 = vperm.slane %v3242_v44, 3  ;;  %v468_v13 = vmul.f32 %v2906_v39, %v396_v32  ;;  %v578_v38 = vmul.f32 %v4463_v60, %v529_v56  ;;  %v4464_v32 = vld [vmem:[#allocation21_spill] sm:$0xff] }
 0x167   :  { %v1833_v54 = vadd.f32 %v1801_v36, %v1723_v8  ;;  %v1049_v63 = vadd.f32 %v1017_v33, %v939_v42  ;;  %v688_v0 = vmul.f32 %v2950_v7, %v639_v57  ;;  %v1755_v36 = vperm.slane %v3242_v44, 4  ;;  %v4465_v33 = vld [vmem:[#allocation22_spill] sm:$0xff] }
 0x168   :  { %v1614_v27 = vadd.f32 %v1582_v22, %v1504_v59  ;;  %v1865_v6 = vperm.slane %v3242_v44, 5  ;;  %v610_v25 = vadd.f32 %v578_v38, %v468_v13  ;;  %v798_v10 = vmul.f32 %v2966_v35, %v749_v53  ;;  %v4467_v13 = vld [vmem:[#allocation25_spill] sm:$0xff] }
 0x169   :  { %v1943_v21 = vadd.f32 %v1911_v9, %v1833_v54  ;;  %v1159_v62 = vadd.f32 %v1127_v29, %v1049_v63  ;;  %v1473_v9 = vmul.f32 %v4464_v32, %v1425_v16  ;;  %v1583_v54 = vmul.f32 %v4465_v33, %v1535_v43  ;;  %v4469_v63 = vld [vmem:[#allocation26_spill] sm:$0xff] }
 0x16a   :  { %v1724_v37 = vadd.f32 %v1692_v19, %v1614_v27  ;;  %v2085_v56 = vperm.slane %v3242_v44, 7  ;;  %v720_v42 = vadd.f32 %v688_v0, %v610_v25  ;;  %v908_v59 = vmul.f32 %v2985_v11, %v859_v3  ;;  %v4470_v33 = vld [vmem:[#allocation30_spill] sm:$0xff]  ;;  %v4471_v0 = vld [vmem:[#allocation27_spill] sm:$0xff]  ;;  %v2318_v3 = vld [vmem:[#allocation5 + $0x30] sm:$0xff] }
 0x16b   :  { %v2053_v58 = vadd.f32 %v2021_v15, %v1943_v21  ;;  %v1269_v22 = vadd.f32 %v1237_v50, %v1159_v62  ;;  %v1693_v8 = vmul.f32 %v2785_v20, %v1645_v14  ;;  %v4466_v15 = vld [vmem:[#allocation24_spill] sm:$0xff]  ;;  %v1913_v21 = vmul.f32 %v4467_v13, %v1865_v6 }
 0x16c   :  { %v1834_v7 = vadd.f32 %v1802_v52, %v1724_v37  ;;  %v1803_v29 = vmul.f32 %v4466_v15, %v1755_v36  ;;  %v4468_v53 = vperm.slane %v3242_v44, 6  ;;  %v830_v27 = vadd.f32 %v798_v10, %v720_v42  ;;  %v4472_v52 = vld [vmem:[#allocation13_spill] sm:$0xff] }
 0x16d   :  { %v2163_v57 = vadd.f32 %v2131_v17, %v2053_v58  ;;  %v1395_v19 = vadd.f32 %v1363_v28, %v1269_v22  ;;  %v1018_v17 = vmul.f32 %v4470_v33, %v969_v41  ;;  %v2133_v58 = vmul.f32 %v4471_v0, %v2085_v56 }
 0x16e   :  { %v2023_v38 = vmul.f32 %v4469_v63, %v4468_v53  ;;  %v1944_v50 = vadd.f32 %v1912_v51, %v1834_v7  ;;  %v1128_v37 = vmul.f32 %v3041_v31, %v1079_v45  ;;  %v3321_v62 = vmul.f32 %v2318_v3, %v4472_v52 }
 0x16f   :  { %2195 = vst [vmem:[#allocation7 + $0x10] sm:$0xff] %v2163_v57  ;;  %v1505_v25 = vadd.f32 %v1473_v9, %v1395_v19  ;;  %v940_v13 = vadd.f32 %v908_v59, %v830_v27  ;;  %v1238_v28 = vmul.f32 %v3062_v23, %v1189_v4  ;;  %v1364_v57 = vmul.f32 %v3082_v2, %v1299_v12  ;;  %v4473_v59 = vld [vmem:[#allocation12_spill] sm:$0xff]  ;;  %v4474_v19 = vld [vmem:[#allocation15_spill] sm:$0xff] }
 0x170   :  { %v2054_v22 = vadd.f32 %v2022_v34, %v1944_v50  ;;  %v397_v10 = vperm.slane %v3321_v62, 0  ;;  %v530_v41 = vperm.slane %v3321_v62, 1  ;;  %v640_v7 = vperm.slane %v3321_v62, 2 }
 0x171   :  { %v1615_v51 = vadd.f32 %v1583_v54, %v1505_v25  ;;  %v1050_v42 = vadd.f32 %v1018_v17, %v940_v13  ;;  %v750_v45 = vperm.slane %v3321_v62, 3  ;;  %v1474_v50 = vmul.f32 %v3102_v49, %v1425_v16 }
 0x172   :  { %v2164_v3 = vadd.f32 %v2132_v46, %v2054_v22  ;;  %v469_v9 = vmul.f32 %v2491_v1, %v397_v10  ;;  %v579_v4 = vmul.f32 %v4473_v59, %v530_v41  ;;  %v689_v12 = vmul.f32 %v4474_v19, %v640_v7 }
 0x173   :  { %v1725_v34 = vadd.f32 %v1693_v8, %v1615_v51  ;;  %v1160_v27 = vadd.f32 %v1128_v37, %v1050_v42  ;;  %v1584_v2 = vmul.f32 %v3121_v18, %v1535_v43  ;;  %v1694_v54 = vmul.f32 %v3141_v61, %v1645_v14  ;;  %v2319_v8 = vld [vmem:[#allocation5 + $0x38] sm:$0xff] }
 0x174   :  { %2196 = vst [vmem:[#allocation7 + $0x18] sm:$0xff] %v2164_v3  ;;  %v611_v13 = vadd.f32 %v579_v4, %v469_v9  ;;  %v799_v17 = vmul.f32 %v2603_v48, %v750_v45  ;;  %v970_v46 = vperm.slane %v3321_v62, 5  ;;  %v1804_v53 = vmul.f32 %v3161_v30, %v1755_v36  ;;  %v4475_v37 = vld [vmem:[#allocation14_spill] sm:$0xff] }
 0x175   :  { %v1835_v25 = vadd.f32 %v1803_v29, %v1725_v34  ;;  %v1270_v22 = vadd.f32 %v1238_v28, %v1160_v27  ;;  %v1914_v0 = vmul.f32 %v3181_v47, %v1865_v6  ;;  %v3341_v51 = vmul.f32 %v2319_v8, %v4475_v37 }
 0x176   :  { %v721_v16 = vadd.f32 %v689_v12, %v611_v13  ;;  %v4476_v43 = vperm.slane %v3321_v62, 4  ;;  %v1080_v42 = vperm.slane %v3321_v62, 6  ;;  %v4477_v29 = vperm.slane %v3242_v44, 6  ;;  %v2320_v12 = vld [vmem:[#allocation5 + $0x40] sm:$0xff]  ;;  %v2322_v44 = vld [vmem:[#allocation5 + $0x50] sm:$0xff] }
 0x177   :  { %v1945_v3 = vadd.f32 %v1913_v21, %v1835_v25  ;;  %v1396_v9 = vadd.f32 %v1364_v57, %v1270_v22  ;;  %v4319_v36 = vperm.slane %v3321_v62, 7  ;;  %v2134_v6 = vmul.f32 %v3220_v55, %v2085_v56 }
 0x178   :  { %v909_v14 = vmul.f32 %v2626_v5, %v4476_v43  ;;  %v2024_v28 = vmul.f32 %v3201_v24, %v4477_v29  ;;  %v831_v4 = vadd.f32 %v799_v17, %v721_v16  ;;  %v1019_v34 = vmul.f32 %v2646_v40, %v970_v46  ;;  %v2321_v43 = vld [vmem:[#allocation5 + $0x48] sm:$0xff] }
 0x179   :  { %v3354_v27 = vmul.f32 %v2320_v12, %v4472_v52  ;;  %v2055_v13 = vadd.f32 %v2023_v38, %v1945_v3  ;;  %v1506_v8 = vadd.f32 %v1474_v50, %v1396_v9  ;;  %v3357_v21 = vmul.f32 %v2321_v43, %v4475_v37  ;;  %v4479_v38 = vld [vmem:[#allocation19_spill] sm:$0xff] }
 0x17a   :  { %v3360_v57 = vmul.f32 %v2322_v44, %v4472_v52  ;;  %v941_v25 = vadd.f32 %v909_v14, %v831_v4  ;;  %v1129_v56 = vmul.f32 %v2678_v26, %v1080_v42  ;;  %v1300_v17 = vperm.slane %v3341_v51, 0  ;;  %v4481_v52 = vld [vmem:[#allocation20_spill] sm:$0xff] }
 0x17b   :  { %v1426_v22 = vperm.slane %v3341_v51, 1  ;;  %v2165_v16 = vadd.f32 %v2133_v58, %v2055_v13  ;;  %v1616_v29 = vadd.f32 %v1584_v2, %v1506_v8  ;;  %v1239_v50 = vmul.f32 %v4479_v38, %v4319_v36  ;;  %v4480_v2 = vld [vmem:[#allocation29_spill] sm:$0xff] }
 0x17c   :  { %4478 = vst [vmem:[#allocation21_spill] sm:$0xff] %v3360_v57  ;;  %v1536_v3 = vperm.slane %v3341_v51, 2  ;;  %v1051_v9 = vadd.f32 %v1019_v34, %v941_v25  ;;  %v1646_v12 = vperm.slane %v3341_v51, 3  ;;  %v470_v43 = vmul.f32 %v2906_v39, %v397_v10  ;;  %v4482_v10 = vld [vmem:[#allocation22_spill] sm:$0xff] }
 0x17d   :  { %v580_v14 = vmul.f32 %v4463_v60, %v530_v41  ;;  %2197 = vst [vmem:[#allocation7 + $0x20] sm:$0xff] %v2165_v16  ;;  %v1726_v4 = vadd.f32 %v1694_v54, %v1616_v29  ;;  %v1756_v44 = vperm.slane %v3341_v51, 4  ;;  %v1866_v58 = vperm.slane %v3341_v51, 5 }
 0x17e   :  { %v690_v13 = vmul.f32 %v4480_v2, %v640_v7  ;;  %v1161_v8 = vadd.f32 %v1129_v56, %v1051_v9  ;;  %v1365_v36 = vmul.f32 %v4481_v52, %v1300_v17  ;;  %v800_v34 = vmul.f32 %v2966_v35, %v750_v45 }
 0x17f   :  { %v612_v37 = vadd.f32 %v580_v14, %v470_v43  ;;  %v1836_v25 = vadd.f32 %v1804_v53, %v1726_v4  ;;  %v1475_v57 = vmul.f32 %v4464_v32, %v1426_v22  ;;  %v1585_v55 = vmul.f32 %v4482_v10, %v1536_v3  ;;  %v4484_v43 = vld [vmem:[#allocation25_spill] sm:$0xff] }
 0x180   :  { %v1976_v41 = vperm.slane %v3341_v51, 6  ;;  %v1271_v54 = vadd.f32 %v1239_v50, %v1161_v8  ;;  %v1695_v16 = vmul.f32 %v2785_v20, %v1646_v12  ;;  %v4483_v60 = vperm.slane %v3321_v62, 4 }
 0x181   :  { %v722_v29 = vadd.f32 %v690_v13, %v612_v37  ;;  %v1946_v56 = vadd.f32 %v1914_v0, %v1836_v25  ;;  %v1805_v9 = vmul.f32 %v4466_v15, %v1756_v44  ;;  %v1915_v45 = vmul.f32 %v4484_v43, %v1866_v58 }
 0x182   :  { %v910_v7 = vmul.f32 %v2985_v11, %v4483_v60  ;;  %v1397_v14 = vadd.f32 %v1365_v36, %v1271_v54  ;;  %v1020_v10 = vmul.f32 %v4470_v33, %v970_v46  ;;  %v1130_v50 = vmul.f32 %v3041_v31, %v1080_v42 }
 0x183   :  { %v832_v4 = vadd.f32 %v800_v34, %v722_v29  ;;  %v2056_v8 = vadd.f32 %v2024_v28, %v1946_v56  ;;  %v398_v37 = vperm.slane %v3354_v27, 0  ;;  %v531_v13 = vperm.slane %v3354_v27, 1  ;;  %v4487_v56 = vld [vmem:[#allocation27_spill] sm:$0xff] }
 0x184   :  { %v641_v60 = vperm.slane %v3354_v27, 2  ;;  %v1507_v0 = vadd.f32 %v1475_v57, %v1397_v14  ;;  %v751_v15 = vperm.slane %v3354_v27, 3  ;;  %v861_v43 = vperm.slane %v3354_v27, 4 }
 0x185   :  { %v942_v25 = vadd.f32 %v910_v7, %v832_v4  ;;  %v2166_v53 = vadd.f32 %v2134_v6, %v2056_v8  ;;  %v471_v36 = vmul.f32 %v2491_v1, %v398_v37  ;;  %v581_v46 = vmul.f32 %v4473_v59, %v531_v13 }
 0x186   :  { %v691_v42 = vmul.f32 %v4474_v19, %v641_v60  ;;  %v1617_v28 = vadd.f32 %v1585_v55, %v1507_v0  ;;  %v2025_v34 = vmul.f32 %v4469_v63, %v1976_v41  ;;  %v4485_v29 = vperm.slane %v3321_v62, 7  ;;  %v4488_v55 = vld [vmem:[#allocation32_spill] sm:$0xff] }
 0x187   :  { %v1052_v54 = vadd.f32 %v1020_v10, %v942_v25  ;;  %2198 = vst [vmem:[#allocation7 + $0x28] sm:$0xff] %v2166_v53  ;;  %v4486_v7 = vperm.slane %v3341_v51, 7  ;;  %v613_v6 = vadd.f32 %v581_v46, %v471_v36  ;;  %v801_v4 = vmul.f32 %v2603_v48, %v751_v15 }
 0x188   :  { %v1240_v57 = vmul.f32 %v3062_v23, %v4485_v29  ;;  %v971_v8 = vperm.slane %v3354_v27, 5  ;;  %v1727_v59 = vadd.f32 %v1695_v16, %v1617_v28  ;;  %v1366_v0 = vmul.f32 %v4488_v55, %v1300_v17 }
 0x189   :  { %v2135_v14 = vmul.f32 %v4487_v56, %v4486_v7  ;;  %v1162_v19 = vadd.f32 %v1130_v50, %v1052_v54  ;;  %v1476_v10 = vmul.f32 %v3102_v49, %v1426_v22  ;;  %v723_v25 = vadd.f32 %v691_v42, %v613_v6 }
 0x18a   :  { %v911_v62 = vmul.f32 %v2626_v5, %v861_v43  ;;  %v1081_v53 = vperm.slane %v3354_v27, 6  ;;  %v1191_v29 = vperm.slane %v3354_v27, 7  ;;  %v1837_v63 = vadd.f32 %v1805_v9, %v1727_v59 }
 0x18b   :  { %v1272_v7 = vadd.f32 %v1240_v57, %v1162_v19  ;;  %v1586_v36 = vmul.f32 %v3121_v18, %v1536_v3  ;;  %v1696_v46 = vmul.f32 %v3141_v61, %v1646_v12  ;;  %v1806_v16 = vmul.f32 %v3161_v30, %v1756_v44 }
 0x18c   :  { %v1916_v50 = vmul.f32 %v3181_v47, %v1866_v58  ;;  %v833_v17 = vadd.f32 %v801_v4, %v723_v25  ;;  %v1021_v22 = vmul.f32 %v2646_v40, %v971_v8  ;;  %v1947_v42 = vadd.f32 %v1915_v45, %v1837_v63  ;;  %v4489_v45 = vld [vmem:[#allocation28_spill] sm:$0xff] }
 0x18d   :  { %v1398_v28 = vadd.f32 %v1366_v0, %v1272_v7  ;;  %v2026_v54 = vmul.f32 %v3201_v24, %v1976_v41  ;;  %v1301_v6 = vperm.slane %v3357_v21, 0  ;;  %v1131_v59 = vmul.f32 %v2678_v26, %v1081_v53 }
 0x18e   :  { %v943_v27 = vadd.f32 %v911_v62, %v833_v17  ;;  %v1241_v19 = vmul.f32 %v4479_v38, %v1191_v29  ;;  %v1427_v3 = vperm.slane %v3357_v21, 1  ;;  %v2057_v12 = vadd.f32 %v2025_v34, %v1947_v42 }
 0x18f   :  { %v1508_v44 = vadd.f32 %v1476_v10, %v1398_v28  ;;  %v4331_v58 = vperm.slane %v3357_v21, 2  ;;  %v4329_v9 = vperm.slane %v3357_v21, 3  ;;  %v4330_v63 = vperm.slane %v3357_v21, 4 }
 0x190   :  { %v1053_v57 = vadd.f32 %v1021_v22, %v943_v27  ;;  %v472_v41 = vmul.f32 %v2906_v39, %v398_v37  ;;  %v582_v4 = vmul.f32 %v4489_v45, %v531_v13  ;;  %v2167_v0 = vadd.f32 %v2135_v14, %v2057_v12  ;;  %v4491_v27 = vld [vmem:[#allocation39_spill] sm:$0xff] }
 0x191   :  { %v1618_v25 = vadd.f32 %v1586_v36, %v1508_v44  ;;  %v4332_v62 = vperm.slane %v3357_v21, 5  ;;  %v692_v7 = vmul.f32 %v4480_v2, %v641_v60  ;;  %v1367_v34 = vmul.f32 %v4481_v52, %v1301_v6  ;;  %v4492_v60 = vld [vmem:[#allocation22_spill] sm:$0xff] }
 0x192   :  { %v1163_v17 = vadd.f32 %v1131_v59, %v1053_v57  ;;  %v614_v10 = vadd.f32 %v582_v4, %v472_v41  ;;  %v802_v42 = vmul.f32 %v2966_v35, %v751_v15  ;;  %2199 = vst [vmem:[#allocation7 + $0x30] sm:$0xff] %v2167_v0  ;;  %v4490_v28 = vperm.slane %v3341_v51, 7  ;;  %v4493_v51 = vld [vmem:[#allocation24_spill] sm:$0xff]  ;;  %v4494_v41 = vld [vmem:[#allocation25_spill] sm:$0xff] }
 0x193   :  { %v1728_v22 = vadd.f32 %v1696_v46, %v1618_v25  ;;  %v1477_v13 = vmul.f32 %v4464_v32, %v1427_v3  ;;  %v1977_v14 = vperm.slane %v3357_v21, 6  ;;  %v1587_v59 = vmul.f32 %v4492_v60, %v4331_v58 }
 0x194   :  { %v2136_v37 = vmul.f32 %v4491_v27, %v4490_v28  ;;  %v1273_v36 = vadd.f32 %v1241_v19, %v1163_v17  ;;  %v724_v12 = vadd.f32 %v692_v7, %v614_v10  ;;  %v912_v44 = vmul.f32 %v2985_v11, %v861_v43  ;;  %v4495_v10 = vld [vmem:[#allocation21_spill] sm:$0xff] }
 0x195   :  { %v1838_v57 = vadd.f32 %v1806_v16, %v1728_v22  ;;  %v1697_v15 = vmul.f32 %v2785_v20, %v4329_v9  ;;  %v1807_v46 = vmul.f32 %v4493_v51, %v4330_v63  ;;  %v1917_v19 = vmul.f32 %v4494_v41, %v4332_v62 }
 0x196   :  { %v1399_v4 = vadd.f32 %v1367_v34, %v1273_v36  ;;  %v834_v25 = vadd.f32 %v802_v42, %v724_v12  ;;  %v1022_v7 = vmul.f32 %v4470_v33, %v971_v8  ;;  %v1132_v16 = vmul.f32 %v3041_v31, %v1081_v53  ;;  %v4496_v53 = vld [vmem:[#allocation12_spill] sm:$0xff] }
 0x197   :  { %v1948_v43 = vadd.f32 %v1916_v50, %v1838_v57  ;;  %v1242_v17 = vmul.f32 %v3062_v23, %v1191_v29  ;;  %v399_v22 = vperm.slane %v4495_v10, 0  ;;  %v532_v63 = vperm.slane %v4495_v10, 1  ;;  %v4497_v29 = vld [vmem:[#allocation15_spill] sm:$0xff] }
 0x198   :  { %v1509_v28 = vadd.f32 %v1477_v13, %v1399_v4  ;;  %v944_v9 = vadd.f32 %v912_v44, %v834_v25  ;;  %v642_v58 = vperm.slane %v4495_v10, 2  ;;  %v752_v42 = vperm.slane %v4495_v10, 3  ;;  %v2323_v44 = vld [vmem:[#allocation5 + $0x58] sm:$0xff] }
 0x199   :  { %v2058_v62 = vadd.f32 %v2026_v54, %v1948_v43  ;;  %v473_v34 = vmul.f32 %v2491_v1, %v399_v22  ;;  %v583_v12 = vmul.f32 %v4496_v53, %v532_v63  ;;  %v1368_v13 = vmul.f32 %v4488_v55, %v1301_v6  ;;  %v4498_v4 = vld [vmem:[#allocation14_spill] sm:$0xff] }
 0x19a   :  { %v1619_v50 = vadd.f32 %v1587_v59, %v1509_v28  ;;  %v1054_v36 = vadd.f32 %v1022_v7, %v944_v9  ;;  %v693_v57 = vmul.f32 %v4497_v29, %v642_v58  ;;  %v3462_v25 = vmul.f32 %v2323_v44, %v4498_v4  ;;  %v4499_v9 = vld [vmem:[#allocation26_spill] sm:$0xff] }
 0x19b   :  { %v2168_v0 = vadd.f32 %v2136_v37, %v2058_v62  ;;  %v803_v54 = vmul.f32 %v2603_v48, %v752_v42  ;;  %v615_v23 = vadd.f32 %v583_v12, %v473_v34  ;;  %v972_v8 = vperm.slane %v4495_v10, 5 }
 0x19c   :  { %v1729_v43 = vadd.f32 %v1697_v15, %v1619_v50  ;;  %v1164_v1 = vadd.f32 %v1132_v16, %v1054_v36  ;;  %v2027_v59 = vmul.f32 %v4499_v9, %v1977_v14  ;;  %v4500_v7 = vperm.slane %v3357_v21, 7 }
 0x19d   :  { %2200 = vst [vmem:[#allocation7 + $0x38] sm:$0xff] %v2168_v0  ;;  %v1478_v6 = vmul.f32 %v3102_v49, %v1427_v3  ;;  %v4501_v37 = vperm.slane %v4495_v10, 4  ;;  %v725_v15 = vadd.f32 %v693_v57, %v615_v23  ;;  %v1082_v16 = vperm.slane %v4495_v10, 6 }
 0x19e   :  { %v2137_v62 = vmul.f32 %v4487_v56, %v4500_v7  ;;  %v1839_v44 = vadd.f32 %v1807_v46, %v1729_v43  ;;  %v1274_v48 = vadd.f32 %v1242_v17, %v1164_v1  ;;  %v4502_v34 = vperm.slane %v3357_v21, 2 }
 0x19f   :  { %v913_v28 = vmul.f32 %v2626_v5, %v4501_v37  ;;  %v4503_v50 = vperm.slane %v3357_v21, 3  ;;  %v1192_v12 = vperm.slane %v4495_v10, 7  ;;  %v1302_v3 = vperm.slane %v3462_v25, 0 }
 0x1a0   :  { %v1588_v0 = vmul.f32 %v3121_v18, %v4502_v34  ;;  %v1949_v7 = vadd.f32 %v1917_v19, %v1839_v44  ;;  %v1400_v4 = vadd.f32 %v1368_v13, %v1274_v48  ;;  %v835_v37 = vadd.f32 %v803_v54, %v725_v15 }
 0x1a1   :  { %v1698_v36 = vmul.f32 %v3141_v61, %v4503_v50  ;;  %v1023_v1 = vmul.f32 %v2646_v40, %v972_v8  ;;  %v4504_v23 = vperm.slane %v3357_v21, 4  ;;  %v4505_v17 = vperm.slane %v3357_v21, 5 }
 0x1a2   :  { %v2028_v43 = vmul.f32 %v3201_v24, %v1977_v14  ;;  %v1428_v34 = vperm.slane %v3462_v25, 1  ;;  %v2059_v50 = vadd.f32 %v2027_v59, %v1949_v7  ;;  %v1510_v5 = vadd.f32 %v1478_v6, %v1400_v4 }
 0x1a3   :  { %v1808_v46 = vmul.f32 %v3161_v30, %v4504_v23  ;;  %v1918_v57 = vmul.f32 %v3181_v47, %v4505_v17  ;;  %v945_v61 = vadd.f32 %v913_v28, %v835_v37  ;;  %v1133_v48 = vmul.f32 %v2678_v26, %v1082_v16 }
 0x1a4   :  { %v1243_v19 = vmul.f32 %v4479_v38, %v1192_v12  ;;  %v1369_v13 = vmul.f32 %v4481_v52, %v1302_v3  ;;  %v1538_v54 = vperm.slane %v3462_v25, 2  ;;  %v1648_v44 = vperm.slane %v3462_v25, 3 }
 0x1a5   :  { %v2169_v15 = vadd.f32 %v2137_v62, %v2059_v50  ;;  %v1620_v23 = vadd.f32 %v1588_v0, %v1510_v5  ;;  %v1055_v17 = vadd.f32 %v1023_v1, %v945_v61  ;;  %v474_v14 = vmul.f32 %v2906_v39, %v399_v22 }
 0x1a6   :  { %v1758_v40 = vperm.slane %v3462_v25, 4  ;;  %v4347_v4 = vperm.slane %v3462_v25, 5  ;;  %v584_v59 = vmul.f32 %v4489_v45, %v532_v63  ;;  %v694_v6 = vmul.f32 %v4480_v2, %v642_v58 }
 0x1a7   :  { %2201 = vst [vmem:[#allocation7 + $0x40] sm:$0xff] %v2169_v15  ;;  %v1730_v28 = vadd.f32 %v1698_v36, %v1620_v23  ;;  %v1165_v7 = vadd.f32 %v1133_v48, %v1055_v17  ;;  %v1978_v37 = vperm.slane %v3462_v25, 6  ;;  %v2088_v52 = vperm.slane %v3462_v25, 7 }
 0x1a8   :  { %v4506_v5 = vperm.slane %v3357_v21, 7  ;;  %v1479_v22 = vmul.f32 %v4464_v32, %v1428_v34  ;;  %v616_v62 = vadd.f32 %v584_v59, %v474_v14  ;;  %v804_v0 = vmul.f32 %v2966_v35, %v752_v42 }
 0x1a9   :  { %v1840_v1 = vadd.f32 %v1808_v46, %v1730_v28  ;;  %v1275_v63 = vadd.f32 %v1243_v19, %v1165_v7  ;;  %v1589_v58 = vmul.f32 %v4492_v60, %v1538_v54  ;;  %v1699_v36 = vmul.f32 %v2785_v20, %v1648_v44  ;;  %v2324_v7 = vld [vmem:[#allocation5 + $0x60] sm:$0xff] }
 0x1aa   :  { %v2138_v61 = vmul.f32 %v4491_v27, %v4506_v5  ;;  %v1809_v50 = vmul.f32 %v4493_v51, %v1758_v40  ;;  %v1919_v48 = vmul.f32 %v4494_v41, %v4347_v4  ;;  %v726_v21 = vadd.f32 %v694_v6, %v616_v62  ;;  %v4508_v5 = vld [vmem:[#allocation13_spill] sm:$0xff] }
 0x1ab   :  { %v4507_v15 = vperm.slane %v4495_v10, 4  ;;  %v1950_v17 = vadd.f32 %v1918_v57, %v1840_v1  ;;  %v1401_v14 = vadd.f32 %v1369_v13, %v1275_v63  ;;  %v2029_v42 = vmul.f32 %v4499_v9, %v1978_v37  ;;  %v4509_v10 = vld [vmem:[#allocation31_spill] sm:$0xff] }
 0x1ac   :  { %v2139_v46 = vmul.f32 %v4487_v56, %v2088_v52  ;;  %v836_v19 = vadd.f32 %v804_v0, %v726_v21  ;;  %v1024_v59 = vmul.f32 %v4470_v33, %v972_v8  ;;  %v1134_v28 = vmul.f32 %v3041_v31, %v1082_v16  ;;  %v4513_v56 = vld [vmem:[#allocation35_spill] sm:$0xff] }
 0x1ad   :  { %v914_v23 = vmul.f32 %v2985_v11, %v4507_v15  ;;  %v3523_v51 = vmul.f32 %v2324_v7, %v4508_v5  ;;  %v2060_v6 = vadd.f32 %v2028_v43, %v1950_v17  ;;  %v1511_v62 = vadd.f32 %v1479_v22, %v1401_v14  ;;  %v4510_v43 = vld [vmem:[#allocation11_spill] sm:$0xff]  ;;  %v4512_v15 = vld [vmem:[#allocation16_spill] sm:$0xff] }
 0x1ae   :  { %v1244_v4 = vmul.f32 %v4509_v10, %v1192_v12  ;;  %v1370_v57 = vmul.f32 %v4488_v55, %v1302_v3  ;;  %v1480_v17 = vmul.f32 %v3102_v49, %v1428_v34  ;;  %v1590_v14 = vmul.f32 %v3121_v18, %v1538_v54  ;;  %v4515_v34 = vld [vmem:[#allocation17_spill] sm:$0xff] }
 0x1af   :  { %v946_v13 = vadd.f32 %v914_v23, %v836_v19  ;;  %v400_v1 = vperm.slane %v3523_v51, 0  ;;  %v533_v63 = vperm.slane %v3523_v51, 1  ;;  %v643_v0 = vperm.slane %v3523_v51, 2  ;;  %v2325_v19 = vld [vmem:[#allocation5 + $0x68] sm:$0xff] }
 0x1b0   :  { %v2170_v8 = vadd.f32 %v2138_v61, %v2060_v6  ;;  %v1621_v21 = vadd.f32 %v1589_v58, %v1511_v62  ;;  %v753_v16 = vperm.slane %v3523_v51, 3  ;;  %v4511_v61 = vld [vmem:[#allocation14_spill] sm:$0xff]  ;;  %v1700_v10 = vmul.f32 %v4513_v56, %v1648_v44 }
 0x1b1   :  { %v1056_v7 = vadd.f32 %v1024_v59, %v946_v13  ;;  %v475_v22 = vmul.f32 %v4510_v43, %v400_v1  ;;  %v585_v12 = vmul.f32 %v4496_v53, %v533_v63  ;;  %v695_v3 = vmul.f32 %v4497_v29, %v643_v0 }
 0x1b2   :  { %2202 = vst [vmem:[#allocation7 + $0x48] sm:$0xff] %v2170_v8  ;;  %v1731_v23 = vadd.f32 %v1699_v36, %v1621_v21  ;;  %v3538_v58 = vmul.f32 %v2325_v19, %v4511_v61  ;;  %v805_v59 = vmul.f32 %v4512_v15, %v753_v16  ;;  %v973_v13 = vperm.slane %v3523_v51, 5 }
 0x1b3   :  { %v1166_v6 = vadd.f32 %v1134_v28, %v1056_v7  ;;  %v617_v62 = vadd.f32 %v585_v12, %v475_v22  ;;  %v1810_v8 = vmul.f32 %v3161_v30, %v1758_v40  ;;  %v4514_v36 = vperm.slane %v3523_v51, 4 }
 0x1b4   :  { %v1841_v55 = vadd.f32 %v1809_v50, %v1731_v23  ;;  %v1083_v19 = vperm.slane %v3523_v51, 6  ;;  %v4355_v28 = vperm.slane %v3523_v51, 7  ;;  %v4516_v22 = vperm.slane %v3462_v25, 5  ;;  %v2327_v25 = vld [vmem:[#allocation5 + $0x78] sm:$0xff] }
 0x1b5   :  { %v915_v21 = vmul.f32 %v4515_v34, %v4514_v36  ;;  %v1276_v54 = vadd.f32 %v1244_v4, %v1166_v6  ;;  %v727_v18 = vadd.f32 %v695_v3, %v617_v62  ;;  %v2030_v50 = vmul.f32 %v3201_v24, %v1978_v37  ;;  %v4517_v36 = vld [vmem:[#allocation18_spill] sm:$0xff]  ;;  %v2326_v62 = vld [vmem:[#allocation5 + $0x70] sm:$0xff] }
 0x1b6   :  { %v1951_v7 = vadd.f32 %v1919_v48, %v1841_v55  ;;  %v1920_v12 = vmul.f32 %v3181_v47, %v4516_v22  ;;  %v4354_v44 = vperm.slane %v3538_v58, 0  ;;  %v2140_v23 = vmul.f32 %v4491_v27, %v2088_v52 }
 0x1b7   :  { %v1402_v40 = vadd.f32 %v1370_v57, %v1276_v54  ;;  %v837_v30 = vadd.f32 %v805_v59, %v727_v18  ;;  %v1025_v4 = vmul.f32 %v4517_v36, %v973_v13  ;;  %v4356_v6 = vperm.slane %v3538_v58, 1 }
 0x1b8   :  { %v2061_v3 = vadd.f32 %v2029_v42, %v1951_v7  ;;  %v3558_v55 = vmul.f32 %v2326_v62, %v4508_v5  ;;  %v3561_v48 = vmul.f32 %v2327_v25, %v4511_v61  ;;  %v1135_v57 = vmul.f32 %v2678_v26, %v1083_v19  ;;  %v4518_v42 = vld [vmem:[#allocation20_spill] sm:$0xff] }
 0x1b9   :  { %v1512_v37 = vadd.f32 %v1480_v17, %v1402_v40  ;;  %v947_v22 = vadd.f32 %v915_v21, %v837_v30  ;;  %v1245_v18 = vmul.f32 %v4479_v38, %v4355_v28  ;;  %v1371_v59 = vmul.f32 %v4518_v42, %v4354_v44 }
 0x1ba   :  { %v2171_v52 = vadd.f32 %v2139_v46, %v2061_v3  ;;  %v476_v17 = vmul.f32 %v2906_v39, %v400_v1  ;;  %v586_v30 = vmul.f32 %v4489_v45, %v533_v63  ;;  %v1759_v21 = vperm.slane %v3538_v58, 4 }
 0x1bb   :  { %v1622_v62 = vadd.f32 %v1590_v14, %v1512_v37  ;;  %v1057_v25 = vadd.f32 %v1025_v4, %v947_v22  ;;  %v1869_v40 = vperm.slane %v3538_v58, 5  ;;  %v1979_v46 = vperm.slane %v3538_v58, 6  ;;  %v2328_v22 = vld [vmem:[#allocation5 + $0x80] sm:$0xff] }
 0x1bc   :  { %2203 = vst [vmem:[#allocation7 + $0x50] sm:$0xff] %v2171_v52  ;;  %v696_v3 = vmul.f32 %v4480_v2, %v643_v0  ;;  %v618_v54 = vadd.f32 %v586_v30, %v476_v17  ;;  %v806_v7 = vmul.f32 %v2966_v35, %v753_v16  ;;  %v1481_v1 = vmul.f32 %v4464_v32, %v4356_v6 }
 0x1bd   :  { %v1732_v44 = vadd.f32 %v1700_v10, %v1622_v62  ;;  %v1167_v28 = vadd.f32 %v1135_v57, %v1057_v25  ;;  %v4519_v63 = vperm.slane %v3538_v58, 2  ;;  %v4520_v4 = vperm.slane %v3538_v58, 3  ;;  %v4523_v25 = vld [vmem:[#allocation24_spill] sm:$0xff] }
 0x1be   :  { %v3589_v0 = vmul.f32 %v2328_v22, %v4508_v5  ;;  %v728_v52 = vadd.f32 %v696_v3, %v618_v54  ;;  %v4522_v16 = vperm.slane %v3523_v51, 4  ;;  %v1811_v17 = vmul.f32 %v4523_v25, %v1759_v21 }
 0x1bf   :  { %v1591_v14 = vmul.f32 %v4492_v60, %v4519_v63  ;;  %v1701_v37 = vmul.f32 %v2785_v20, %v4520_v4  ;;  %v1842_v10 = vadd.f32 %v1810_v8, %v1732_v44  ;;  %v1277_v57 = vadd.f32 %v1245_v18, %v1167_v28 }
 0x1c0   :  { %4521 = vst [vmem:[#allocation30_spill] sm:$0xff] %v3589_v0  ;;  %v916_v62 = vmul.f32 %v2985_v11, %v4522_v16  ;;  %v1921_v30 = vmul.f32 %v4494_v41, %v1869_v40  ;;  %v2031_v63 = vmul.f32 %v4499_v9, %v1979_v46  ;;  %v838_v20 = vadd.f32 %v806_v7, %v728_v52  ;;  %v4525_v9 = vld [vmem:[#allocation31_spill] sm:$0xff] }
 0x1c1   :  { %v1952_v4 = vadd.f32 %v1920_v12, %v1842_v10  ;;  %v1403_v61 = vadd.f32 %v1371_v59, %v1277_v57  ;;  %v1026_v22 = vmul.f32 %v4470_v33, %v973_v13  ;;  %v401_v8 = vperm.slane %v3558_v55, 0 }
 0x1c2   :  { %v534_v28 = vperm.slane %v3558_v55, 1  ;;  %v644_v44 = vperm.slane %v3558_v55, 2  ;;  %v754_v18 = vperm.slane %v3558_v55, 3  ;;  %v948_v16 = vadd.f32 %v916_v62, %v838_v20  ;;  %v4527_v20 = vld [vmem:[#allocation27_spill] sm:$0xff] }
 0x1c3   :  { %v2062_v54 = vadd.f32 %v2030_v50, %v1952_v4  ;;  %v1513_v3 = vadd.f32 %v1481_v1, %v1403_v61  ;;  %v1136_v5 = vmul.f32 %v3041_v31, %v1083_v19  ;;  %v477_v6 = vmul.f32 %v4510_v43, %v401_v8 }
 0x1c4   :  { %v587_v12 = vmul.f32 %v4496_v53, %v534_v28  ;;  %v697_v59 = vmul.f32 %v4497_v29, %v644_v44  ;;  %v864_v13 = vperm.slane %v3558_v55, 4  ;;  %v1058_v57 = vadd.f32 %v1026_v22, %v948_v16 }
 0x1c5   :  { %v2172_v7 = vadd.f32 %v2140_v23, %v2062_v54  ;;  %v1623_v10 = vadd.f32 %v1591_v14, %v1513_v3  ;;  %v4524_v52 = vperm.slane %v3523_v51, 7  ;;  %v4526_v61 = vperm.slane %v3538_v58, 7  ;;  %v4529_v14 = vld [vmem:[#allocation32_spill] sm:$0xff] }
 0x1c6   :  { %v619_v19 = vadd.f32 %v587_v12, %v477_v6  ;;  %v807_v1 = vmul.f32 %v4512_v15, %v754_v18  ;;  %v974_v62 = vperm.slane %v3558_v55, 5  ;;  %v1168_v29 = vadd.f32 %v1136_v5, %v1058_v57  ;;  %v4532_v5 = vld [vmem:[#allocation34_spill] sm:$0xff] }
 0x1c7   :  { %v1246_v0 = vmul.f32 %v4525_v9, %v4524_v52  ;;  %v2141_v50 = vmul.f32 %v4527_v20, %v4526_v61  ;;  %2204 = vst [vmem:[#allocation7 + $0x58] sm:$0xff] %v2172_v7  ;;  %v1733_v4 = vadd.f32 %v1701_v37, %v1623_v10  ;;  %v4528_v23 = vperm.slane %v3538_v58, 0 }
 0x1c8   :  { %v4530_v51 = vperm.slane %v3538_v58, 1  ;;  %v729_v3 = vadd.f32 %v697_v59, %v619_v19  ;;  %v917_v16 = vmul.f32 %v4515_v34, %v864_v13  ;;  %v1084_v6 = vperm.slane %v3558_v55, 6 }
 0x1c9   :  { %v1372_v22 = vmul.f32 %v4529_v14, %v4528_v23  ;;  %v1194_v12 = vperm.slane %v3558_v55, 7  ;;  %v1843_v52 = vadd.f32 %v1811_v17, %v1733_v4  ;;  %v1278_v61 = vadd.f32 %v1246_v0, %v1168_v29  ;;  %v4534_v23 = vld [vmem:[#allocation36_spill] sm:$0xff] }
 0x1ca   :  { %v1482_v54 = vmul.f32 %v3102_v49, %v4530_v51  ;;  %v4531_v37 = vperm.slane %v3538_v58, 2  ;;  %v4533_v10 = vperm.slane %v3538_v58, 3  ;;  %v1812_v20 = vmul.f32 %v4534_v23, %v1759_v21 }
 0x1cb   :  { %v1922_v59 = vmul.f32 %v3181_v47, %v1869_v40  ;;  %v839_v19 = vadd.f32 %v807_v1, %v729_v3  ;;  %v1027_v51 = vmul.f32 %v4517_v36, %v974_v62  ;;  %v1953_v34 = vadd.f32 %v1921_v30, %v1843_v52 }
 0x1cc   :  { %v1592_v7 = vmul.f32 %v4532_v5, %v4531_v37  ;;  %v1702_v57 = vmul.f32 %v4513_v56, %v4533_v10  ;;  %v1404_v49 = vadd.f32 %v1372_v22, %v1278_v61  ;;  %v2032_v55 = vmul.f32 %v3201_v24, %v1979_v46 }
 0x1cd   :  { %v1304_v29 = vperm.slane %v3561_v48, 0  ;;  %v949_v0 = vadd.f32 %v917_v16, %v839_v19  ;;  %v1137_v17 = vmul.f32 %v2678_v26, %v1084_v6  ;;  %v1247_v4 = vmul.f32 %v4479_v38, %v1194_v12 }
 0x1ce   :  { %v1430_v37 = vperm.slane %v3561_v48, 1  ;;  %v2063_v10 = vadd.f32 %v2031_v63, %v1953_v34  ;;  %v1514_v21 = vadd.f32 %v1482_v54, %v1404_v49  ;;  %v4371_v40 = vperm.slane %v3561_v48, 2 }
 0x1cf   :  { %v4370_v1 = vperm.slane %v3561_v48, 3  ;;  %v1059_v3 = vadd.f32 %v1027_v51, %v949_v0  ;;  %v4369_v30 = vperm.slane %v3561_v48, 4  ;;  %v478_v46 = vmul.f32 %v2906_v39, %v401_v8 }
 0x1d0   :  { %v588_v22 = vmul.f32 %v4489_v45, %v534_v28  ;;  %v2173_v16 = vadd.f32 %v2141_v50, %v2063_v10  ;;  %v1624_v52 = vadd.f32 %v1592_v7, %v1514_v21  ;;  %v4368_v61 = vperm.slane %v3561_v48, 5 }
 0x1d1   :  { %v698_v19 = vmul.f32 %v4480_v2, %v644_v44  ;;  %v1169_v38 = vadd.f32 %v1137_v17, %v1059_v3  ;;  %v1373_v49 = vmul.f32 %v4518_v42, %v1304_v29  ;;  %v808_v63 = vmul.f32 %v2966_v35, %v754_v18  ;;  %v4536_v18 = vld [vmem:[#allocation23_spill] sm:$0xff] }
 0x1d2   :  { %v620_v34 = vadd.f32 %v588_v22, %v478_v46  ;;  %2205 = vst [vmem:[#allocation7 + $0x60] sm:$0xff] %v2173_v16  ;;  %v1734_v54 = vadd.f32 %v1702_v57, %v1624_v52  ;;  %v4535_v51 = vperm.slane %v3538_v58, 7  ;;  %v1483_v28 = vmul.f32 %v4464_v32, %v1430_v37  ;;  %v4537_v16 = vld [vmem:[#allocation30_spill] sm:$0xff] }
 0x1d3   :  { %v1980_v50 = vperm.slane %v3561_v48, 6  ;;  %v1279_v7 = vadd.f32 %v1247_v4, %v1169_v38  ;;  %v1593_v44 = vmul.f32 %v4492_v60, %v4371_v40  ;;  %v918_v17 = vmul.f32 %v2985_v11, %v864_v13 }
 0x1d4   :  { %v2142_v8 = vmul.f32 %v4491_v27, %v4535_v51  ;;  %v730_v0 = vadd.f32 %v698_v19, %v620_v34  ;;  %v1844_v10 = vadd.f32 %v1812_v20, %v1734_v54  ;;  %v1703_v57 = vmul.f32 %v4536_v18, %v4370_v1 }
 0x1d5   :  { %v1813_v58 = vmul.f32 %v4523_v25, %v4369_v30  ;;  %v1923_v38 = vmul.f32 %v4494_v41, %v4368_v61  ;;  %v1405_v4 = vadd.f32 %v1373_v49, %v1279_v7  ;;  %v4373_v21 = vperm.slane %v3561_v48, 7 }
 0x1d6   :  { %v840_v3 = vadd.f32 %v808_v63, %v730_v0  ;;  %v1028_v46 = vmul.f32 %v4470_v33, %v974_v62  ;;  %v1954_v13 = vadd.f32 %v1922_v59, %v1844_v10  ;;  %v1138_v20 = vmul.f32 %v3041_v31, %v1084_v6 }
 0x1d7   :  { %v1248_v22 = vmul.f32 %v4525_v9, %v1194_v12  ;;  %v402_v52 = vperm.slane %v4537_v16, 0  ;;  %v1515_v19 = vadd.f32 %v1483_v28, %v1405_v4  ;;  %v535_v54 = vperm.slane %v4537_v16, 1  ;;  %v4538_v12 = vld [vmem:[#allocation15_spill] sm:$0xff]  ;;  %v4539_v4 = vld [vmem:[#allocation14_spill] sm:$0xff] }
 0x1d8   :  { %v950_v34 = vadd.f32 %v918_v17, %v840_v3  ;;  %v645_v51 = vperm.slane %v4537_v16, 2  ;;  %v2064_v61 = vadd.f32 %v2032_v55, %v1954_v13  ;;  %v755_v63 = vperm.slane %v4537_v16, 3  ;;  %v2329_v17 = vld [vmem:[#allocation5 + $0x88] sm:$0xff] }
 0x1d9   :  { %v479_v49 = vmul.f32 %v4510_v43, %v402_v52  ;;  %v4374_v62 = vperm.slane %v4537_v16, 4  ;;  %v1625_v59 = vadd.f32 %v1593_v44, %v1515_v19  ;;  %v589_v6 = vmul.f32 %v4496_v53, %v535_v54  ;;  %v4540_v44 = vld [vmem:[#allocation26_spill] sm:$0xff]  ;;  %v4541_v19 = vld [vmem:[#allocation27_spill] sm:$0xff] }
 0x1da   :  { %v1060_v7 = vadd.f32 %v1028_v46, %v950_v34  ;;  %v699_v0 = vmul.f32 %v4538_v12, %v645_v51  ;;  %v2174_v10 = vadd.f32 %v2142_v8, %v2064_v61  ;;  %v1374_v28 = vmul.f32 %v4529_v14, %v1304_v29  ;;  %v4542_v8 = vld [vmem:[#allocation33_spill] sm:$0xff] }
 0x1db   :  { %v3680_v3 = vmul.f32 %v2329_v17, %v4539_v4  ;;  %v809_v55 = vmul.f32 %v4512_v15, %v755_v63  ;;  %v1735_v13 = vadd.f32 %v1703_v57, %v1625_v59  ;;  %v621_v1 = vadd.f32 %v589_v6, %v479_v49  ;;  %v4543_v34 = vld [vmem:[#allocation17_spill] sm:$0xff] }
 0x1dc   :  { %v1170_v30 = vadd.f32 %v1138_v20, %v1060_v7  ;;  %v975_v40 = vperm.slane %v4537_v16, 5  ;;  %2206 = vst [vmem:[#allocation7 + $0x68] sm:$0xff] %v2174_v10  ;;  %v2033_v46 = vmul.f32 %v4540_v44, %v1980_v50  ;;  %v2143_v61 = vmul.f32 %v4541_v19, %v4373_v21 }
 0x1dd   :  { %v1484_v29 = vmul.f32 %v4542_v8, %v1430_v37  ;;  %v919_v17 = vmul.f32 %v4543_v34, %v4374_v62  ;;  %v1845_v4 = vadd.f32 %v1813_v58, %v1735_v13  ;;  %v731_v57 = vadd.f32 %v699_v0, %v621_v1 }
 0x1de   :  { %v1280_v15 = vadd.f32 %v1248_v22, %v1170_v30  ;;  %v1085_v20 = vperm.slane %v4537_v16, 6  ;;  %v4544_v49 = vperm.slane %v3561_v48, 2  ;;  %v4545_v7 = vperm.slane %v3561_v48, 3 }
 0x1df   :  { %v1195_v10 = vperm.slane %v4537_v16, 7  ;;  %v1305_v37 = vperm.slane %v3680_v3, 0  ;;  %v1955_v21 = vadd.f32 %v1923_v38, %v1845_v4  ;;  %v841_v62 = vadd.f32 %v809_v55, %v731_v57  ;;  %v4548_v38 = vld [vmem:[#allocation19_spill] sm:$0xff] }
 0x1e0   :  { %v1594_v59 = vmul.f32 %v4532_v5, %v4544_v49  ;;  %v1704_v6 = vmul.f32 %v4513_v56, %v4545_v7  ;;  %v1406_v8 = vadd.f32 %v1374_v28, %v1280_v15  ;;  %v1029_v30 = vmul.f32 %v4517_v36, %v975_v40 }
 0x1e1   :  { %v4546_v1 = vperm.slane %v3561_v48, 4  ;;  %v4547_v22 = vperm.slane %v3561_v48, 5  ;;  %v2034_v13 = vmul.f32 %v3201_v24, %v1980_v50  ;;  %v1431_v49 = vperm.slane %v3680_v3, 1 }
 0x1e2   :  { %v2065_v7 = vadd.f32 %v2033_v46, %v1955_v21  ;;  %v1516_v34 = vadd.f32 %v1484_v29, %v1406_v8  ;;  %v951_v56 = vadd.f32 %v919_v17, %v841_v62  ;;  %v1139_v15 = vmul.f32 %v2678_v26, %v1085_v20 }
 0x1e3   :  { %v1814_v58 = vmul.f32 %v4534_v23, %v4546_v1  ;;  %v1924_v0 = vmul.f32 %v3181_v47, %v4547_v22  ;;  %v1249_v28 = vmul.f32 %v4548_v38, %v1195_v10  ;;  %v1375_v4 = vmul.f32 %v4518_v42, %v1305_v37 }
 0x1e4   :  { %v1541_v55 = vperm.slane %v3680_v3, 2  ;;  %v1651_v57 = vperm.slane %v3680_v3, 3  ;;  %v2175_v1 = vadd.f32 %v2143_v61, %v2065_v7  ;;  %v1626_v36 = vadd.f32 %v1594_v59, %v1516_v34 }
 0x1e5   :  { %v1061_v22 = vadd.f32 %v1029_v30, %v951_v56  ;;  %v480_v50 = vmul.f32 %v2906_v39, %v402_v52  ;;  %v1761_v24 = vperm.slane %v3680_v3, 4  ;;  %v4381_v21 = vperm.slane %v3680_v3, 5 }
 0x1e6   :  { %v590_v62 = vmul.f32 %v4489_v45, %v535_v54  ;;  %v700_v46 = vmul.f32 %v4480_v2, %v645_v51  ;;  %2207 = vst [vmem:[#allocation7 + $0x70] sm:$0xff] %v2175_v1  ;;  %v1736_v8 = vadd.f32 %v1704_v6, %v1626_v36  ;;  %v1981_v17 = vperm.slane %v3680_v3, 6 }
 0x1e7   :  { %v1171_v29 = vadd.f32 %v1139_v15, %v1061_v22  ;;  %v2091_v42 = vperm.slane %v3680_v3, 7  ;;  %v4549_v61 = vperm.slane %v3561_v48, 7  ;;  %v1485_v52 = vmul.f32 %v4464_v32, %v1431_v49 }
 0x1e8   :  { %v622_v34 = vadd.f32 %v590_v62, %v480_v50  ;;  %v810_v59 = vmul.f32 %v2966_v35, %v755_v63  ;;  %v1846_v30 = vadd.f32 %v1814_v58, %v1736_v8  ;;  %v1595_v51 = vmul.f32 %v4492_v60, %v1541_v55 }
 0x1e9   :  { %v2144_v56 = vmul.f32 %v4491_v27, %v4549_v61  ;;  %v1281_v54 = vadd.f32 %v1249_v28, %v1171_v29  ;;  %v1705_v36 = vmul.f32 %v4536_v18, %v1651_v57  ;;  %v1815_v6 = vmul.f32 %v4523_v25, %v1761_v24  ;;  %v2330_v29 = vld [vmem:[#allocation5 + $0x90] sm:$0xff] }
 0x1ea   :  { %v1925_v7 = vmul.f32 %v4494_v41, %v4381_v21  ;;  %v732_v48 = vadd.f32 %v700_v46, %v622_v34  ;;  %v4550_v15 = vperm.slane %v4537_v16, 4  ;;  %v1956_v22 = vadd.f32 %v1924_v0, %v1846_v30  ;;  %v4551_v61 = vld [vmem:[#allocation13_spill] sm:$0xff]  ;;  %v4554_v21 = vld [vmem:[#allocation16_spill] sm:$0xff] }
 0x1eb   :  { %v1407_v50 = vadd.f32 %v1375_v4, %v1281_v54  ;;  %v2035_v63 = vmul.f32 %v4540_v44, %v1981_v17  ;;  %v2145_v58 = vmul.f32 %v4541_v19, %v2091_v42  ;;  %v1030_v62 = vmul.f32 %v4470_v33, %v975_v40 }
 0x1ec   :  { %v920_v1 = vmul.f32 %v2985_v11, %v4550_v15  ;;  %v842_v28 = vadd.f32 %v810_v59, %v732_v48  ;;  %v1140_v8 = vmul.f32 %v3041_v31, %v1085_v20  ;;  %v3741_v25 = vmul.f32 %v2330_v29, %v4551_v61 }
 0x1ed   :  { %v2066_v46 = vadd.f32 %v2034_v13, %v1956_v22  ;;  %v1517_v34 = vadd.f32 %v1485_v52, %v1407_v50  ;;  %v1250_v16 = vmul.f32 %v4525_v9, %v1195_v10  ;;  %v1376_v0 = vmul.f32 %v4529_v14, %v1305_v37  ;;  %v4555_v14 = vld [vmem:[#allocation35_spill] sm:$0xff] }
 0x1ee   :  { %v952_v4 = vadd.f32 %v920_v1, %v842_v28  ;;  %v403_v30 = vperm.slane %v3741_v25, 0  ;;  %v536_v54 = vperm.slane %v3741_v25, 1  ;;  %v646_v59 = vperm.slane %v3741_v25, 2  ;;  %v4552_v1 = vld [vmem:[#allocation33_spill] sm:$0xff]  ;;  %v2331_v28 = vld [vmem:[#allocation5 + $0x98] sm:$0xff] }
 0x1ef   :  { %v2176_v40 = vadd.f32 %v2144_v56, %v2066_v46  ;;  %v1627_v48 = vadd.f32 %v1595_v51, %v1517_v34  ;;  %v756_v20 = vperm.slane %v3741_v25, 3  ;;  %v1486_v22 = vmul.f32 %v4552_v1, %v1431_v49  ;;  %v4553_v56 = vld [vmem:[#allocation14_spill] sm:$0xff]  ;;  %v4557_v49 = vld [vmem:[#allocation17_spill] sm:$0xff] }
 0x1f0   :  { %v1062_v29 = vadd.f32 %v1030_v62, %v952_v4  ;;  %v481_v13 = vmul.f32 %v4510_v43, %v403_v30  ;;  %v591_v10 = vmul.f32 %v4496_v53, %v536_v54  ;;  %v701_v37 = vmul.f32 %v4538_v12, %v646_v59 }
 0x1f1   :  { %2208 = vst [vmem:[#allocation7 + $0x78] sm:$0xff] %v2176_v40  ;;  %v1737_v52 = vadd.f32 %v1705_v36, %v1627_v48  ;;  %v1596_v50 = vmul.f32 %v4532_v5, %v1541_v55  ;;  %v3756_v51 = vmul.f32 %v2331_v28, %v4553_v56  ;;  %v811_v62 = vmul.f32 %v4554_v21, %v756_v20 }
 0x1f2   :  { %v1172_v46 = vadd.f32 %v1140_v8, %v1062_v29  ;;  %v623_v34 = vadd.f32 %v591_v10, %v481_v13  ;;  %v976_v4 = vperm.slane %v3741_v25, 5  ;;  %v1706_v19 = vmul.f32 %v4555_v14, %v1651_v57 }
 0x1f3   :  { %v1847_v15 = vadd.f32 %v1815_v6, %v1737_v52  ;;  %v1816_v40 = vmul.f32 %v4534_v23, %v1761_v24  ;;  %v4556_v36 = vperm.slane %v3741_v25, 4  ;;  %v1086_v28 = vperm.slane %v3741_v25, 6  ;;  %v4559_v6 = vld [vmem:[#allocation38_spill] sm:$0xff] }
 0x1f4   :  { %v1282_v55 = vadd.f32 %v1250_v16, %v1172_v46  ;;  %v733_v5 = vadd.f32 %v701_v37, %v623_v34  ;;  %v4387_v8 = vperm.slane %v3741_v25, 7  ;;  %v4558_v13 = vperm.slane %v3680_v3, 5  ;;  %v2332_v34 = vld [vmem:[#allocation5 + $0xa0] sm:$0xff]  ;;  %v2333_v3 = vld [vmem:[#allocation5 + $0xa8] sm:$0xff] }
 0x1f5   :  { %v921_v48 = vmul.f32 %v4557_v49, %v4556_v36  ;;  %v1957_v29 = vadd.f32 %v1925_v7, %v1847_v15  ;;  %v2036_v52 = vmul.f32 %v4559_v6, %v1981_v17  ;;  %v4386_v57 = vperm.slane %v3756_v51, 0  ;;  %v4560_v36 = vld [vmem:[#allocation18_spill] sm:$0xff] }
 0x1f6   :  { %v1926_v10 = vmul.f32 %v3181_v47, %v4558_v13  ;;  %v1408_v24 = vadd.f32 %v1376_v0, %v1282_v55  ;;  %v2146_v23 = vmul.f32 %v4491_v27, %v2091_v42  ;;  %v843_v14 = vadd.f32 %v811_v62, %v733_v5 }
 0x1f7   :  { %v1031_v16 = vmul.f32 %v4560_v36, %v976_v4  ;;  %v2067_v37 = vadd.f32 %v2035_v63, %v1957_v29  ;;  %v4388_v46 = vperm.slane %v3756_v51, 1  ;;  %v3776_v7 = vmul.f32 %v2332_v34, %v4551_v61  ;;  %v4561_v63 = vld [vmem:[#allocation20_spill] sm:$0xff] }
 0x1f8   :  { %v3779_v15 = vmul.f32 %v2333_v3, %v4553_v56  ;;  %v1518_v17 = vadd.f32 %v1486_v22, %v1408_v24  ;;  %v953_v13 = vadd.f32 %v921_v48, %v843_v14  ;;  %v1141_v0 = vmul.f32 %v2678_v26, %v1086_v28 }
 0x1f9   :  { %v1251_v42 = vmul.f32 %v4548_v38, %v4387_v8  ;;  %v2177_v5 = vadd.f32 %v2145_v58, %v2067_v37  ;;  %v1377_v62 = vmul.f32 %v4561_v63, %v4386_v57  ;;  %v482_v22 = vmul.f32 %v2906_v39, %v403_v30 }
 0x1fa   :  { %v1628_v34 = vadd.f32 %v1596_v50, %v1518_v17  ;;  %v1063_v3 = vadd.f32 %v1031_v16, %v953_v13  ;;  %v592_v14 = vmul.f32 %v4489_v45, %v536_v54  ;;  %v1762_v48 = vperm.slane %v3756_v51, 4  ;;  %v2334_v13 = vld [vmem:[#allocation5 + $0xb0] sm:$0xff] }
 0x1fb   :  { %2209 = vst [vmem:[#allocation7 + $0x80] sm:$0xff] %v2177_v5  ;;  %v1872_v24 = vperm.slane %v3756_v51, 5  ;;  %v1982_v58 = vperm.slane %v3756_v51, 6  ;;  %v702_v37 = vmul.f32 %v4480_v2, %v646_v59  ;;  %v812_v29 = vmul.f32 %v2966_v35, %v756_v20 }
 0x1fc   :  { %v1738_v57 = vadd.f32 %v1706_v19, %v1628_v34  ;;  %v1173_v8 = vadd.f32 %v1141_v0, %v1063_v3  ;;  %v624_v55 = vadd.f32 %v592_v14, %v482_v22  ;;  %v1487_v30 = vmul.f32 %v4464_v32, %v4388_v46  ;;  %v4565_v3 = vld [vmem:[#allocation24_spill] sm:$0xff] }
 0x1fd   :  { %v4562_v54 = vperm.slane %v3756_v51, 2  ;;  %v4563_v16 = vperm.slane %v3756_v51, 3  ;;  %v3807_v59 = vmul.f32 %v2334_v13, %v4551_v61  ;;  %v4564_v20 = vperm.slane %v3741_v25, 4 }
 0x1fe   :  { %v1848_v19 = vadd.f32 %v1816_v40, %v1738_v57  ;;  %v1283_v0 = vadd.f32 %v1251_v42, %v1173_v8  ;;  %v734_v5 = vadd.f32 %v702_v37, %v624_v55  ;;  %v1817_v22 = vmul.f32 %v4565_v3, %v1762_v48 }
 0x1ff   :  { %v1597_v50 = vmul.f32 %v4492_v60, %v4562_v54  ;;  %v1707_v17 = vmul.f32 %v4536_v18, %v4563_v16  ;;  %v922_v34 = vmul.f32 %v2985_v11, %v4564_v20  ;;  %v1927_v14 = vmul.f32 %v4494_v41, %v1872_v24 }
 0x200   :  { %v2037_v54 = vmul.f32 %v4540_v44, %v1982_v58  ;;  %v1958_v16 = vadd.f32 %v1926_v10, %v1848_v19  ;;  %v1409_v56 = vadd.f32 %v1377_v62, %v1283_v0  ;;  %v844_v18 = vadd.f32 %v812_v29, %v734_v5 }
 0x201   :  { %v1032_v13 = vmul.f32 %v4470_v33, %v976_v4  ;;  %v404_v40 = vperm.slane %v3776_v7, 0  ;;  %v537_v8 = vperm.slane %v3776_v7, 1  ;;  %v647_v57 = vperm.slane %v3776_v7, 2 }
 0x202   :  { %v757_v42 = vperm.slane %v3776_v7, 3  ;;  %v2068_v55 = vadd.f32 %v2036_v52, %v1958_v16  ;;  %v1519_v37 = vadd.f32 %v1487_v30, %v1409_v56  ;;  %v954_v20 = vadd.f32 %v922_v34, %v844_v18  ;;  %v4568_v18 = vld [vmem:[#allocation27_spill] sm:$0xff] }
 0x203   :  { %v1142_v61 = vmul.f32 %v3041_v31, %v1086_v28  ;;  %v483_v46 = vmul.f32 %v4510_v43, %v404_v40  ;;  %v593_v10 = vmul.f32 %v4496_v53, %v537_v8  ;;  %v703_v62 = vmul.f32 %v4538_v12, %v647_v57 }
 0x204   :  { %v867_v4 = vperm.slane %v3776_v7, 4  ;;  %v2178_v29 = vadd.f32 %v2146_v23, %v2068_v55  ;;  %v1629_v19 = vadd.f32 %v1597_v50, %v1519_v37  ;;  %v1064_v0 = vadd.f32 %v1032_v13, %v954_v20  ;;  %v4570_v50 = vld [vmem:[#allocation32_spill] sm:$0xff] }
 0x205   :  { %v4566_v5 = vperm.slane %v3741_v25, 7  ;;  %v4567_v56 = vperm.slane %v3756_v51, 7  ;;  %v625_v28 = vadd.f32 %v593_v10, %v483_v46  ;;  %v813_v30 = vmul.f32 %v4554_v21, %v757_v42 }
 0x206   :  { %v977_v34 = vperm.slane %v3776_v7, 5  ;;  %2210 = vst [vmem:[#allocation7 + $0x88] sm:$0xff] %v2178_v29  ;;  %v1739_v16 = vadd.f32 %v1707_v17, %v1629_v19  ;;  %v1174_v12 = vadd.f32 %v1142_v61, %v1064_v0  ;;  %v4569_v23 = vperm.slane %v3756_v51, 0  ;;  %v4573_v61 = vld [vmem:[#allocation34_spill] sm:$0xff]  ;;  %v4575_v0 = vld [vmem:[#allocation35_spill] sm:$0xff] }
 0x207   :  { %v1252_v44 = vmul.f32 %v4525_v9, %v4566_v5  ;;  %v2147_v52 = vmul.f32 %v4568_v18, %v4567_v56  ;;  %v4571_v25 = vperm.slane %v3756_v51, 1  ;;  %v735_v37 = vadd.f32 %v703_v62, %v625_v28  ;;  %v4576_v18 = vld [vmem:[#allocation36_spill] sm:$0xff] }
 0x208   :  { %v1378_v13 = vmul.f32 %v4570_v50, %v4569_v23  ;;  %v923_v20 = vmul.f32 %v4557_v49, %v867_v4  ;;  %v1087_v46 = vperm.slane %v3776_v7, 6  ;;  %v1197_v10 = vperm.slane %v3776_v7, 7 }
 0x209   :  { %v1488_v55 = vmul.f32 %v4552_v1, %v4571_v25  ;;  %v1849_v5 = vadd.f32 %v1817_v22, %v1739_v16  ;;  %v1284_v56 = vadd.f32 %v1252_v44, %v1174_v12  ;;  %v4572_v17 = vperm.slane %v3756_v51, 2 }
 0x20a   :  { %v4574_v19 = vperm.slane %v3756_v51, 3  ;;  %v1818_v21 = vmul.f32 %v4576_v18, %v1762_v48  ;;  %v1928_v62 = vmul.f32 %v3181_v47, %v1872_v24  ;;  %v845_v28 = vadd.f32 %v813_v30, %v735_v37 }
 0x20b   :  { %v1598_v29 = vmul.f32 %v4573_v61, %v4572_v17  ;;  %v1033_v25 = vmul.f32 %v4560_v36, %v977_v34  ;;  %v1959_v49 = vadd.f32 %v1927_v14, %v1849_v5  ;;  %v1410_v1 = vadd.f32 %v1378_v13, %v1284_v56 }
 0x20c   :  { %v1708_v23 = vmul.f32 %v4575_v0, %v4574_v19  ;;  %v2038_v7 = vmul.f32 %v4559_v6, %v1982_v58  ;;  %v1307_v12 = vperm.slane %v3779_v15, 0  ;;  %v955_v44 = vadd.f32 %v923_v20, %v845_v28 }
 0x20d   :  { %v1143_v22 = vmul.f32 %v2678_v26, %v1087_v46  ;;  %v1253_v16 = vmul.f32 %v4548_v38, %v1197_v10  ;;  %v1433_v17 = vperm.slane %v3779_v15, 1  ;;  %v2069_v19 = vadd.f32 %v2037_v54, %v1959_v49 }
 0x20e   :  { %v1520_v48 = vadd.f32 %v1488_v55, %v1410_v1  ;;  %v4401_v24 = vperm.slane %v3779_v15, 2  ;;  %v4400_v30 = vperm.slane %v3779_v15, 3  ;;  %v1065_v37 = vadd.f32 %v1033_v25, %v955_v44 }
 0x20f   :  { %v4399_v14 = vperm.slane %v3779_v15, 4  ;;  %v484_v58 = vmul.f32 %v2906_v39, %v404_v40  ;;  %v594_v13 = vmul.f32 %v4489_v45, %v537_v8  ;;  %v2179_v20 = vadd.f32 %v2147_v52, %v2069_v19 }
 0x210   :  { %v1630_v5 = vadd.f32 %v1598_v29, %v1520_v48  ;;  %v4398_v56 = vperm.slane %v3779_v15, 5  ;;  %v704_v28 = vmul.f32 %v4480_v2, %v647_v57  ;;  %v1175_v38 = vadd.f32 %v1143_v22, %v1065_v37 }
 0x211   :  { %v1379_v1 = vmul.f32 %v4561_v63, %v1307_v12  ;;  %v626_v49 = vadd.f32 %v594_v13, %v484_v58  ;;  %v814_v54 = vmul.f32 %v2966_v35, %v757_v42  ;;  %2211 = vst [vmem:[#allocation7 + $0x90] sm:$0xff] %v2179_v20  ;;  %v4577_v25 = vperm.slane %v3756_v51, 7  ;;  %v4578_v42 = vld [vmem:[#allocation23_spill] sm:$0xff] }
 0x212   :  { %v1740_v55 = vadd.f32 %v1708_v23, %v1630_v5  ;;  %v1489_v8 = vmul.f32 %v4464_v32, %v1433_v17  ;;  %v1983_v52 = vperm.slane %v3779_v15, 6  ;;  %v1285_v29 = vadd.f32 %v1253_v16, %v1175_v38 }
 0x213   :  { %v2148_v40 = vmul.f32 %v4491_v27, %v4577_v25  ;;  %v1599_v57 = vmul.f32 %v4492_v60, %v4401_v24  ;;  %v736_v44 = vadd.f32 %v704_v28, %v626_v49  ;;  %v924_v22 = vmul.f32 %v2985_v11, %v867_v4 }
 0x214   :  { %v1850_v19 = vadd.f32 %v1818_v21, %v1740_v55  ;;  %v1709_v23 = vmul.f32 %v4578_v42, %v4400_v30  ;;  %v1819_v51 = vmul.f32 %v4565_v3, %v4399_v14  ;;  %v1929_v38 = vmul.f32 %v4494_v41, %v4398_v56 }
 0x215   :  { %v1411_v16 = vadd.f32 %v1379_v1, %v1285_v29  ;;  %v846_v37 = vadd.f32 %v814_v54, %v736_v44  ;;  %v1034_v58 = vmul.f32 %v4470_v33, %v977_v34  ;;  %v1144_v21 = vmul.f32 %v3041_v31, %v1087_v46 }
 0x216   :  { %v1960_v4 = vadd.f32 %v1928_v62, %v1850_v19  ;;  %v1254_v13 = vmul.f32 %v4525_v9, %v1197_v10  ;;  %v405_v20 = vperm.slane %v3807_v59, 0  ;;  %v538_v49 = vperm.slane %v3807_v59, 1  ;;  %v4579_v10 = vld [vmem:[#allocation15_spill] sm:$0xff] }
 0x217   :  { %v1521_v5 = vadd.f32 %v1489_v8, %v1411_v16  ;;  %v956_v28 = vadd.f32 %v924_v22, %v846_v37  ;;  %v648_v55 = vperm.slane %v3807_v59, 2  ;;  %v758_v54 = vperm.slane %v3807_v59, 3  ;;  %v2335_v22 = vld [vmem:[#allocation5 + $0xb8] sm:$0xff] }
 0x218   :  { %v2070_v25 = vadd.f32 %v2038_v7, %v1960_v4  ;;  %v485_v1 = vmul.f32 %v4510_v43, %v405_v20  ;;  %v4402_v34 = vperm.slane %v3807_v59, 4  ;;  %v595_v46 = vmul.f32 %v4496_v53, %v538_v49  ;;  %v4580_v16 = vld [vmem:[#allocation14_spill] sm:$0xff]  ;;  %v4581_v7 = vld [vmem:[#allocation16_spill] sm:$0xff] }
 0x219   :  { %v1631_v62 = vadd.f32 %v1599_v57, %v1521_v5  ;;  %v1066_v29 = vadd.f32 %v1034_v58, %v956_v28  ;;  %v705_v44 = vmul.f32 %v4579_v10, %v648_v55  ;;  %v1380_v8 = vmul.f32 %v4570_v50, %v1307_v12  ;;  %v4582_v57 = vld [vmem:[#allocation26_spill] sm:$0xff]  ;;  %v4583_v5 = vld [vmem:[#allocation33_spill] sm:$0xff] }
 0x21a   :  { %v2180_v19 = vadd.f32 %v2148_v40, %v2070_v25  ;;  %v3898_v37 = vmul.f32 %v2335_v22, %v4580_v16  ;;  %v815_v4 = vmul.f32 %v4581_v7, %v758_v54  ;;  %v627_v30 = vadd.f32 %v595_v46, %v485_v1  ;;  %v4584_v40 = vld [vmem:[#allocation17_spill] sm:$0xff] }
 0x21b   :  { %v1741_v56 = vadd.f32 %v1709_v23, %v1631_v62  ;;  %v1176_v14 = vadd.f32 %v1144_v21, %v1066_v29  ;;  %v978_v24 = vperm.slane %v3807_v59, 5  ;;  %v2039_v58 = vmul.f32 %v4582_v57, %v1983_v52  ;;  %v4586_v21 = vld [vmem:[#allocation27_spill] sm:$0xff] }
 0x21c   :  { %2212 = vst [vmem:[#allocation7 + $0x98] sm:$0xff] %v2180_v19  ;;  %v1490_v28 = vmul.f32 %v4583_v5, %v1433_v17  ;;  %v925_v12 = vmul.f32 %v4584_v40, %v4402_v34  ;;  %v737_v22 = vadd.f32 %v705_v44, %v627_v30  ;;  %v1088_v16 = vperm.slane %v3807_v59, 6 }
 0x21d   :  { %v1851_v25 = vadd.f32 %v1819_v51, %v1741_v56  ;;  %v1286_v48 = vadd.f32 %v1254_v13, %v1176_v14  ;;  %v4585_v23 = vperm.slane %v3779_v15, 7  ;;  %v4587_v62 = vperm.slane %v3779_v15, 2 }
 0x21e   :  { %v1198_v46 = vperm.slane %v3807_v59, 7  ;;  %v847_v34 = vadd.f32 %v815_v4, %v737_v22  ;;  %v1035_v14 = vmul.f32 %v4560_v36, %v978_v24  ;;  %v4588_v30 = vperm.slane %v3779_v15, 3  ;;  %v4591_v4 = vld [vmem:[#allocation19_spill] sm:$0xff] }
 0x21f   :  { %v2149_v1 = vmul.f32 %v4586_v21, %v4585_v23  ;;  %v1600_v29 = vmul.f32 %v4573_v61, %v4587_v62  ;;  %v1961_v19 = vadd.f32 %v1929_v38, %v1851_v25  ;;  %v1412_v7 = vadd.f32 %v1380_v8, %v1286_v48 }
 0x220   :  { %v1710_v56 = vmul.f32 %v4575_v0, %v4588_v30  ;;  %v4589_v51 = vperm.slane %v3779_v15, 4  ;;  %v4590_v44 = vperm.slane %v3779_v15, 5  ;;  %v2040_v62 = vmul.f32 %v4559_v6, %v1983_v52 }
 0x221   :  { %v2071_v17 = vadd.f32 %v2039_v58, %v1961_v19  ;;  %v1522_v38 = vadd.f32 %v1490_v28, %v1412_v7  ;;  %v957_v48 = vadd.f32 %v925_v12, %v847_v34  ;;  %v1145_v8 = vmul.f32 %v2678_v26, %v1088_v16 }
 0x222   :  { %v1820_v13 = vmul.f32 %v4576_v18, %v4589_v51  ;;  %v1930_v23 = vmul.f32 %v3181_v47, %v4590_v44  ;;  %v1255_v25 = vmul.f32 %v4591_v4, %v1198_v46  ;;  %v4592_v22 = vperm.slane %v3898_v37, 0 }
 0x223   :  { %v1434_v36 = vperm.slane %v3898_v37, 1  ;;  %v1544_v51 = vperm.slane %v3898_v37, 2  ;;  %v2181_v40 = vadd.f32 %v2149_v1, %v2071_v17  ;;  %v1632_v18 = vadd.f32 %v1600_v29, %v1522_v38 }
 0x224   :  { %v1381_v30 = vmul.f32 %v4561_v63, %v4592_v22  ;;  %v1067_v44 = vadd.f32 %v1035_v14, %v957_v48  ;;  %v486_v52 = vmul.f32 %v2906_v39, %v405_v20  ;;  %v1654_v7 = vperm.slane %v3898_v37, 3 }
 0x225   :  { %v1764_v34 = vperm.slane %v3898_v37, 4  ;;  %v596_v58 = vmul.f32 %v4489_v45, %v538_v49  ;;  %v706_v28 = vmul.f32 %v4480_v2, %v648_v55  ;;  %2213 = vst [vmem:[#allocation7 + $0xa0] sm:$0xff] %v2181_v40  ;;  %v1742_v12 = vadd.f32 %v1710_v56, %v1632_v18 }
 0x226   :  { %v1177_v19 = vadd.f32 %v1145_v8, %v1067_v44  ;;  %v1874_v22 = vperm.slane %v3898_v37, 5  ;;  %v1984_v63 = vperm.slane %v3898_v37, 6  ;;  %v4593_v1 = vperm.slane %v3779_v15, 7 }
 0x227   :  { %v4406_v20 = vperm.slane %v3898_v37, 7  ;;  %v628_v17 = vadd.f32 %v596_v58, %v486_v52  ;;  %v816_v14 = vmul.f32 %v2966_v35, %v758_v54  ;;  %v1852_v38 = vadd.f32 %v1820_v13, %v1742_v12  ;;  %v2336_v12 = vld [vmem:[#allocation5 + $0xc0] sm:$0xff] }
 0x228   :  { %v2150_v29 = vmul.f32 %v4491_v27, %v4593_v1  ;;  %v1287_v49 = vadd.f32 %v1255_v25, %v1177_v19  ;;  %v1491_v55 = vmul.f32 %v4464_v32, %v1434_v36  ;;  %v1601_v18 = vmul.f32 %v4492_v60, %v1544_v51  ;;  %v4595_v19 = vld [vmem:[#allocation13_spill] sm:$0xff] }
 0x229   :  { %v1711_v40 = vmul.f32 %v4578_v42, %v1654_v7  ;;  %v1821_v56 = vmul.f32 %v4565_v3, %v1764_v34  ;;  %v738_v48 = vadd.f32 %v706_v28, %v628_v17  ;;  %v4594_v15 = vperm.slane %v3807_v59, 4 }
 0x22a   :  { %v1962_v44 = vadd.f32 %v1930_v23, %v1852_v38  ;;  %v1413_v1 = vadd.f32 %v1381_v30, %v1287_v49  ;;  %v1931_v52 = vmul.f32 %v4494_v41, %v1874_v22  ;;  %v2041_v54 = vmul.f32 %v4582_v57, %v1984_v63 }
 0x22b   :  { %v926_v8 = vmul.f32 %v2985_v11, %v4594_v15  ;;  %v2151_v13 = vmul.f32 %v4586_v21, %v4406_v20  ;;  %v848_v25 = vadd.f32 %v816_v14, %v738_v48  ;;  %v1036_v58 = vmul.f32 %v4470_v33, %v978_v24 }
 0x22c   :  { %v3960_v28 = vmul.f32 %v2336_v12, %v4595_v19  ;;  %v2072_v59 = vadd.f32 %v2040_v62, %v1962_v44  ;;  %v1523_v17 = vadd.f32 %v1491_v55, %v1413_v1  ;;  %v1146_v23 = vmul.f32 %v3041_v31, %v1088_v16  ;;  %v4597_v1 = vld [vmem:[#allocation14_spill] sm:$0xff] }
 0x22d   :  { %v1256_v30 = vmul.f32 %v4525_v9, %v1198_v46  ;;  %v958_v38 = vadd.f32 %v926_v8, %v848_v25  ;;  %v4596_v8 = vperm.slane %v3898_v37, 0 }
 0x22e   :  { %v406_v49 = vperm.slane %v3960_v28, 0  ;;  %v539_v15 = vperm.slane %v3960_v28, 1  ;;  %v649_v20 = vperm.slane %v3960_v28, 2  ;;  %v2182_v14 = vadd.f32 %v2150_v29, %v2072_v59 }
 0x22f   :  { %v1633_v48 = vadd.f32 %v1601_v18, %v1523_v17  ;;  %v759_v24 = vperm.slane %v3960_v28, 3  ;;  %v1068_v21 = vadd.f32 %v1036_v58, %v958_v38  ;;  %v1382_v44 = vmul.f32 %v4570_v50, %v4596_v8  ;;  %v2337_v18 = vld [vmem:[#allocation5 + $0xc8] sm:$0xff] }
 0x230   :  { %v487_v62 = vmul.f32 %v4510_v43, %v406_v49  ;;  %v597_v16 = vmul.f32 %v4496_v53, %v539_v15  ;;  %v707_v46 = vmul.f32 %v4579_v10, %v649_v20  ;;  %2214 = vst [vmem:[#allocation7 + $0xa8] sm:$0xff] %v2182_v14  ;;  %v1492_v29 = vmul.f32 %v4583_v5, %v1434_v36  ;;  %v4598_v17 = vld [vmem:[#allocation16_spill] sm:$0xff]  ;;  %v4601_v5 = vld [vmem:[#allocation17_spill] sm:$0xff] }
 0x231   :  { %v1743_v55 = vadd.f32 %v1711_v40, %v1633_v48  ;;  %v3977_v25 = vmul.f32 %v2337_v18, %v4597_v1  ;;  %v1178_v59 = vadd.f32 %v1146_v23, %v1068_v21  ;;  %v817_v38 = vmul.f32 %v4598_v17, %v759_v24  ;;  %v4599_v48 = vld [vmem:[#allocation36_spill] sm:$0xff] }
 0x232   :  { %v629_v58 = vadd.f32 %v597_v16, %v487_v62  ;;  %v979_v12 = vperm.slane %v3960_v28, 5  ;;  %v1602_v14 = vmul.f32 %v4573_v61, %v1544_v51  ;;  %v1712_v40 = vmul.f32 %v4575_v0, %v1654_v7 }
 0x233   :  { %v1853_v57 = vadd.f32 %v1821_v56, %v1743_v55  ;;  %v1822_v9 = vmul.f32 %v4599_v48, %v1764_v34  ;;  %v1288_v8 = vadd.f32 %v1256_v30, %v1178_v59  ;;  %v4600_v36 = vperm.slane %v3960_v28, 4  ;;  %v4602_v34 = vld [vmem:[#allocation18_spill] sm:$0xff] }
 0x234   :  { %v739_v50 = vadd.f32 %v707_v46, %v629_v58  ;;  %v1089_v21 = vperm.slane %v3960_v28, 6  ;;  %v1932_v62 = vmul.f32 %v3181_v47, %v1874_v22  ;;  %v4412_v16 = vperm.slane %v3960_v28, 7  ;;  %v2339_v22 = vld [vmem:[#allocation5 + $0xd8] sm:$0xff] }
 0x235   :  { %v927_v18 = vmul.f32 %v4601_v5, %v4600_v36  ;;  %v1963_v23 = vadd.f32 %v1931_v52, %v1853_v57  ;;  %v1414_v51 = vadd.f32 %v1382_v44, %v1288_v8  ;;  %v2042_v7 = vmul.f32 %v4559_v6, %v1984_v63  ;;  %v2338_v36 = vld [vmem:[#allocation5 + $0xd0] sm:$0xff]  ;;  %v4605_v8 = vld [vmem:[#allocation20_spill] sm:$0xff] }
 0x236   :  { %v849_v55 = vadd.f32 %v817_v38, %v739_v50  ;;  %v1037_v30 = vmul.f32 %v4602_v34, %v979_v12  ;;  %v4603_v59 = vperm.slane %v3898_v37, 7  ;;  %v3997_v57 = vmul.f32 %v2338_v36, %v4595_v19 }
 0x237   :  { %v2073_v46 = vadd.f32 %v2041_v54, %v1963_v23  ;;  %v4000_v52 = vmul.f32 %v2339_v22, %v4597_v1  ;;  %v1524_v56 = vadd.f32 %v1492_v29, %v1414_v51  ;;  %v1147_v63 = vmul.f32 %v2678_v26, %v1089_v21 }
 0x238   :  { %v2152_v58 = vmul.f32 %v4491_v27, %v4603_v59  ;;  %v959_v44 = vadd.f32 %v927_v18, %v849_v55  ;;  %v1257_v37 = vmul.f32 %v4591_v4, %v4412_v16  ;;  %v4604_v54 = vperm.slane %v3977_v25, 0 }
 0x239   :  { %v2183_v38 = vadd.f32 %v2151_v13, %v2073_v46  ;;  %v1634_v36 = vadd.f32 %v1602_v14, %v1524_v56  ;;  %v488_v29 = vmul.f32 %v2906_v39, %v406_v49  ;;  %v598_v18 = vmul.f32 %v4489_v45, %v539_v15 }
 0x23a   :  { %v1383_v23 = vmul.f32 %v4605_v8, %v4604_v54  ;;  %v1069_v22 = vadd.f32 %v1037_v30, %v959_v44  ;;  %v1655_v51 = vperm.slane %v3977_v25, 3  ;;  %v4413_v13 = vperm.slane %v3977_v25, 4  ;;  %v2340_v44 = vld [vmem:[#allocation5 + $0xe0] sm:$0xff] }
 0x23b   :  { %2215 = vst [vmem:[#allocation7 + $0xb0] sm:$0xff] %v2183_v38  ;;  %v4414_v55 = vperm.slane %v3977_v25, 5  ;;  %v708_v46 = vmul.f32 %v4480_v2, %v649_v20  ;;  %v1744_v16 = vadd.f32 %v1712_v40, %v1634_v36  ;;  %v630_v54 = vadd.f32 %v598_v18, %v488_v29 }
 0x23c   :  { %v1179_v50 = vadd.f32 %v1147_v63, %v1069_v22  ;;  %v818_v59 = vmul.f32 %v2966_v35, %v759_v24  ;;  %v4606_v14 = vperm.slane %v3977_v25, 1  ;;  %v4607_v15 = vperm.slane %v3977_v25, 2 }
 0x23d   :  { %v4026_v38 = vmul.f32 %v2340_v44, %v4595_v19  ;;  %v1854_v20 = vadd.f32 %v1822_v9, %v1744_v16  ;;  %v740_v63 = vadd.f32 %v708_v46, %v630_v54  ;;  %v4608_v36 = vperm.slane %v3960_v28, 4  ;;  %v4610_v19 = vld [vmem:[#allocation31_spill] sm:$0xff] }
 0x23e   :  { %v1493_v49 = vmul.f32 %v4464_v32, %v4606_v14  ;;  %v1603_v56 = vmul.f32 %v4492_v60, %v4607_v15  ;;  %v1289_v40 = vadd.f32 %v1257_v37, %v1179_v50  ;;  %v1713_v22 = vmul.f32 %v4578_v42, %v1655_v51 }
 0x23f   :  { %v928_v24 = vmul.f32 %v2985_v11, %v4608_v36  ;;  %v1823_v29 = vmul.f32 %v4565_v3, %v4413_v13  ;;  %v1933_v18 = vmul.f32 %v4494_v41, %v4414_v55  ;;  %v1964_v15 = vadd.f32 %v1932_v62, %v1854_v20 }
 0x240   :  { %v1415_v9 = vadd.f32 %v1383_v23, %v1289_v40  ;;  %v850_v16 = vadd.f32 %v818_v59, %v740_v63  ;;  %v1038_v50 = vmul.f32 %v4470_v33, %v979_v12  ;;  %v407_v37 = vperm.slane %v3997_v57, 0 }
 0x241   :  { %v540_v46 = vperm.slane %v3997_v57, 1  ;;  %v650_v54 = vperm.slane %v3997_v57, 2  ;;  %v760_v44 = vperm.slane %v3997_v57, 3  ;;  %v2074_v36 = vadd.f32 %v2042_v7, %v1964_v15 }
 0x242   :  { %v1525_v13 = vadd.f32 %v1493_v49, %v1415_v9  ;;  %v960_v30 = vadd.f32 %v928_v24, %v850_v16  ;;  %v1148_v55 = vmul.f32 %v3041_v31, %v1089_v21  ;;  %v489_v14 = vmul.f32 %v4510_v43, %v407_v37  ;;  %v4612_v49 = vld [vmem:[#allocation26_spill] sm:$0xff] }
 0x243   :  { %v599_v62 = vmul.f32 %v4496_v53, %v540_v46  ;;  %v709_v23 = vmul.f32 %v4579_v10, %v650_v54  ;;  %v870_v12 = vperm.slane %v3997_v57, 4  ;;  %v2184_v59 = vadd.f32 %v2152_v58, %v2074_v36  ;;  %v4614_v58 = vld [vmem:[#allocation27_spill] sm:$0xff] }
 0x244   :  { %v1635_v20 = vadd.f32 %v1603_v56, %v1525_v13  ;;  %v1070_v40 = vadd.f32 %v1038_v50, %v960_v30  ;;  %v4609_v63 = vperm.slane %v3960_v28, 7  ;;  %v4611_v7 = vperm.slane %v3977_v25, 6  ;;  %v4616_v30 = vld [vmem:[#allocation32_spill] sm:$0xff] }
 0x245   :  { %v631_v21 = vadd.f32 %v599_v62, %v489_v14  ;;  %v819_v15 = vmul.f32 %v4598_v17, %v760_v44  ;;  %v980_v9 = vperm.slane %v3997_v57, 5  ;;  %2216 = vst [vmem:[#allocation7 + $0xb8] sm:$0xff] %v2184_v59  ;;  %v4613_v10 = vperm.slane %v3977_v25, 7  ;;  %v4618_v59 = vld [vmem:[#allocation33_spill] sm:$0xff] }
 0x246   :  { %v1258_v1 = vmul.f32 %v4610_v19, %v4609_v63  ;;  %v2043_v24 = vmul.f32 %v4612_v49, %v4611_v7  ;;  %v1745_v16 = vadd.f32 %v1713_v22, %v1635_v20  ;;  %v1180_v56 = vadd.f32 %v1148_v55, %v1070_v40 }
 0x247   :  { %v2153_v13 = vmul.f32 %v4614_v58, %v4613_v10  ;;  %v4615_v28 = vperm.slane %v3977_v25, 0  ;;  %v741_v36 = vadd.f32 %v709_v23, %v631_v21  ;;  %v929_v63 = vmul.f32 %v4601_v5, %v870_v12 }
 0x248   :  { %v1090_v14 = vperm.slane %v3997_v57, 6  ;;  %v1200_v62 = vperm.slane %v3997_v57, 7  ;;  %v1855_v7 = vadd.f32 %v1823_v29, %v1745_v16  ;;  %v1290_v49 = vadd.f32 %v1258_v1, %v1180_v56 }
 0x249   :  { %v1384_v50 = vmul.f32 %v4616_v30, %v4615_v28  ;;  %v4617_v22 = vperm.slane %v3977_v25, 1  ;;  %v4421_v10 = vperm.slane %v4000_v52, 0  ;;  %v4619_v55 = vperm.slane %v3977_v25, 2 }
 0x24a   :  { %v1714_v23 = vmul.f32 %v4575_v0, %v1655_v51  ;;  %v851_v21 = vadd.f32 %v819_v15, %v741_v36  ;;  %v1039_v28 = vmul.f32 %v4602_v34, %v980_v9  ;;  %v1965_v58 = vadd.f32 %v1933_v18, %v1855_v7 }
 0x24b   :  { %v1494_v20 = vmul.f32 %v4618_v59, %v4617_v22  ;;  %v1604_v40 = vmul.f32 %v4573_v61, %v4619_v55  ;;  %v1416_v5 = vadd.f32 %v1384_v50, %v1290_v49  ;;  %v4620_v57 = vperm.slane %v3977_v25, 4 }
 0x24c   :  { %v4621_v29 = vperm.slane %v3977_v25, 5  ;;  %v961_v56 = vadd.f32 %v929_v63, %v851_v21  ;;  %v1149_v22 = vmul.f32 %v2678_v26, %v1090_v14  ;;  %v1259_v55 = vmul.f32 %v4591_v4, %v1200_v62 }
 0x24d   :  { %v1824_v1 = vmul.f32 %v4599_v48, %v4620_v57  ;;  %v1436_v51 = vperm.slane %v4000_v52, 1  ;;  %v2075_v15 = vadd.f32 %v2043_v24, %v1965_v58  ;;  %v1526_v36 = vadd.f32 %v1494_v20, %v1416_v5 }
 0x24e   :  { %v1934_v16 = vmul.f32 %v3181_v47, %v4621_v29  ;;  %v1385_v18 = vmul.f32 %v4605_v8, %v4421_v10  ;;  %v1546_v49 = vperm.slane %v4000_v52, 2  ;;  %v1071_v50 = vadd.f32 %v1039_v28, %v961_v56 }
 0x24f   :  { %v4424_v7 = vperm.slane %v4000_v52, 3  ;;  %v490_v57 = vmul.f32 %v2906_v39, %v407_v37  ;;  %v600_v63 = vmul.f32 %v4489_v45, %v540_v46  ;;  %v2185_v21 = vadd.f32 %v2153_v13, %v2075_v15 }
 0x250   :  { %v1636_v29 = vadd.f32 %v1604_v40, %v1526_v36  ;;  %v4423_v47 = vperm.slane %v4000_v52, 4  ;;  %v710_v24 = vmul.f32 %v4480_v2, %v650_v54  ;;  %v1181_v5 = vadd.f32 %v1149_v22, %v1071_v50 }
 0x251   :  { %v4422_v58 = vperm.slane %v4000_v52, 5  ;;  %v632_v20 = vadd.f32 %v600_v63, %v490_v57  ;;  %v820_v10 = vmul.f32 %v2966_v35, %v760_v44  ;;  %2217 = vst [vmem:[#allocation7 + $0xc0] sm:$0xff] %v2185_v21  ;;  %v4622_v56 = vperm.slane %v3977_v25, 6 }
 0x252   :  { %v1746_v28 = vadd.f32 %v1714_v23, %v1636_v29  ;;  %v4623_v46 = vperm.slane %v3977_v25, 7  ;;  %v1495_v40 = vmul.f32 %v4464_v32, %v1436_v51  ;;  %v1291_v15 = vadd.f32 %v1259_v55, %v1181_v5 }
 0x253   :  { %v2044_v37 = vmul.f32 %v4559_v6, %v4622_v56  ;;  %v4425_v54 = vperm.slane %v4000_v52, 6  ;;  %v742_v22 = vadd.f32 %v710_v24, %v632_v20  ;;  %v930_v36 = vmul.f32 %v2985_v11, %v870_v12 }
 0x254   :  { %v2154_v13 = vmul.f32 %v4491_v27, %v4623_v46  ;;  %v1856_v50 = vadd.f32 %v1824_v1, %v1746_v28  ;;  %v1605_v44 = vmul.f32 %v4492_v60, %v1546_v49  ;;  %v1715_v23 = vmul.f32 %v4578_v42, %v4424_v7 }
 0x255   :  { %v1825_v25 = vmul.f32 %v4565_v3, %v4423_v47  ;;  %v1417_v57 = vadd.f32 %v1385_v18, %v1291_v15  ;;  %v1935_v55 = vmul.f32 %v4494_v41, %v4422_v58  ;;  %v852_v63 = vadd.f32 %v820_v10, %v742_v22 }
 0x256   :  { %v1040_v12 = vmul.f32 %v4470_v33, %v980_v9  ;;  %v1966_v1 = vadd.f32 %v1934_v16, %v1856_v50  ;;  %v1150_v21 = vmul.f32 %v3041_v31, %v1090_v14  ;;  %v1260_v29 = vmul.f32 %v4610_v19, %v1200_v62  ;;  %v4624_v62 = vld [vmem:[#allocation15_spill] sm:$0xff] }
 0x257   :  { %v408_v24 = vperm.slane %v4026_v38, 0  ;;  %v1527_v5 = vadd.f32 %v1495_v40, %v1417_v57  ;;  %v962_v20 = vadd.f32 %v930_v36, %v852_v63  ;;  %v541_v28 = vperm.slane %v4026_v38, 1 }
 0x258   :  { %v651_v18 = vperm.slane %v4026_v38, 2  ;;  %v2076_v56 = vadd.f32 %v2044_v37, %v1966_v1  ;;  %v761_v10 = vperm.slane %v4026_v38, 3  ;;  %v4427_v9 = vperm.slane %v4026_v38, 4 }
 0x259   :  { %v491_v46 = vmul.f32 %v4510_v43, %v408_v24  ;;  %v1637_v16 = vadd.f32 %v1605_v44, %v1527_v5  ;;  %v1072_v15 = vadd.f32 %v1040_v12, %v962_v20  ;;  %v601_v14 = vmul.f32 %v4496_v53, %v541_v28  ;;  %v4626_v44 = vld [vmem:[#allocation26_spill] sm:$0xff]  ;;  %v2341_v5 = vld [vmem:[#allocation5 + $0xe8] sm:$0xff] }
 0x25a   :  { %v711_v22 = vmul.f32 %v4624_v62, %v651_v18  ;;  %v2186_v50 = vadd.f32 %v2154_v13, %v2076_v56  ;;  %v2096_v40 = vperm.slane %v4000_v52, 7  ;;  %v4625_v36 = vperm.slane %v4000_v52, 0  ;;  %v4627_v20 = vld [vmem:[#allocation14_spill] sm:$0xff] }
 0x25b   :  { %v821_v37 = vmul.f32 %v4598_v17, %v761_v10  ;;  %v1747_v63 = vadd.f32 %v1715_v23, %v1637_v16  ;;  %v1182_v1 = vadd.f32 %v1150_v21, %v1072_v15  ;;  %v633_v58 = vadd.f32 %v601_v14, %v491_v46  ;;  %v4629_v15 = vld [vmem:[#allocation27_spill] sm:$0xff] }
 0x25c   :  { %v1386_v57 = vmul.f32 %v4616_v30, %v4625_v36  ;;  %v981_v47 = vperm.slane %v4026_v38, 5  ;;  %2218 = vst [vmem:[#allocation7 + $0xc8] sm:$0xff] %v2186_v50  ;;  %v2045_v12 = vmul.f32 %v4626_v44, %v4425_v54  ;;  %v1496_v13 = vmul.f32 %v4618_v59, %v1436_v51  ;;  %v4628_v36 = vld [vmem:[#allocation17_spill] sm:$0xff] }
 0x25d   :  { %v4138_v56 = vmul.f32 %v2341_v5, %v4627_v20  ;;  %v931_v7 = vmul.f32 %v4628_v36, %v4427_v9  ;;  %v1857_v23 = vadd.f32 %v1825_v25, %v1747_v63  ;;  %v1292_v21 = vadd.f32 %v1260_v29, %v1182_v1 }
 0x25e   :  { %v743_v46 = vadd.f32 %v711_v22, %v633_v58  ;;  %v1091_v16 = vperm.slane %v4026_v38, 6  ;;  %v2155_v14 = vmul.f32 %v4629_v15, %v2096_v40  ;;  %v1606_v50 = vmul.f32 %v4573_v61, %v1546_v49 }
 0x25f   :  { %v1201_v51 = vperm.slane %v4026_v38, 7  ;;  %v1967_v54 = vadd.f32 %v1935_v55, %v1857_v23  ;;  %v1418_v5 = vadd.f32 %v1386_v57, %v1292_v21  ;;  %v1041_v59 = vmul.f32 %v4602_v34, %v981_v47 }
 0x260   :  { %v853_v20 = vadd.f32 %v821_v37, %v743_v46  ;;  %v4630_v9 = vperm.slane %v4000_v52, 3  ;;  %v1311_v58 = vperm.slane %v4138_v56, 0  ;;  %v1151_v1 = vmul.f32 %v2678_v26, %v1091_v16 }
 0x261   :  { %v2077_v29 = vadd.f32 %v2045_v12, %v1967_v54  ;;  %v1528_v22 = vadd.f32 %v1496_v13, %v1418_v5  ;;  %v4631_v49 = vperm.slane %v4000_v52, 4  ;;  %v1261_v55 = vmul.f32 %v4591_v4, %v1201_v51  ;;  %v4633_v54 = vld [vmem:[#allocation37_spill] sm:$0xff] }
 0x262   :  { %v1716_v25 = vmul.f32 %v4575_v0, %v4630_v9  ;;  %v963_v63 = vadd.f32 %v931_v7, %v853_v20  ;;  %v1437_v57 = vperm.slane %v4138_v56, 1  ;;  %v492_v9 = vmul.f32 %v2906_v39, %v408_v24 }
 0x263   :  { %v1826_v61 = vmul.f32 %v4599_v48, %v4631_v49  ;;  %v2187_v37 = vadd.f32 %v2155_v14, %v2077_v29  ;;  %v1638_v23 = vadd.f32 %v1606_v50, %v1528_v22  ;;  %v4632_v46 = vperm.slane %v4000_v52, 5 }
 0x264   :  { %v1073_v21 = vadd.f32 %v1041_v59, %v963_v63  ;;  %v1547_v7 = vperm.slane %v4138_v56, 2  ;;  %v602_v13 = vmul.f32 %v4489_v45, %v541_v28  ;;  %v712_v20 = vmul.f32 %v4480_v2, %v651_v18 }
 0x265   :  { %v1936_v12 = vmul.f32 %v4633_v54, %v4632_v46  ;;  %2219 = vst [vmem:[#allocation7 + $0xd0] sm:$0xff] %v2187_v37  ;;  %v1748_v5 = vadd.f32 %v1716_v25, %v1638_v23  ;;  %v1387_v4 = vmul.f32 %v4605_v8, %v1311_v58  ;;  %v1657_v14 = vperm.slane %v4138_v56, 3 }
 0x266   :  { %v1183_v49 = vadd.f32 %v1151_v1, %v1073_v21  ;;  %v4634_v59 = vperm.slane %v4000_v52, 6  ;;  %v1767_v50 = vperm.slane %v4138_v56, 4  ;;  %v634_v29 = vadd.f32 %v602_v13, %v492_v9 }
 0x267   :  { %v822_v22 = vmul.f32 %v2966_v35, %v761_v10  ;;  %v1858_v63 = vadd.f32 %v1826_v61, %v1748_v5  ;;  %v2156_v28 = vmul.f32 %v4491_v27, %v2096_v40  ;;  %v1497_v25 = vmul.f32 %v4464_v32, %v1437_v57  ;;  %v4636_v5 = vld [vmem:[#allocation13_spill] sm:$0xff] }
 0x268   :  { %v2046_v24 = vmul.f32 %v4559_v6, %v4634_v59  ;;  %v1293_v18 = vadd.f32 %v1261_v55, %v1183_v49  ;;  %v1607_v1 = vmul.f32 %v4492_v60, %v1547_v7  ;;  %v1877_v37 = vperm.slane %v4138_v56, 5 }
 0x269   :  { %v744_v52 = vadd.f32 %v712_v20, %v634_v29  ;;  %v4635_v23 = vperm.slane %v4026_v38, 4  ;;  %v1968_v9 = vadd.f32 %v1936_v12, %v1858_v63  ;;  %v1717_v61 = vmul.f32 %v4578_v42, %v1657_v14  ;;  %v2342_v20 = vld [vmem:[#allocation5 + $0xf0] sm:$0xff] }
 0x26a   :  { %v1419_v46 = vadd.f32 %v1387_v4, %v1293_v18  ;;  %v1987_v10 = vperm.slane %v4138_v56, 6  ;;  %v1827_v40 = vmul.f32 %v4565_v3, %v1767_v50  ;;  %v1042_v13 = vmul.f32 %v4470_v33, %v981_v47 }
 0x26b   :  { %v932_v21 = vmul.f32 %v2985_v11, %v4635_v23  ;;  %v854_v55 = vadd.f32 %v822_v22, %v744_v52  ;;  %v4192_v38 = vmul.f32 %v2342_v20, %v4636_v5  ;;  %v2078_v49 = vadd.f32 %v2046_v24, %v1968_v9 }
 0x26c   :  { %v1529_v12 = vadd.f32 %v1497_v25, %v1419_v46  ;;  %v1152_v4 = vmul.f32 %v3041_v31, %v1091_v16  ;;  %v1262_v59 = vmul.f32 %v4610_v19, %v1201_v51 }
 0x26d   :  { %v964_v29 = vadd.f32 %v932_v21, %v854_v55  ;;  %v409_v63 = vperm.slane %v4192_v38, 0  ;;  %v542_v18 = vperm.slane %v4192_v38, 1  ;;  %v652_v23 = vperm.slane %v4192_v38, 2 }
 0x26e   :  { %v2188_v22 = vadd.f32 %v2156_v28, %v2078_v49  ;;  %v1639_v52 = vadd.f32 %v1607_v1, %v1529_v12  ;;  %v762_v47 = vperm.slane %v4192_v38, 3  ;;  %v872_v20 = vperm.slane %v4192_v38, 4  ;;  %v2343_v49 = vld [vmem:[#allocation5 + $0xf8] sm:$0xff] }
 0x26f   :  { %v1074_v5 = vadd.f32 %v1042_v13, %v964_v29  ;;  %v493_v24 = vmul.f32 %v4510_v43, %v409_v63  ;;  %v603_v16 = vmul.f32 %v4496_v53, %v542_v18  ;;  %v713_v51 = vmul.f32 %v4624_v62, %v652_v23  ;;  %v4637_v62 = vld [vmem:[#allocation33_spill] sm:$0xff]  ;;  %v4638_v12 = vld [vmem:[#allocation14_spill] sm:$0xff] }
 0x270   :  { %2220 = vst [vmem:[#allocation7 + $0xd8] sm:$0xff] %v2188_v22  ;;  %v1749_v25 = vadd.f32 %v1717_v61, %v1639_v52  ;;  %v1937_v21 = vmul.f32 %v4494_v41, %v1877_v37  ;;  %v2097_v28 = vperm.slane %v4138_v56, 7  ;;  %v1388_v1 = vmul.f32 %v4616_v30, %v1311_v58 }
 0x271   :  { %v1184_v9 = vadd.f32 %v1152_v4, %v1074_v5  ;;  %v635_v46 = vadd.f32 %v603_v16, %v493_v24  ;;  %v823_v55 = vmul.f32 %v4598_v17, %v762_v47  ;;  %v982_v43 = vperm.slane %v4192_v38, 5  ;;  %v4639_v16 = vld [vmem:[#allocation34_spill] sm:$0xff] }
 0x272   :  { %v1859_v13 = vadd.f32 %v1827_v40, %v1749_v25  ;;  %v2047_v53 = vmul.f32 %v4626_v44, %v1987_v10  ;;  %v1498_v61 = vmul.f32 %v4637_v62, %v1437_v57  ;;  %v4216_v29 = vmul.f32 %v2343_v49, %v4638_v12 }
 0x273   :  { %v1294_v22 = vadd.f32 %v1262_v59, %v1184_v9  ;;  %v745_v52 = vadd.f32 %v713_v51, %v635_v46  ;;  %v933_v58 = vmul.f32 %v4628_v36, %v872_v20  ;;  %v1092_v4 = vperm.slane %v4192_v38, 6 }
 0x274   :  { %v1969_v17 = vadd.f32 %v1937_v21, %v1859_v13  ;;  %v2157_v5 = vmul.f32 %v4629_v15, %v2097_v28  ;;  %v1202_v40 = vperm.slane %v4192_v38, 7  ;;  %v1608_v57 = vmul.f32 %v4639_v16, %v1547_v7  ;;  %v4640_v7 = vld [vmem:[#allocation19_spill] sm:$0xff] }
 0x275   :  { %v1420_v24 = vadd.f32 %v1388_v1, %v1294_v22  ;;  %v855_v25 = vadd.f32 %v823_v55, %v745_v52  ;;  %v1043_v49 = vmul.f32 %v4602_v34, %v982_v43  ;;  %v1312_v59 = vperm.slane %v4216_v29, 0 }
 0x276   :  { %v2079_v12 = vadd.f32 %v2047_v53, %v1969_v17  ;;  %v1718_v36 = vmul.f32 %v4575_v0, %v1657_v14  ;;  %v1153_v9 = vmul.f32 %v2678_v26, %v1092_v4  ;;  %v1828_v1 = vmul.f32 %v4599_v48, %v1767_v50 }
 0x277   :  { %v1530_v51 = vadd.f32 %v1498_v61, %v1420_v24  ;;  %v965_v21 = vadd.f32 %v933_v58, %v855_v25  ;;  %v1263_v46 = vmul.f32 %v4640_v7, %v1202_v40  ;;  %v1438_v34 = vperm.slane %v4216_v29, 1 }
 0x278   :  { %v2189_v38 = vadd.f32 %v2157_v5, %v2079_v12  ;;  %v494_v53 = vmul.f32 %v2906_v39, %v409_v63  ;;  %v604_v61 = vmul.f32 %v4489_v45, %v542_v18  ;;  %v1938_v26 = vmul.f32 %v4633_v54, %v1877_v37 }
 0x279   :  { %v1640_v55 = vadd.f32 %v1608_v57, %v1530_v51  ;;  %v1075_v13 = vadd.f32 %v1043_v49, %v965_v21  ;;  %v1389_v14 = vmul.f32 %v4605_v8, %v1312_v59  ;;  %v1548_v22 = vperm.slane %v4216_v29, 2 }
 0x27a   :  { %2221 = vst [vmem:[#allocation7 + $0xe0] sm:$0xff] %v2189_v38  ;;  %v714_v50 = vmul.f32 %v4480_v2, %v652_v23  ;;  %v636_v17 = vadd.f32 %v604_v61, %v494_v53  ;;  %v824_v5 = vmul.f32 %v2966_v35, %v762_v47  ;;  %v2048_v39 = vmul.f32 %v4559_v6, %v1987_v10 }
 0x27b   :  { %v1750_v52 = vadd.f32 %v1718_v36, %v1640_v55  ;;  %v1185_v58 = vadd.f32 %v1153_v9, %v1075_v13  ;;  %v1499_v45 = vmul.f32 %v4464_v32, %v1438_v34  ;;  %v1658_v63 = vperm.slane %v4216_v29, 3 }
 0x27c   :  { %v746_v8 = vadd.f32 %v714_v50, %v636_v17  ;;  %v934_v24 = vmul.f32 %v2985_v11, %v872_v20  ;;  %v2158_v2 = vmul.f32 %v4491_v27, %v2097_v28  ;;  %v1609_v23 = vmul.f32 %v4492_v60, %v1548_v22 }
 0x27d   :  { %v1860_v37 = vadd.f32 %v1828_v1, %v1750_v52  ;;  %v1295_v18 = vadd.f32 %v1263_v46, %v1185_v58  ;;  %v1768_v57 = vperm.slane %v4216_v29, 4  ;;  %v1044_v10 = vmul.f32 %v4470_v33, %v982_v43 }
 0x27e   :  { %v856_v56 = vadd.f32 %v824_v5, %v746_v8  ;;  %v1719_v32 = vmul.f32 %v4578_v42, %v1658_v63  ;;  %v1878_v25 = vperm.slane %v4216_v29, 5  ;;  %v1154_v11 = vmul.f32 %v3041_v31, %v1092_v4 }
 0x27f   :  { %v1970_v35 = vadd.f32 %v1938_v26, %v1860_v37  ;;  %v1421_v47 = vadd.f32 %v1389_v14, %v1295_v18  ;;  %v1829_v20 = vmul.f32 %v4565_v3, %v1768_v57  ;;  %v1988_v60 = vperm.slane %v4216_v29, 6 }
 0x280   :  { %v966_v51 = vadd.f32 %v934_v24, %v856_v56  ;;  %v1264_v9 = vmul.f32 %v4610_v19, %v1202_v40  ;;  %v1939_v33 = vmul.f32 %v4494_v41, %v1878_v25  ;;  %v2098_v43 = vperm.slane %v4216_v29, 7 }
 0x281   :  { %v2080_v49 = vadd.f32 %v2048_v39, %v1970_v35  ;;  %v1531_v12 = vadd.f32 %v1499_v45, %v1421_v47  ;;  %v1390_v1 = vmul.f32 %v4616_v30, %v1312_v59  ;;  %v2049_v31 = vmul.f32 %v4626_v44, %v1988_v60 }
 0x282   :  { %v1076_v21 = vadd.f32 %v1044_v10, %v966_v51  ;;  %v1500_v4 = vmul.f32 %v4637_v62, %v1438_v34  ;;  %v2159_v55 = vmul.f32 %v4629_v15, %v2098_v43  ;;  %v1610_v19 = vmul.f32 %v4639_v16, %v1548_v22 }
 0x283   :  { %v2190_v28 = vadd.f32 %v2158_v2, %v2080_v49  ;;  %v1641_v36 = vadd.f32 %v1609_v23, %v1531_v12  ;;  %v1720_v53 = vmul.f32 %v4575_v0, %v1658_v63  ;;  %v1830_v30 = vmul.f32 %v4599_v48, %v1768_v57 }
 0x284   :  { %v1186_v38 = vadd.f32 %v1154_v11, %v1076_v21  ;;  %v1940_v44 = vmul.f32 %v4633_v54, %v1878_v25  ;;  %v2050_v62 = vmul.f32 %v4559_v6, %v1988_v60  ;;  %v2160_v15 = vmul.f32 %v4491_v27, %v2098_v43 }
 0x285   :  { %2222 = vst [vmem:[#allocation7 + $0xe8] sm:$0xff] %v2190_v28  ;;  %v1751_v42 = vadd.f32 %v1719_v32, %v1641_v36 }
 0x286   :  { %v1296_v3 = vadd.f32 %v1264_v9, %v1186_v38 }
 0x287   :  { %v1861_v7 = vadd.f32 %v1829_v20, %v1751_v42 }
 0x288   :  { %v1422_v13 = vadd.f32 %v1390_v1, %v1296_v3 }
 0x289   :  { %v1971_v46 = vadd.f32 %v1939_v33, %v1861_v7 }
 0x28a   :  { %v1532_v40 = vadd.f32 %v1500_v4, %v1422_v13 }
 0x28b   :  { %v2081_v41 = vadd.f32 %v2049_v31, %v1971_v46 }
 0x28c   :  { %v1642_v61 = vadd.f32 %v1610_v19, %v1532_v40 }
 0x28d   :  { %v2191_v29 = vadd.f32 %v2159_v55, %v2081_v41 }
 0x28e   :  { %v1752_v59 = vadd.f32 %v1720_v53, %v1642_v61 }
 0x28f   :  { %2223 = vst [vmem:[#allocation7 + $0xf0] sm:$0xff] %v2191_v29 }
 0x290   :  { %v1862_v26 = vadd.f32 %v1830_v30, %v1752_v59 }
 0x292   :  { %v1972_v34 = vadd.f32 %v1940_v44, %v1862_v26 }
 0x294   :  { %v2082_v0 = vadd.f32 %v2050_v62, %v1972_v34 }
 0x296   :  { %v2192_v16 = vadd.f32 %v2160_v15, %v2082_v0 }
 0x298   :  { %2224 = vst [vmem:[#allocation7 + $0xf8] sm:$0xff] %v2192_v16 }
 0x299   :  { %2237 = dma.vmem_to_hbm [thread:$0]  %s2230_s1, 4096, %s2232_s23, [#allocation4], %s2423_s17, %s2423_s17, %s2424_s18  }
 0x29a   :  { %2420 = dma.done.wait [#allocation4], 4096  }
 0x29b   :  { %2421 = vsyncadd [#allocation4], 4294963200 }
 0x29c   :  { %2242 = vsyncpa [#allocation3], 1 }
 0x29d   :  { %2243 = vsyncpa [#allocation6], 1 }
 0x29e   :  { %2244 = vsyncpa [#allocation4], 1 }

</bundles_post_ra>
